<compile_context>
chip_gen: v5e
topology: v5e:2x2
jax: 0.10.0
libtpu: 0.0.40
codegen_flags: <defaults>
</compile_context>

<pallas_src>
import jax
import jax.numpy as jnp
from jax import lax
from jax.experimental import pallas as pl
from jax.experimental.pallas import tpu as pltpu

# ---- tiny model config ----
B = 2              # batch
S = 8              # sequence length (power of two -> shift for batch-id)
T = B * S          # flattened tokens
H = 128            # hidden size
NH = 4             # attention heads
DH = H // NH       # head dim
FF = 256           # FFN intermediate size
NLAYERS = 2
VOCAB = 100
VOCAB_PAD = 128    # pad vocab to a clean (8,128)-friendly table
NUM_BASETERM = 16
NUM_FACET = 8
NUM_HEAD_OUT = NUM_BASETERM + NUM_FACET
LN_EPS = 1e-12
assert S & (S - 1) == 0
LOG2_S = S.bit_length() - 1

# ---- row layout of the packed (N_VEC_ROWS, H) f32 vector slab ----
ROW_EMB_G, ROW_EMB_B = 0, 1
ROWS_PER_LAYER = 9
(OFF_BQ, OFF_BK, OFF_BV, OFF_BO, OFF_G1, OFF_BE1,
 OFF_B2, OFF_G2, OFF_BE2) = range(ROWS_PER_LAYER)
ROW_HEAD_B = 2 + NLAYERS * ROWS_PER_LAYER          # head biases (padded to 128 lanes)
N_VEC_ROWS = ROW_HEAD_B + 1


def _ln(x, g, b, eps=LN_EPS):
    mu = jnp.mean(x, axis=-1, keepdims=True)
    var = jnp.mean((x - mu) ** 2, axis=-1, keepdims=True)
    return (x - mu) * lax.rsqrt(var + eps) * g + b


def _mxu(a, b):
    """MXU matmul: bf16 operands, f32 accumulation (used by kernel AND reference)."""
    return jnp.dot(a.astype(jnp.bfloat16), b.astype(jnp.bfloat16),
                   preferred_element_type=jnp.float32)


# ---------------------------------------------------------------------------
# Fused forward-pass Pallas kernel (no grid: single invocation)
# ---------------------------------------------------------------------------

def fused_forward_kernel(ids_ref, amask_ref, btlab_ref, facet_ref,
                         emb_ref, vecs_ref, vff_ref,
                         wqkv_ref, wo_ref, wi_ref, w2_ref, headw_ref,
                         out_ref):
    f32 = jnp.float32
    bf16 = jnp.bfloat16

    def vrow(i):                               # (1, H) f32 parameter row from the slab
        return vecs_ref[i:i + 1, :]

    # ---- token embeddings: one-hot gather matmul against the VMEM-resident table ----
    ids = ids_ref[...]                                            # (T, 1) int32
    vocab_iota = lax.broadcasted_iota(jnp.int32, (T, VOCAB_PAD), 1)
    onehot_ids = (vocab_iota == ids).astype(f32)                  # (T, VOCAB_PAD)
    word_tab = emb_ref[0:VOCAB_PAD, :]                            # (VOCAB_PAD, H)
    pos_tab = emb_ref[VOCAB_PAD:VOCAB_PAD + S, :]                 # (S, H)
    type_row = emb_ref[VOCAB_PAD + S:VOCAB_PAD + S + 1, :]        # (1, H)
    emb = (jnp.dot(onehot_ids, word_tab, preferred_element_type=f32)   # exact row select
           + jnp.concatenate([pos_tab] * B, axis=0)
           + type_row)

    x = _ln(emb, vrow(ROW_EMB_G), vrow(ROW_EMB_B))                # (T, H) f32

    # ---- block-diagonal additive attention mask over flattened tokens (T, T) ----
    row_iota = lax.broadcasted_iota(jnp.int32, (T, T), 0)
    col_iota = lax.broadcasted_iota(jnp.int32, (T, T), 1)
    same_batch = (row_iota >> LOG2_S) == (col_iota >> LOG2_S)
    key_valid = amask_ref[...] > 0                                # (1, T)
    mask = jnp.where(same_batch & key_valid, 0.0, -1e9).astype(f32)

    for l in range(NLAYERS):                                      # static unroll
        base = 2 + l * ROWS_PER_LAYER

        # fused QKV projection; 1/sqrt(DH) already folded into wq / bq
        qkv = _mxu(x, wqkv_ref[l])                                # (T, 3H) f32
        q = qkv[:, 0:H] + vrow(base + OFF_BQ)
        k = qkv[:, H:2 * H] + vrow(base + OFF_BK)
        v = qkv[:, 2 * H:3 * H] + vrow(base + OFF_BV)

        q_b = q.astype(bf16)
        kt_b = k.T.astype(bf16)                                   # transpose ONCE per layer
        v_b = v.astype(bf16)

        ctx = []
        for h in range(NH):                                       # tiny per-head matmuls
            c0 = h * DH
            s = jnp.dot(q_b[:, c0:c0 + DH], kt_b[c0:c0 + DH, :],
                        preferred_element_type=f32) + mask        # (T, T)
            s = s - jnp.max(s, axis=-1, keepdims=True)
            p = jnp.exp(s)
            p = p * pl.reciprocal(jnp.sum(p, axis=-1, keepdims=True), approx=True)
            ctx.append(jnp.dot(p.astype(bf16), v_b[:, c0:c0 + DH],
                               preferred_element_type=f32))       # (T, DH)
        ctx_all = jnp.concatenate(ctx, axis=-1)                   # (T, H)

        attn = _mxu(ctx_all, wo_ref[l]) + vrow(base + OFF_BO)     # single K=128 Wo matmul
        x1 = _ln(x + attn, vrow(base + OFF_G1), vrow(base + OFF_BE1))

        hmid = jax.nn.gelu(_mxu(x1, wi_ref[l]) + vff_ref[l:l + 1, :], approximate=True)
        ffn = _mxu(hmid, w2_ref[l]) + vrow(base + OFF_B2)
        x = _ln(x1 + ffn, vrow(base + OFF_G2), vrow(base + OFF_BE2))

    # ---- CLS pooling: token 0 of each batch row (sublane-aligned slices, S=8) ----
    pooled = jnp.concatenate([x[b * S:b * S + 1, :] for b in range(B)], axis=0)   # (B, H)

    # ---- both classifier heads in one matmul ----
    head_b = vrow(ROW_HEAD_B)[:, 0:NUM_HEAD_OUT]                  # (1, 24)
    logits = _mxu(pooled, headw_ref[...]) + head_b                # (B, 24)
    bl = logits[:, 0:NUM_BASETERM]
    fl = logits[:, NUM_BASETERM:NUM_HEAD_OUT]

    # CrossEntropyLoss (mean over batch)
    bt_onehot = (lax.broadcasted_iota(jnp.int32, (B, NUM_BASETERM), 1)
                 == btlab_ref[...]).astype(f32)
    m = jnp.max(bl, axis=-1, keepdims=True)
    lse = m + jnp.log(jnp.sum(jnp.exp(bl - m), axis=-1, keepdims=True))
    picked = jnp.sum(bt_onehot * bl, axis=-1, keepdims=True)
    ce = jnp.sum(lse - picked, axis=(0, 1), keepdims=True) * (1.0 / B)

    # BCEWithLogitsLoss (mean over all elements)
    z = fl
    y = facet_ref[...]
    bce_el = jnp.maximum(z, 0.0) - z * y + jnp.log(1.0 + jnp.exp(-jnp.abs(z)))
    bce = jnp.sum(bce_el, axis=(0, 1), keepdims=True) * (1.0 / (B * NUM_FACET))

    # ---- single lane-padded (8,128) output slab ----
    out_ref[...] = jnp.zeros((8, 128), f32)
    out_ref[0:B, 0:NUM_HEAD_OUT] = logits
    out_ref[B:B + 1, 0:1] = ce + bce


# ---------------------------------------------------------------------------
# wrapper: one pallas_call, tiny reshapes only
# ---------------------------------------------------------------------------

@jax.jit
def model_forward(params, input_ids, attention_mask, baseterm_label, facet_labels):
    ids_col = input_ids.reshape(T, 1).astype(jnp.int32)
    amask_row = attention_mask.reshape(1, T).astype(jnp.int32)
    bt_col = baseterm_label.reshape(B, 1).astype(jnp.int32)
    facet = facet_labels.astype(jnp.float32)

    vmem = pl.BlockSpec(memory_space=pltpu.MemorySpace.VMEM)
    out = pl.pallas_call(
        fused_forward_kernel,
        out_shape=jax.ShapeDtypeStruct((8, 128), jnp.float32),
        in_specs=[vmem] * 12,
        out_specs=vmem,
        compiler_params=pltpu.CompilerParams(vmem_limit_bytes=8 * 1024 * 1024),
    )(ids_col, amask_row, bt_col, facet,
      params["emb_slab"], params["vecs_h"], params["vecs_ff"],
      params["w_qkv"], params["w_o"], params["w_i"], params["w_2"],
      params["head_w"])

    bl = out[0:B, 0:NUM_BASETERM]
    fl = out[0:B, NUM_BASETERM:NUM_HEAD_OUT]
    loss = out[B, 0]
    return {"loss": loss, "baseterm_logits": bl, "facet_logits": fl}


# ---------------------------------------------------------------------------
# deterministic raw init + packing into kernel-friendly slabs
# ---------------------------------------------------------------------------

def init_raw_params(key):
    keys = iter(jax.random.split(key, 64))

    def nrm(shape, scale=0.02):
        return (scale * jax.random.normal(next(keys), shape)).astype(jnp.float32)

    return {
        "word_emb": nrm((VOCAB, H)),
        "pos_emb": nrm((S, H)),
        "type_emb": nrm((2, H)),
        "emb_g": jnp.ones((H,), jnp.float32),
        "emb_b": jnp.zeros((H,), jnp.float32),
        "stacked": {
            "wq": nrm((NLAYERS, H, H)), "bq": nrm((NLAYERS, H)),
            "wk": nrm((NLAYERS, H, H)), "bk": nrm((NLAYERS, H)),
            "wv": nrm((NLAYERS, H, H)), "bv": nrm((NLAYERS, H)),
            "wo": nrm((NLAYERS, H, H)), "bo": nrm((NLAYERS, H)),
            "g1": jnp.ones((NLAYERS, H), jnp.float32),
            "be1": jnp.zeros((NLAYERS, H), jnp.float32),
            "wi": nrm((NLAYERS, H, FF)), "bi": nrm((NLAYERS, FF)),
            "w2": nrm((NLAYERS, FF, H)), "b2": nrm((NLAYERS, H)),
            "g2": jnp.ones((NLAYERS, H), jnp.float32),
            "be2": jnp.zeros((NLAYERS, H), jnp.float32),
        },
        "head": {
            "wb": nrm((H, NUM_BASETERM)), "bb": nrm((NUM_BASETERM,)),
            "wf": nrm((H, NUM_FACET)), "bf": nrm((NUM_FACET,)),
        },
    }


def pack_params(raw):
    scale = 1.0 / (DH ** 0.5)
    st, hd = raw["stacked"], raw["head"]

    word = jnp.zeros((VOCAB_PAD, H), jnp.float32).at[:VOCAB].set(raw["word_emb"])
    emb_slab = jnp.concatenate([word, raw["pos_emb"], raw["type_emb"][0:1]], axis=0)

    rows = [raw["emb_g"][None, :], raw["emb_b"][None, :]]
    for l in range(NLAYERS):
        rows += [(st["bq"][l] * scale)[None, :], st["bk"][l][None, :], st["bv"][l][None, :],
                 st["bo"][l][None, :], st["g1"][l][None, :], st["be1"][l][None, :],
                 st["b2"][l][None, :], st["g2"][l][None, :], st["be2"][l][None, :]]
    head_b = (jnp.zeros((H,), jnp.float32)
              .at[0:NUM_BASETERM].set(hd["bb"])
              .at[NUM_BASETERM:NUM_HEAD_OUT].set(hd["bf"]))
    rows.append(head_b[None, :])
    vecs_h = jnp.concatenate(rows, axis=0)                            # (21, H) f32
    assert vecs_h.shape[0] == N_VEC_ROWS

    return {
        "emb_slab": emb_slab,                                         # (137, H) f32
        "vecs_h": vecs_h,
        "vecs_ff": st["bi"],                                          # (L, FF) f32
        "w_qkv": jnp.concatenate([st["wq"] * scale, st["wk"], st["wv"]],
                                 axis=-1).astype(jnp.bfloat16),       # (L, H, 3H)
        "w_o": st["wo"].astype(jnp.bfloat16),                         # (L, H, H)
        "w_i": st["wi"].astype(jnp.bfloat16),                         # (L, H, FF)
        "w_2": st["w2"].astype(jnp.bfloat16),                         # (L, FF, H)
        "head_w": jnp.concatenate([hd["wb"], hd["wf"]],
                                  axis=-1).astype(jnp.bfloat16),      # (H, 24)
    }


# ---------------------------------------------------------------------------
# pure-JAX reference (standard per-batch multi-head attention, same packed params)
# ---------------------------------------------------------------------------

def ref_forward(params, input_ids, attention_mask, baseterm_label, facet_labels):
    f32 = jnp.float32
    bf16 = jnp.bfloat16
    vh = params["vecs_h"]
    word = params["emb_slab"][:VOCAB_PAD]
    pos = params["emb_slab"][VOCAB_PAD:VOCAB_PAD + S]
    typ = params["emb_slab"][VOCAB_PAD + S]

    emb = word[input_ids] + pos[None, :, :] + typ[None, None, :]
    x = _ln(emb, vh[ROW_EMB_G], vh[ROW_EMB_B])
    bias = (1.0 - attention_mask.astype(f32)) * -1e9                  # (B, S)

    for l in range(NLAYERS):
        base = 2 + l * ROWS_PER_LAYER
        qkv = _mxu(x, params["w_qkv"][l])                             # (B, S, 3H)
        q = qkv[..., 0:H] + vh[base + OFF_BQ]
        k = qkv[..., H:2 * H] + vh[base + OFF_BK]
        v = qkv[..., 2 * H:3 * H] + vh[base + OFF_BV]
        qh = q.reshape(B, S, NH, DH).astype(bf16)
        kh = k.reshape(B, S, NH, DH).astype(bf16)
        vv = v.reshape(B, S, NH, DH).astype(bf16)
        s = jnp.einsum("bqhd,bkhd->bhqk", qh, kh,
                       preferred_element_type=f32) + bias[:, None, None, :]
        p = jax.nn.softmax(s, axis=-1)
        ctx = jnp.einsum("bhqk,bkhd->bqhd", p.astype(bf16), vv,
                         preferred_element_type=f32).reshape(B, S, H)
        attn = _mxu(ctx, params["w_o"][l]) + vh[base + OFF_BO]
        x1 = _ln(x + attn, vh[base + OFF_G1], vh[base + OFF_BE1])
        hmid = jax.nn.gelu(_mxu(x1, params["w_i"][l]) + params["vecs_ff"][l],
                           approximate=True)
        ffn = _mxu(hmid, params["w_2"][l]) + vh[base + OFF_B2]
        x = _ln(x1 + ffn, vh[base + OFF_G2], vh[base + OFF_BE2])

    pooled = x[:, 0]
    logits = _mxu(pooled, params["head_w"]) + vh[ROW_HEAD_B, 0:NUM_HEAD_OUT]
    bl = logits[:, 0:NUM_BASETERM]
    fl = logits[:, NUM_BASETERM:NUM_HEAD_OUT]
    lse = jax.scipy.special.logsumexp(bl, axis=-1)
    oh = jax.nn.one_hot(baseterm_label, NUM_BASETERM, dtype=f32)
    ce = jnp.mean(lse - jnp.sum(oh * bl, axis=-1))
    z, y = fl, facet_labels
    bce = jnp.mean(jnp.maximum(z, 0.0) - z * y + jnp.log(1.0 + jnp.exp(-jnp.abs(z))))
    return bl, fl, ce + bce


if __name__ == "__main__":
    key = jax.random.PRNGKey(0)
    kp, kid, kbl, kfl = jax.random.split(key, 4)
    params = pack_params(init_raw_params(kp))

    input_ids = jax.random.randint(kid, (B, S), 0, VOCAB, dtype=jnp.int32)
    attention_mask = jnp.array([[1] * S, [1] * (S - 2) + [0, 0]], dtype=jnp.int32)
    baseterm_label = jax.random.randint(kbl, (B,), 0, NUM_BASETERM, dtype=jnp.int32)
    facet_labels = jax.random.bernoulli(kfl, 0.3, (B, NUM_FACET)).astype(jnp.float32)

    out = model_forward(params, input_ids, attention_mask, baseterm_label, facet_labels)
    jax.block_until_ready(out)

    rbl, rfl, rloss = ref_forward(params, input_ids, attention_mask,
                                  baseterm_label, facet_labels)
    # tolerance accounts for the EUP approximate reciprocal in the softmax denominator
    # (bf16 MXU operands are identical in kernel and reference, so they add no cross error)
    assert jnp.allclose(out["baseterm_logits"], rbl, atol=2e-3, rtol=2e-3)
    assert jnp.allclose(out["facet_logits"], rfl, atol=2e-3, rtol=2e-3)
    assert jnp.allclose(out["loss"], rloss, atol=2e-3, rtol=2e-3)
    print("KERNEL_OK")
</pallas_src>

<mosaic_0001>
module attributes {stable_mosaic.version = 11 : i64} {
  func.func @fused_forward_kernel(%arg0: memref<16x1xi32, #tpu.memory_space<vmem>>, %arg1: memref<1x16xi32, #tpu.memory_space<vmem>>, %arg2: memref<2x1xi32, #tpu.memory_space<vmem>>, %arg3: memref<2x8xf32, #tpu.memory_space<vmem>>, %arg4: memref<137x128xf32, #tpu.memory_space<vmem>>, %arg5: memref<21x128xf32, #tpu.memory_space<vmem>>, %arg6: memref<2x256xf32, #tpu.memory_space<vmem>>, %arg7: memref<2x128x384xbf16, #tpu.memory_space<vmem>>, %arg8: memref<2x128x128xbf16, #tpu.memory_space<vmem>>, %arg9: memref<2x128x256xbf16, #tpu.memory_space<vmem>>, %arg10: memref<2x256x128xbf16, #tpu.memory_space<vmem>>, %arg11: memref<128x24xbf16, #tpu.memory_space<vmem>>, %arg12: memref<8x128xf32, #tpu.memory_space<vmem>>) attributes {dimension_semantics = [], scalar_prefetch = 0 : i64, scratch_operands = 0 : i64, tpu.core_type = #tpu.core_type<tc>} {
    %c0 = arith.constant 0 : index
    %c0_0 = arith.constant 0 : index
    %0 = vector.load %arg0[%c0, %c0_0] : memref<16x1xi32, #tpu.memory_space<vmem>>, vector<16x1xi32>
    %1 = tpu.iota {dimensions = array<i32: 1>} : vector<16x128xi32>
    %2 = vector.broadcast %0 : vector<16x1xi32> to vector<16x128xi32>
    %3 = arith.cmpi eq, %1, %2 : vector<16x128xi32>
    %4 = arith.extui %3 : vector<16x128xi1> to vector<16x128xi32>
    %5 = arith.sitofp %4 : vector<16x128xi32> to vector<16x128xf32>
    %c0_1 = arith.constant 0 : index
    %c0_2 = arith.constant 0 : index
    %6 = vector.load %arg4[%c0_1, %c0_2] : memref<137x128xf32, #tpu.memory_space<vmem>>, vector<128x128xf32>
    %c128 = arith.constant 128 : index
    %c0_3 = arith.constant 0 : index
    %7 = vector.load %arg4[%c128, %c0_3] : memref<137x128xf32, #tpu.memory_space<vmem>>, vector<8x128xf32>
    %c136 = arith.constant 136 : index
    %c0_4 = arith.constant 0 : index
    %8 = vector.load %arg4[%c136, %c0_4] : memref<137x128xf32, #tpu.memory_space<vmem>>, vector<1x128xf32>
    %cst = arith.constant dense<0.000000e+00> : vector<16x128xf32>
    %9 = tpu.matmul %5, %6, %cst {dimension_numbers = #tpu.dot_dimension_numbers<[1], [0], [0], [1], [0, 0, 1, 1], [], []>} : vector<16x128xf32>, vector<128x128xf32>, vector<16x128xf32> -> vector<16x128xf32>
    %10 = tpu.concatenate %7, %7 in 0 : vector<8x128xf32>, vector<8x128xf32> -> vector<16x128xf32>
    %11 = arith.addf %9, %10 : vector<16x128xf32>
    %12 = vector.broadcast %8 : vector<1x128xf32> to vector<16x128xf32>
    %13 = arith.addf %11, %12 : vector<16x128xf32>
    %c0_5 = arith.constant 0 : index
    %c0_6 = arith.constant 0 : index
    %14 = vector.load %arg5[%c0_5, %c0_6] : memref<21x128xf32, #tpu.memory_space<vmem>>, vector<1x128xf32>
    %c1 = arith.constant 1 : index
    %c0_7 = arith.constant 0 : index
    %15 = vector.load %arg5[%c1, %c0_7] : memref<21x128xf32, #tpu.memory_space<vmem>>, vector<1x128xf32>
    %cst_8 = arith.constant dense<0.000000e+00> : vector<16xf32>
    %16 = vector.multi_reduction <add>, %13, %cst_8 [1] : vector<16x128xf32> to vector<16xf32>
    %17 = vector.shape_cast %16 : vector<16xf32> to vector<16x1xf32>
    %cst_9 = arith.constant 1.280000e+02 : f32
    %18 = vector.broadcast %cst_9 : f32 to vector<16x1xf32>
    %19 = arith.divf %17, %18 : vector<16x1xf32>
    %20 = vector.broadcast %19 : vector<16x1xf32> to vector<16x128xf32>
    %21 = arith.subf %13, %20 : vector<16x128xf32>
    %22 = arith.mulf %21, %21 : vector<16x128xf32>
    %cst_10 = arith.constant dense<0.000000e+00> : vector<16xf32>
    %23 = vector.multi_reduction <add>, %22, %cst_10 [1] : vector<16x128xf32> to vector<16xf32>
    %24 = vector.shape_cast %23 : vector<16xf32> to vector<16x1xf32>
    %cst_11 = arith.constant 1.280000e+02 : f32
    %25 = vector.broadcast %cst_11 : f32 to vector<16x1xf32>
    %26 = arith.divf %24, %25 : vector<16x1xf32>
    %27 = vector.broadcast %19 : vector<16x1xf32> to vector<16x128xf32>
    %28 = arith.subf %13, %27 : vector<16x128xf32>
    %cst_12 = arith.constant 9.99999996E-13 : f32
    %29 = vector.broadcast %cst_12 : f32 to vector<16x1xf32>
    %30 = arith.addf %26, %29 : vector<16x1xf32>
    %31 = math.rsqrt %30 : vector<16x1xf32>
    %32 = vector.broadcast %31 : vector<16x1xf32> to vector<16x128xf32>
    %33 = arith.mulf %28, %32 : vector<16x128xf32>
    %34 = vector.broadcast %14 : vector<1x128xf32> to vector<16x128xf32>
    %35 = arith.mulf %33, %34 : vector<16x128xf32>
    %36 = vector.broadcast %15 : vector<1x128xf32> to vector<16x128xf32>
    %37 = arith.addf %35, %36 : vector<16x128xf32>
    %38 = tpu.iota {dimensions = array<i32: 0>} : vector<16x16xi32>
    %39 = tpu.iota {dimensions = array<i32: 1>} : vector<16x16xi32>
    %c3_i32 = arith.constant 3 : i32
    %40 = vector.broadcast %c3_i32 : i32 to vector<16x16xi32>
    %41 = arith.shrsi %38, %40 : vector<16x16xi32>
    %c3_i32_13 = arith.constant 3 : i32
    %42 = vector.broadcast %c3_i32_13 : i32 to vector<16x16xi32>
    %43 = arith.shrsi %39, %42 : vector<16x16xi32>
    %44 = arith.cmpi eq, %41, %43 : vector<16x16xi32>
    %c0_14 = arith.constant 0 : index
    %c0_15 = arith.constant 0 : index
    %45 = vector.load %arg1[%c0_14, %c0_15] : memref<1x16xi32, #tpu.memory_space<vmem>>, vector<1x16xi32>
    %c0_i32 = arith.constant 0 : i32
    %46 = vector.broadcast %c0_i32 : i32 to vector<1x16xi32>
    %47 = arith.cmpi sgt, %45, %46 : vector<1x16xi32>
    %48 = vector.broadcast %47 : vector<1x16xi1> to vector<16x16xi1>
    %49 = arith.andi %44, %48 : vector<16x16xi1>
    %cst_16 = arith.constant 0.000000e+00 : f32
    %cst_17 = arith.constant -1.000000e+09 : f32
    %50 = vector.broadcast %cst_16 : f32 to vector<16x16xf32>
    %51 = vector.broadcast %cst_17 : f32 to vector<16x16xf32>
    %52 = arith.select %49, %50, %51 : vector<16x16xi1>, vector<16x16xf32>
    %c0_18 = arith.constant 0 : index
    %c0_19 = arith.constant 0 : index
    %c0_20 = arith.constant 0 : index
    %53 = vector.load %arg7[%c0_18, %c0_19, %c0_20] : memref<2x128x384xbf16, #tpu.memory_space<vmem>>, vector<1x128x384xbf16>
    %54 = vector.shape_cast %53 : vector<1x128x384xbf16> to vector<128x384xbf16>
    %55 = arith.truncf %37 : vector<16x128xf32> to vector<16x128xbf16>
    %cst_21 = arith.constant dense<0.000000e+00> : vector<16x384xf32>
    %56 = tpu.matmul %55, %54, %cst_21 {dimension_numbers = #tpu.dot_dimension_numbers<[1], [0], [0], [1], [0, 0, 1, 1], [], []>} : vector<16x128xbf16>, vector<128x384xbf16>, vector<16x384xf32> -> vector<16x384xf32>
    %57 = vector.extract_strided_slice %56 {offsets = [0, 0], sizes = [16, 128], strides = [1, 1]} : vector<16x384xf32> to vector<16x128xf32>
    %c2 = arith.constant 2 : index
    %c0_22 = arith.constant 0 : index
    %58 = vector.load %arg5[%c2, %c0_22] : memref<21x128xf32, #tpu.memory_space<vmem>>, vector<1x128xf32>
    %59 = vector.broadcast %58 : vector<1x128xf32> to vector<16x128xf32>
    %60 = arith.addf %57, %59 : vector<16x128xf32>
    %61 = vector.extract_strided_slice %56 {offsets = [0, 128], sizes = [16, 128], strides = [1, 1]} : vector<16x384xf32> to vector<16x128xf32>
    %c3 = arith.constant 3 : index
    %c0_23 = arith.constant 0 : index
    %62 = vector.load %arg5[%c3, %c0_23] : memref<21x128xf32, #tpu.memory_space<vmem>>, vector<1x128xf32>
    %63 = vector.broadcast %62 : vector<1x128xf32> to vector<16x128xf32>
    %64 = arith.addf %61, %63 : vector<16x128xf32>
    %65 = vector.extract_strided_slice %56 {offsets = [0, 256], sizes = [16, 128], strides = [1, 1]} : vector<16x384xf32> to vector<16x128xf32>
    %c4 = arith.constant 4 : index
    %c0_24 = arith.constant 0 : index
    %66 = vector.load %arg5[%c4, %c0_24] : memref<21x128xf32, #tpu.memory_space<vmem>>, vector<1x128xf32>
    %67 = vector.broadcast %66 : vector<1x128xf32> to vector<16x128xf32>
    %68 = arith.addf %65, %67 : vector<16x128xf32>
    %69 = arith.truncf %60 : vector<16x128xf32> to vector<16x128xbf16>
    %70 = tpu.transpose %64, [1, 0] : vector<16x128xf32> -> vector<128x16xf32>
    %71 = arith.truncf %70 : vector<128x16xf32> to vector<128x16xbf16>
    %72 = arith.truncf %68 : vector<16x128xf32> to vector<16x128xbf16>
    %73 = vector.extract_strided_slice %69 {offsets = [0, 0], sizes = [16, 32], strides = [1, 1]} : vector<16x128xbf16> to vector<16x32xbf16>
    %74 = vector.extract_strided_slice %71 {offsets = [0, 0], sizes = [32, 16], strides = [1, 1]} : vector<128x16xbf16> to vector<32x16xbf16>
    %cst_25 = arith.constant dense<0.000000e+00> : vector<16x16xf32>
    %75 = tpu.matmul %73, %74, %cst_25 {dimension_numbers = #tpu.dot_dimension_numbers<[1], [0], [0], [1], [0, 0, 1, 1], [], []>} : vector<16x32xbf16>, vector<32x16xbf16>, vector<16x16xf32> -> vector<16x16xf32>
    %76 = arith.addf %75, %52 : vector<16x16xf32>
    %cst_26 = arith.constant dense<0xFF800000> : vector<16xf32>
    %77 = vector.multi_reduction <maximumf>, %76, %cst_26 [1] : vector<16x16xf32> to vector<16xf32>
    %78 = vector.shape_cast %77 : vector<16xf32> to vector<16x1xf32>
    %79 = vector.broadcast %78 : vector<16x1xf32> to vector<16x16xf32>
    %80 = arith.subf %76, %79 : vector<16x16xf32>
    %81 = math.exp %80 : vector<16x16xf32>
    %cst_27 = arith.constant dense<0.000000e+00> : vector<16xf32>
    %82 = vector.multi_reduction <add>, %81, %cst_27 [1] : vector<16x16xf32> to vector<16xf32>
    %83 = vector.shape_cast %82 : vector<16xf32> to vector<16x1xf32>
    %84 = tpu.reciprocal %83 {approx = true} : vector<16x1xf32> -> vector<16x1xf32>
    %85 = vector.broadcast %84 : vector<16x1xf32> to vector<16x16xf32>
    %86 = arith.mulf %81, %85 : vector<16x16xf32>
    %87 = arith.truncf %86 : vector<16x16xf32> to vector<16x16xbf16>
    %88 = vector.extract_strided_slice %72 {offsets = [0, 0], sizes = [16, 32], strides = [1, 1]} : vector<16x128xbf16> to vector<16x32xbf16>
    %cst_28 = arith.constant dense<0.000000e+00> : vector<16x32xf32>
    %89 = tpu.matmul %87, %88, %cst_28 {dimension_numbers = #tpu.dot_dimension_numbers<[1], [0], [0], [1], [0, 0, 1, 1], [], []>} : vector<16x16xbf16>, vector<16x32xbf16>, vector<16x32xf32> -> vector<16x32xf32>
    %90 = vector.extract_strided_slice %69 {offsets = [0, 32], sizes = [16, 32], strides = [1, 1]} : vector<16x128xbf16> to vector<16x32xbf16>
    %91 = vector.extract_strided_slice %71 {offsets = [32, 0], sizes = [32, 16], strides = [1, 1]} : vector<128x16xbf16> to vector<32x16xbf16>
    %cst_29 = arith.constant dense<0.000000e+00> : vector<16x16xf32>
    %92 = tpu.matmul %90, %91, %cst_29 {dimension_numbers = #tpu.dot_dimension_numbers<[1], [0], [0], [1], [0, 0, 1, 1], [], []>} : vector<16x32xbf16>, vector<32x16xbf16>, vector<16x16xf32> -> vector<16x16xf32>
    %93 = arith.addf %92, %52 : vector<16x16xf32>
    %cst_30 = arith.constant dense<0xFF800000> : vector<16xf32>
    %94 = vector.multi_reduction <maximumf>, %93, %cst_30 [1] : vector<16x16xf32> to vector<16xf32>
    %95 = vector.shape_cast %94 : vector<16xf32> to vector<16x1xf32>
    %96 = vector.broadcast %95 : vector<16x1xf32> to vector<16x16xf32>
    %97 = arith.subf %93, %96 : vector<16x16xf32>
    %98 = math.exp %97 : vector<16x16xf32>
    %cst_31 = arith.constant dense<0.000000e+00> : vector<16xf32>
    %99 = vector.multi_reduction <add>, %98, %cst_31 [1] : vector<16x16xf32> to vector<16xf32>
    %100 = vector.shape_cast %99 : vector<16xf32> to vector<16x1xf32>
    %101 = tpu.reciprocal %100 {approx = true} : vector<16x1xf32> -> vector<16x1xf32>
    %102 = vector.broadcast %101 : vector<16x1xf32> to vector<16x16xf32>
    %103 = arith.mulf %98, %102 : vector<16x16xf32>
    %104 = arith.truncf %103 : vector<16x16xf32> to vector<16x16xbf16>
    %105 = vector.extract_strided_slice %72 {offsets = [0, 32], sizes = [16, 32], strides = [1, 1]} : vector<16x128xbf16> to vector<16x32xbf16>
    %cst_32 = arith.constant dense<0.000000e+00> : vector<16x32xf32>
    %106 = tpu.matmul %104, %105, %cst_32 {dimension_numbers = #tpu.dot_dimension_numbers<[1], [0], [0], [1], [0, 0, 1, 1], [], []>} : vector<16x16xbf16>, vector<16x32xbf16>, vector<16x32xf32> -> vector<16x32xf32>
    %107 = vector.extract_strided_slice %69 {offsets = [0, 64], sizes = [16, 32], strides = [1, 1]} : vector<16x128xbf16> to vector<16x32xbf16>
    %108 = vector.extract_strided_slice %71 {offsets = [64, 0], sizes = [32, 16], strides = [1, 1]} : vector<128x16xbf16> to vector<32x16xbf16>
    %cst_33 = arith.constant dense<0.000000e+00> : vector<16x16xf32>
    %109 = tpu.matmul %107, %108, %cst_33 {dimension_numbers = #tpu.dot_dimension_numbers<[1], [0], [0], [1], [0, 0, 1, 1], [], []>} : vector<16x32xbf16>, vector<32x16xbf16>, vector<16x16xf32> -> vector<16x16xf32>
    %110 = arith.addf %109, %52 : vector<16x16xf32>
    %cst_34 = arith.constant dense<0xFF800000> : vector<16xf32>
    %111 = vector.multi_reduction <maximumf>, %110, %cst_34 [1] : vector<16x16xf32> to vector<16xf32>
    %112 = vector.shape_cast %111 : vector<16xf32> to vector<16x1xf32>
    %113 = vector.broadcast %112 : vector<16x1xf32> to vector<16x16xf32>
    %114 = arith.subf %110, %113 : vector<16x16xf32>
    %115 = math.exp %114 : vector<16x16xf32>
    %cst_35 = arith.constant dense<0.000000e+00> : vector<16xf32>
    %116 = vector.multi_reduction <add>, %115, %cst_35 [1] : vector<16x16xf32> to vector<16xf32>
    %117 = vector.shape_cast %116 : vector<16xf32> to vector<16x1xf32>
    %118 = tpu.reciprocal %117 {approx = true} : vector<16x1xf32> -> vector<16x1xf32>
    %119 = vector.broadcast %118 : vector<16x1xf32> to vector<16x16xf32>
    %120 = arith.mulf %115, %119 : vector<16x16xf32>
    %121 = arith.truncf %120 : vector<16x16xf32> to vector<16x16xbf16>
    %122 = vector.extract_strided_slice %72 {offsets = [0, 64], sizes = [16, 32], strides = [1, 1]} : vector<16x128xbf16> to vector<16x32xbf16>
    %cst_36 = arith.constant dense<0.000000e+00> : vector<16x32xf32>
    %123 = tpu.matmul %121, %122, %cst_36 {dimension_numbers = #tpu.dot_dimension_numbers<[1], [0], [0], [1], [0, 0, 1, 1], [], []>} : vector<16x16xbf16>, vector<16x32xbf16>, vector<16x32xf32> -> vector<16x32xf32>
    %124 = vector.extract_strided_slice %69 {offsets = [0, 96], sizes = [16, 32], strides = [1, 1]} : vector<16x128xbf16> to vector<16x32xbf16>
    %125 = vector.extract_strided_slice %71 {offsets = [96, 0], sizes = [32, 16], strides = [1, 1]} : vector<128x16xbf16> to vector<32x16xbf16>
    %cst_37 = arith.constant dense<0.000000e+00> : vector<16x16xf32>
    %126 = tpu.matmul %124, %125, %cst_37 {dimension_numbers = #tpu.dot_dimension_numbers<[1], [0], [0], [1], [0, 0, 1, 1], [], []>} : vector<16x32xbf16>, vector<32x16xbf16>, vector<16x16xf32> -> vector<16x16xf32>
    %127 = arith.addf %126, %52 : vector<16x16xf32>
    %cst_38 = arith.constant dense<0xFF800000> : vector<16xf32>
    %128 = vector.multi_reduction <maximumf>, %127, %cst_38 [1] : vector<16x16xf32> to vector<16xf32>
    %129 = vector.shape_cast %128 : vector<16xf32> to vector<16x1xf32>
    %130 = vector.broadcast %129 : vector<16x1xf32> to vector<16x16xf32>
    %131 = arith.subf %127, %130 : vector<16x16xf32>
    %132 = math.exp %131 : vector<16x16xf32>
    %cst_39 = arith.constant dense<0.000000e+00> : vector<16xf32>
    %133 = vector.multi_reduction <add>, %132, %cst_39 [1] : vector<16x16xf32> to vector<16xf32>
    %134 = vector.shape_cast %133 : vector<16xf32> to vector<16x1xf32>
    %135 = tpu.reciprocal %134 {approx = true} : vector<16x1xf32> -> vector<16x1xf32>
    %136 = vector.broadcast %135 : vector<16x1xf32> to vector<16x16xf32>
    %137 = arith.mulf %132, %136 : vector<16x16xf32>
    %138 = arith.truncf %137 : vector<16x16xf32> to vector<16x16xbf16>
    %139 = vector.extract_strided_slice %72 {offsets = [0, 96], sizes = [16, 32], strides = [1, 1]} : vector<16x128xbf16> to vector<16x32xbf16>
    %cst_40 = arith.constant dense<0.000000e+00> : vector<16x32xf32>
    %140 = tpu.matmul %138, %139, %cst_40 {dimension_numbers = #tpu.dot_dimension_numbers<[1], [0], [0], [1], [0, 0, 1, 1], [], []>} : vector<16x16xbf16>, vector<16x32xbf16>, vector<16x32xf32> -> vector<16x32xf32>
    %141 = tpu.concatenate %89, %106, %123, %140 in 1 : vector<16x32xf32>, vector<16x32xf32>, vector<16x32xf32>, vector<16x32xf32> -> vector<16x128xf32>
    %c0_41 = arith.constant 0 : index
    %c0_42 = arith.constant 0 : index
    %c0_43 = arith.constant 0 : index
    %142 = vector.load %arg8[%c0_41, %c0_42, %c0_43] : memref<2x128x128xbf16, #tpu.memory_space<vmem>>, vector<1x128x128xbf16>
    %143 = vector.shape_cast %142 : vector<1x128x128xbf16> to vector<128x128xbf16>
    %144 = arith.truncf %141 : vector<16x128xf32> to vector<16x128xbf16>
    %cst_44 = arith.constant dense<0.000000e+00> : vector<16x128xf32>
    %145 = tpu.matmul %144, %143, %cst_44 {dimension_numbers = #tpu.dot_dimension_numbers<[1], [0], [0], [1], [0, 0, 1, 1], [], []>} : vector<16x128xbf16>, vector<128x128xbf16>, vector<16x128xf32> -> vector<16x128xf32>
    %c5 = arith.constant 5 : index
    %c0_45 = arith.constant 0 : index
    %146 = vector.load %arg5[%c5, %c0_45] : memref<21x128xf32, #tpu.memory_space<vmem>>, vector<1x128xf32>
    %147 = vector.broadcast %146 : vector<1x128xf32> to vector<16x128xf32>
    %148 = arith.addf %145, %147 : vector<16x128xf32>
    %149 = arith.addf %37, %148 : vector<16x128xf32>
    %c6 = arith.constant 6 : index
    %c0_46 = arith.constant 0 : index
    %150 = vector.load %arg5[%c6, %c0_46] : memref<21x128xf32, #tpu.memory_space<vmem>>, vector<1x128xf32>
    %c7 = arith.constant 7 : index
    %c0_47 = arith.constant 0 : index
    %151 = vector.load %arg5[%c7, %c0_47] : memref<21x128xf32, #tpu.memory_space<vmem>>, vector<1x128xf32>
    %cst_48 = arith.constant dense<0.000000e+00> : vector<16xf32>
    %152 = vector.multi_reduction <add>, %149, %cst_48 [1] : vector<16x128xf32> to vector<16xf32>
    %153 = vector.shape_cast %152 : vector<16xf32> to vector<16x1xf32>
    %cst_49 = arith.constant 1.280000e+02 : f32
    %154 = vector.broadcast %cst_49 : f32 to vector<16x1xf32>
    %155 = arith.divf %153, %154 : vector<16x1xf32>
    %156 = vector.broadcast %155 : vector<16x1xf32> to vector<16x128xf32>
    %157 = arith.subf %149, %156 : vector<16x128xf32>
    %158 = arith.mulf %157, %157 : vector<16x128xf32>
    %cst_50 = arith.constant dense<0.000000e+00> : vector<16xf32>
    %159 = vector.multi_reduction <add>, %158, %cst_50 [1] : vector<16x128xf32> to vector<16xf32>
    %160 = vector.shape_cast %159 : vector<16xf32> to vector<16x1xf32>
    %cst_51 = arith.constant 1.280000e+02 : f32
    %161 = vector.broadcast %cst_51 : f32 to vector<16x1xf32>
    %162 = arith.divf %160, %161 : vector<16x1xf32>
    %163 = vector.broadcast %155 : vector<16x1xf32> to vector<16x128xf32>
    %164 = arith.subf %149, %163 : vector<16x128xf32>
    %cst_52 = arith.constant 9.99999996E-13 : f32
    %165 = vector.broadcast %cst_52 : f32 to vector<16x1xf32>
    %166 = arith.addf %162, %165 : vector<16x1xf32>
    %167 = math.rsqrt %166 : vector<16x1xf32>
    %168 = vector.broadcast %167 : vector<16x1xf32> to vector<16x128xf32>
    %169 = arith.mulf %164, %168 : vector<16x128xf32>
    %170 = vector.broadcast %150 : vector<1x128xf32> to vector<16x128xf32>
    %171 = arith.mulf %169, %170 : vector<16x128xf32>
    %172 = vector.broadcast %151 : vector<1x128xf32> to vector<16x128xf32>
    %173 = arith.addf %171, %172 : vector<16x128xf32>
    %c0_53 = arith.constant 0 : index
    %c0_54 = arith.constant 0 : index
    %c0_55 = arith.constant 0 : index
    %174 = vector.load %arg9[%c0_53, %c0_54, %c0_55] : memref<2x128x256xbf16, #tpu.memory_space<vmem>>, vector<1x128x256xbf16>
    %175 = vector.shape_cast %174 : vector<1x128x256xbf16> to vector<128x256xbf16>
    %176 = arith.truncf %173 : vector<16x128xf32> to vector<16x128xbf16>
    %cst_56 = arith.constant dense<0.000000e+00> : vector<16x256xf32>
    %177 = tpu.matmul %176, %175, %cst_56 {dimension_numbers = #tpu.dot_dimension_numbers<[1], [0], [0], [1], [0, 0, 1, 1], [], []>} : vector<16x128xbf16>, vector<128x256xbf16>, vector<16x256xf32> -> vector<16x256xf32>
    %c0_57 = arith.constant 0 : index
    %c0_58 = arith.constant 0 : index
    %178 = vector.load %arg6[%c0_57, %c0_58] : memref<2x256xf32, #tpu.memory_space<vmem>>, vector<1x256xf32>
    %179 = vector.broadcast %178 : vector<1x256xf32> to vector<16x256xf32>
    %180 = arith.addf %177, %179 : vector<16x256xf32>
    %181 = arith.mulf %180, %180 : vector<16x256xf32>
    %182 = arith.mulf %180, %181 : vector<16x256xf32>
    %cst_59 = arith.constant 4.471500e-02 : f32
    %183 = vector.broadcast %cst_59 : f32 to vector<16x256xf32>
    %184 = arith.mulf %183, %182 : vector<16x256xf32>
    %185 = arith.addf %180, %184 : vector<16x256xf32>
    %cst_60 = arith.constant 0.797884583 : f32
    %186 = vector.broadcast %cst_60 : f32 to vector<16x256xf32>
    %187 = arith.mulf %186, %185 : vector<16x256xf32>
    %188 = math.tanh %187 : vector<16x256xf32>
    %cst_61 = arith.constant 1.000000e+00 : f32
    %189 = vector.broadcast %cst_61 : f32 to vector<16x256xf32>
    %190 = arith.addf %189, %188 : vector<16x256xf32>
    %cst_62 = arith.constant 5.000000e-01 : f32
    %191 = vector.broadcast %cst_62 : f32 to vector<16x256xf32>
    %192 = arith.mulf %191, %190 : vector<16x256xf32>
    %193 = arith.mulf %180, %192 : vector<16x256xf32>
    %c0_63 = arith.constant 0 : index
    %c0_64 = arith.constant 0 : index
    %c0_65 = arith.constant 0 : index
    %194 = vector.load %arg10[%c0_63, %c0_64, %c0_65] : memref<2x256x128xbf16, #tpu.memory_space<vmem>>, vector<1x256x128xbf16>
    %195 = vector.shape_cast %194 : vector<1x256x128xbf16> to vector<256x128xbf16>
    %196 = arith.truncf %193 : vector<16x256xf32> to vector<16x256xbf16>
    %cst_66 = arith.constant dense<0.000000e+00> : vector<16x128xf32>
    %197 = tpu.matmul %196, %195, %cst_66 {dimension_numbers = #tpu.dot_dimension_numbers<[1], [0], [0], [1], [0, 0, 1, 1], [], []>} : vector<16x256xbf16>, vector<256x128xbf16>, vector<16x128xf32> -> vector<16x128xf32>
    %c8 = arith.constant 8 : index
    %c0_67 = arith.constant 0 : index
    %198 = vector.load %arg5[%c8, %c0_67] : memref<21x128xf32, #tpu.memory_space<vmem>>, vector<1x128xf32>
    %199 = vector.broadcast %198 : vector<1x128xf32> to vector<16x128xf32>
    %200 = arith.addf %197, %199 : vector<16x128xf32>
    %201 = arith.addf %173, %200 : vector<16x128xf32>
    %c9 = arith.constant 9 : index
    %c0_68 = arith.constant 0 : index
    %202 = vector.load %arg5[%c9, %c0_68] : memref<21x128xf32, #tpu.memory_space<vmem>>, vector<1x128xf32>
    %c10 = arith.constant 10 : index
    %c0_69 = arith.constant 0 : index
    %203 = vector.load %arg5[%c10, %c0_69] : memref<21x128xf32, #tpu.memory_space<vmem>>, vector<1x128xf32>
    %cst_70 = arith.constant dense<0.000000e+00> : vector<16xf32>
    %204 = vector.multi_reduction <add>, %201, %cst_70 [1] : vector<16x128xf32> to vector<16xf32>
    %205 = vector.shape_cast %204 : vector<16xf32> to vector<16x1xf32>
    %cst_71 = arith.constant 1.280000e+02 : f32
    %206 = vector.broadcast %cst_71 : f32 to vector<16x1xf32>
    %207 = arith.divf %205, %206 : vector<16x1xf32>
    %208 = vector.broadcast %207 : vector<16x1xf32> to vector<16x128xf32>
    %209 = arith.subf %201, %208 : vector<16x128xf32>
    %210 = arith.mulf %209, %209 : vector<16x128xf32>
    %cst_72 = arith.constant dense<0.000000e+00> : vector<16xf32>
    %211 = vector.multi_reduction <add>, %210, %cst_72 [1] : vector<16x128xf32> to vector<16xf32>
    %212 = vector.shape_cast %211 : vector<16xf32> to vector<16x1xf32>
    %cst_73 = arith.constant 1.280000e+02 : f32
    %213 = vector.broadcast %cst_73 : f32 to vector<16x1xf32>
    %214 = arith.divf %212, %213 : vector<16x1xf32>
    %215 = vector.broadcast %207 : vector<16x1xf32> to vector<16x128xf32>
    %216 = arith.subf %201, %215 : vector<16x128xf32>
    %cst_74 = arith.constant 9.99999996E-13 : f32
    %217 = vector.broadcast %cst_74 : f32 to vector<16x1xf32>
    %218 = arith.addf %214, %217 : vector<16x1xf32>
    %219 = math.rsqrt %218 : vector<16x1xf32>
    %220 = vector.broadcast %219 : vector<16x1xf32> to vector<16x128xf32>
    %221 = arith.mulf %216, %220 : vector<16x128xf32>
    %222 = vector.broadcast %202 : vector<1x128xf32> to vector<16x128xf32>
    %223 = arith.mulf %221, %222 : vector<16x128xf32>
    %224 = vector.broadcast %203 : vector<1x128xf32> to vector<16x128xf32>
    %225 = arith.addf %223, %224 : vector<16x128xf32>
    %c1_75 = arith.constant 1 : index
    %c0_76 = arith.constant 0 : index
    %c0_77 = arith.constant 0 : index
    %226 = vector.load %arg7[%c1_75, %c0_76, %c0_77] : memref<2x128x384xbf16, #tpu.memory_space<vmem>>, vector<1x128x384xbf16>
    %227 = vector.shape_cast %226 : vector<1x128x384xbf16> to vector<128x384xbf16>
    %228 = arith.truncf %225 : vector<16x128xf32> to vector<16x128xbf16>
    %cst_78 = arith.constant dense<0.000000e+00> : vector<16x384xf32>
    %229 = tpu.matmul %228, %227, %cst_78 {dimension_numbers = #tpu.dot_dimension_numbers<[1], [0], [0], [1], [0, 0, 1, 1], [], []>} : vector<16x128xbf16>, vector<128x384xbf16>, vector<16x384xf32> -> vector<16x384xf32>
    %230 = vector.extract_strided_slice %229 {offsets = [0, 0], sizes = [16, 128], strides = [1, 1]} : vector<16x384xf32> to vector<16x128xf32>
    %c11 = arith.constant 11 : index
    %c0_79 = arith.constant 0 : index
    %231 = vector.load %arg5[%c11, %c0_79] : memref<21x128xf32, #tpu.memory_space<vmem>>, vector<1x128xf32>
    %232 = vector.broadcast %231 : vector<1x128xf32> to vector<16x128xf32>
    %233 = arith.addf %230, %232 : vector<16x128xf32>
    %234 = vector.extract_strided_slice %229 {offsets = [0, 128], sizes = [16, 128], strides = [1, 1]} : vector<16x384xf32> to vector<16x128xf32>
    %c12 = arith.constant 12 : index
    %c0_80 = arith.constant 0 : index
    %235 = vector.load %arg5[%c12, %c0_80] : memref<21x128xf32, #tpu.memory_space<vmem>>, vector<1x128xf32>
    %236 = vector.broadcast %235 : vector<1x128xf32> to vector<16x128xf32>
    %237 = arith.addf %234, %236 : vector<16x128xf32>
    %238 = vector.extract_strided_slice %229 {offsets = [0, 256], sizes = [16, 128], strides = [1, 1]} : vector<16x384xf32> to vector<16x128xf32>
    %c13 = arith.constant 13 : index
    %c0_81 = arith.constant 0 : index
    %239 = vector.load %arg5[%c13, %c0_81] : memref<21x128xf32, #tpu.memory_space<vmem>>, vector<1x128xf32>
    %240 = vector.broadcast %239 : vector<1x128xf32> to vector<16x128xf32>
    %241 = arith.addf %238, %240 : vector<16x128xf32>
    %242 = arith.truncf %233 : vector<16x128xf32> to vector<16x128xbf16>
    %243 = tpu.transpose %237, [1, 0] : vector<16x128xf32> -> vector<128x16xf32>
    %244 = arith.truncf %243 : vector<128x16xf32> to vector<128x16xbf16>
    %245 = arith.truncf %241 : vector<16x128xf32> to vector<16x128xbf16>
    %246 = vector.extract_strided_slice %242 {offsets = [0, 0], sizes = [16, 32], strides = [1, 1]} : vector<16x128xbf16> to vector<16x32xbf16>
    %247 = vector.extract_strided_slice %244 {offsets = [0, 0], sizes = [32, 16], strides = [1, 1]} : vector<128x16xbf16> to vector<32x16xbf16>
    %cst_82 = arith.constant dense<0.000000e+00> : vector<16x16xf32>
    %248 = tpu.matmul %246, %247, %cst_82 {dimension_numbers = #tpu.dot_dimension_numbers<[1], [0], [0], [1], [0, 0, 1, 1], [], []>} : vector<16x32xbf16>, vector<32x16xbf16>, vector<16x16xf32> -> vector<16x16xf32>
    %249 = arith.addf %248, %52 : vector<16x16xf32>
    %cst_83 = arith.constant dense<0xFF800000> : vector<16xf32>
    %250 = vector.multi_reduction <maximumf>, %249, %cst_83 [1] : vector<16x16xf32> to vector<16xf32>
    %251 = vector.shape_cast %250 : vector<16xf32> to vector<16x1xf32>
    %252 = vector.broadcast %251 : vector<16x1xf32> to vector<16x16xf32>
    %253 = arith.subf %249, %252 : vector<16x16xf32>
    %254 = math.exp %253 : vector<16x16xf32>
    %cst_84 = arith.constant dense<0.000000e+00> : vector<16xf32>
    %255 = vector.multi_reduction <add>, %254, %cst_84 [1] : vector<16x16xf32> to vector<16xf32>
    %256 = vector.shape_cast %255 : vector<16xf32> to vector<16x1xf32>
    %257 = tpu.reciprocal %256 {approx = true} : vector<16x1xf32> -> vector<16x1xf32>
    %258 = vector.broadcast %257 : vector<16x1xf32> to vector<16x16xf32>
    %259 = arith.mulf %254, %258 : vector<16x16xf32>
    %260 = arith.truncf %259 : vector<16x16xf32> to vector<16x16xbf16>
    %261 = vector.extract_strided_slice %245 {offsets = [0, 0], sizes = [16, 32], strides = [1, 1]} : vector<16x128xbf16> to vector<16x32xbf16>
    %cst_85 = arith.constant dense<0.000000e+00> : vector<16x32xf32>
    %262 = tpu.matmul %260, %261, %cst_85 {dimension_numbers = #tpu.dot_dimension_numbers<[1], [0], [0], [1], [0, 0, 1, 1], [], []>} : vector<16x16xbf16>, vector<16x32xbf16>, vector<16x32xf32> -> vector<16x32xf32>
    %263 = vector.extract_strided_slice %242 {offsets = [0, 32], sizes = [16, 32], strides = [1, 1]} : vector<16x128xbf16> to vector<16x32xbf16>
    %264 = vector.extract_strided_slice %244 {offsets = [32, 0], sizes = [32, 16], strides = [1, 1]} : vector<128x16xbf16> to vector<32x16xbf16>
    %cst_86 = arith.constant dense<0.000000e+00> : vector<16x16xf32>
    %265 = tpu.matmul %263, %264, %cst_86 {dimension_numbers = #tpu.dot_dimension_numbers<[1], [0], [0], [1], [0, 0, 1, 1], [], []>} : vector<16x32xbf16>, vector<32x16xbf16>, vector<16x16xf32> -> vector<16x16xf32>
    %266 = arith.addf %265, %52 : vector<16x16xf32>
    %cst_87 = arith.constant dense<0xFF800000> : vector<16xf32>
    %267 = vector.multi_reduction <maximumf>, %266, %cst_87 [1] : vector<16x16xf32> to vector<16xf32>
    %268 = vector.shape_cast %267 : vector<16xf32> to vector<16x1xf32>
    %269 = vector.broadcast %268 : vector<16x1xf32> to vector<16x16xf32>
    %270 = arith.subf %266, %269 : vector<16x16xf32>
    %271 = math.exp %270 : vector<16x16xf32>
    %cst_88 = arith.constant dense<0.000000e+00> : vector<16xf32>
    %272 = vector.multi_reduction <add>, %271, %cst_88 [1] : vector<16x16xf32> to vector<16xf32>
    %273 = vector.shape_cast %272 : vector<16xf32> to vector<16x1xf32>
    %274 = tpu.reciprocal %273 {approx = true} : vector<16x1xf32> -> vector<16x1xf32>
    %275 = vector.broadcast %274 : vector<16x1xf32> to vector<16x16xf32>
    %276 = arith.mulf %271, %275 : vector<16x16xf32>
    %277 = arith.truncf %276 : vector<16x16xf32> to vector<16x16xbf16>
    %278 = vector.extract_strided_slice %245 {offsets = [0, 32], sizes = [16, 32], strides = [1, 1]} : vector<16x128xbf16> to vector<16x32xbf16>
    %cst_89 = arith.constant dense<0.000000e+00> : vector<16x32xf32>
    %279 = tpu.matmul %277, %278, %cst_89 {dimension_numbers = #tpu.dot_dimension_numbers<[1], [0], [0], [1], [0, 0, 1, 1], [], []>} : vector<16x16xbf16>, vector<16x32xbf16>, vector<16x32xf32> -> vector<16x32xf32>
    %280 = vector.extract_strided_slice %242 {offsets = [0, 64], sizes = [16, 32], strides = [1, 1]} : vector<16x128xbf16> to vector<16x32xbf16>
    %281 = vector.extract_strided_slice %244 {offsets = [64, 0], sizes = [32, 16], strides = [1, 1]} : vector<128x16xbf16> to vector<32x16xbf16>
    %cst_90 = arith.constant dense<0.000000e+00> : vector<16x16xf32>
    %282 = tpu.matmul %280, %281, %cst_90 {dimension_numbers = #tpu.dot_dimension_numbers<[1], [0], [0], [1], [0, 0, 1, 1], [], []>} : vector<16x32xbf16>, vector<32x16xbf16>, vector<16x16xf32> -> vector<16x16xf32>
    %283 = arith.addf %282, %52 : vector<16x16xf32>
    %cst_91 = arith.constant dense<0xFF800000> : vector<16xf32>
    %284 = vector.multi_reduction <maximumf>, %283, %cst_91 [1] : vector<16x16xf32> to vector<16xf32>
    %285 = vector.shape_cast %284 : vector<16xf32> to vector<16x1xf32>
    %286 = vector.broadcast %285 : vector<16x1xf32> to vector<16x16xf32>
    %287 = arith.subf %283, %286 : vector<16x16xf32>
    %288 = math.exp %287 : vector<16x16xf32>
    %cst_92 = arith.constant dense<0.000000e+00> : vector<16xf32>
    %289 = vector.multi_reduction <add>, %288, %cst_92 [1] : vector<16x16xf32> to vector<16xf32>
    %290 = vector.shape_cast %289 : vector<16xf32> to vector<16x1xf32>
    %291 = tpu.reciprocal %290 {approx = true} : vector<16x1xf32> -> vector<16x1xf32>
    %292 = vector.broadcast %291 : vector<16x1xf32> to vector<16x16xf32>
    %293 = arith.mulf %288, %292 : vector<16x16xf32>
    %294 = arith.truncf %293 : vector<16x16xf32> to vector<16x16xbf16>
    %295 = vector.extract_strided_slice %245 {offsets = [0, 64], sizes = [16, 32], strides = [1, 1]} : vector<16x128xbf16> to vector<16x32xbf16>
    %cst_93 = arith.constant dense<0.000000e+00> : vector<16x32xf32>
    %296 = tpu.matmul %294, %295, %cst_93 {dimension_numbers = #tpu.dot_dimension_numbers<[1], [0], [0], [1], [0, 0, 1, 1], [], []>} : vector<16x16xbf16>, vector<16x32xbf16>, vector<16x32xf32> -> vector<16x32xf32>
    %297 = vector.extract_strided_slice %242 {offsets = [0, 96], sizes = [16, 32], strides = [1, 1]} : vector<16x128xbf16> to vector<16x32xbf16>
    %298 = vector.extract_strided_slice %244 {offsets = [96, 0], sizes = [32, 16], strides = [1, 1]} : vector<128x16xbf16> to vector<32x16xbf16>
    %cst_94 = arith.constant dense<0.000000e+00> : vector<16x16xf32>
    %299 = tpu.matmul %297, %298, %cst_94 {dimension_numbers = #tpu.dot_dimension_numbers<[1], [0], [0], [1], [0, 0, 1, 1], [], []>} : vector<16x32xbf16>, vector<32x16xbf16>, vector<16x16xf32> -> vector<16x16xf32>
    %300 = arith.addf %299, %52 : vector<16x16xf32>
    %cst_95 = arith.constant dense<0xFF800000> : vector<16xf32>
    %301 = vector.multi_reduction <maximumf>, %300, %cst_95 [1] : vector<16x16xf32> to vector<16xf32>
    %302 = vector.shape_cast %301 : vector<16xf32> to vector<16x1xf32>
    %303 = vector.broadcast %302 : vector<16x1xf32> to vector<16x16xf32>
    %304 = arith.subf %300, %303 : vector<16x16xf32>
    %305 = math.exp %304 : vector<16x16xf32>
    %cst_96 = arith.constant dense<0.000000e+00> : vector<16xf32>
    %306 = vector.multi_reduction <add>, %305, %cst_96 [1] : vector<16x16xf32> to vector<16xf32>
    %307 = vector.shape_cast %306 : vector<16xf32> to vector<16x1xf32>
    %308 = tpu.reciprocal %307 {approx = true} : vector<16x1xf32> -> vector<16x1xf32>
    %309 = vector.broadcast %308 : vector<16x1xf32> to vector<16x16xf32>
    %310 = arith.mulf %305, %309 : vector<16x16xf32>
    %311 = arith.truncf %310 : vector<16x16xf32> to vector<16x16xbf16>
    %312 = vector.extract_strided_slice %245 {offsets = [0, 96], sizes = [16, 32], strides = [1, 1]} : vector<16x128xbf16> to vector<16x32xbf16>
    %cst_97 = arith.constant dense<0.000000e+00> : vector<16x32xf32>
    %313 = tpu.matmul %311, %312, %cst_97 {dimension_numbers = #tpu.dot_dimension_numbers<[1], [0], [0], [1], [0, 0, 1, 1], [], []>} : vector<16x16xbf16>, vector<16x32xbf16>, vector<16x32xf32> -> vector<16x32xf32>
    %314 = tpu.concatenate %262, %279, %296, %313 in 1 : vector<16x32xf32>, vector<16x32xf32>, vector<16x32xf32>, vector<16x32xf32> -> vector<16x128xf32>
    %c1_98 = arith.constant 1 : index
    %c0_99 = arith.constant 0 : index
    %c0_100 = arith.constant 0 : index
    %315 = vector.load %arg8[%c1_98, %c0_99, %c0_100] : memref<2x128x128xbf16, #tpu.memory_space<vmem>>, vector<1x128x128xbf16>
    %316 = vector.shape_cast %315 : vector<1x128x128xbf16> to vector<128x128xbf16>
    %317 = arith.truncf %314 : vector<16x128xf32> to vector<16x128xbf16>
    %cst_101 = arith.constant dense<0.000000e+00> : vector<16x128xf32>
    %318 = tpu.matmul %317, %316, %cst_101 {dimension_numbers = #tpu.dot_dimension_numbers<[1], [0], [0], [1], [0, 0, 1, 1], [], []>} : vector<16x128xbf16>, vector<128x128xbf16>, vector<16x128xf32> -> vector<16x128xf32>
    %c14 = arith.constant 14 : index
    %c0_102 = arith.constant 0 : index
    %319 = vector.load %arg5[%c14, %c0_102] : memref<21x128xf32, #tpu.memory_space<vmem>>, vector<1x128xf32>
    %320 = vector.broadcast %319 : vector<1x128xf32> to vector<16x128xf32>
    %321 = arith.addf %318, %320 : vector<16x128xf32>
    %322 = arith.addf %225, %321 : vector<16x128xf32>
    %c15 = arith.constant 15 : index
    %c0_103 = arith.constant 0 : index
    %323 = vector.load %arg5[%c15, %c0_103] : memref<21x128xf32, #tpu.memory_space<vmem>>, vector<1x128xf32>
    %c16 = arith.constant 16 : index
    %c0_104 = arith.constant 0 : index
    %324 = vector.load %arg5[%c16, %c0_104] : memref<21x128xf32, #tpu.memory_space<vmem>>, vector<1x128xf32>
    %cst_105 = arith.constant dense<0.000000e+00> : vector<16xf32>
    %325 = vector.multi_reduction <add>, %322, %cst_105 [1] : vector<16x128xf32> to vector<16xf32>
    %326 = vector.shape_cast %325 : vector<16xf32> to vector<16x1xf32>
    %cst_106 = arith.constant 1.280000e+02 : f32
    %327 = vector.broadcast %cst_106 : f32 to vector<16x1xf32>
    %328 = arith.divf %326, %327 : vector<16x1xf32>
    %329 = vector.broadcast %328 : vector<16x1xf32> to vector<16x128xf32>
    %330 = arith.subf %322, %329 : vector<16x128xf32>
    %331 = arith.mulf %330, %330 : vector<16x128xf32>
    %cst_107 = arith.constant dense<0.000000e+00> : vector<16xf32>
    %332 = vector.multi_reduction <add>, %331, %cst_107 [1] : vector<16x128xf32> to vector<16xf32>
    %333 = vector.shape_cast %332 : vector<16xf32> to vector<16x1xf32>
    %cst_108 = arith.constant 1.280000e+02 : f32
    %334 = vector.broadcast %cst_108 : f32 to vector<16x1xf32>
    %335 = arith.divf %333, %334 : vector<16x1xf32>
    %336 = vector.broadcast %328 : vector<16x1xf32> to vector<16x128xf32>
    %337 = arith.subf %322, %336 : vector<16x128xf32>
    %cst_109 = arith.constant 9.99999996E-13 : f32
    %338 = vector.broadcast %cst_109 : f32 to vector<16x1xf32>
    %339 = arith.addf %335, %338 : vector<16x1xf32>
    %340 = math.rsqrt %339 : vector<16x1xf32>
    %341 = vector.broadcast %340 : vector<16x1xf32> to vector<16x128xf32>
    %342 = arith.mulf %337, %341 : vector<16x128xf32>
    %343 = vector.broadcast %323 : vector<1x128xf32> to vector<16x128xf32>
    %344 = arith.mulf %342, %343 : vector<16x128xf32>
    %345 = vector.broadcast %324 : vector<1x128xf32> to vector<16x128xf32>
    %346 = arith.addf %344, %345 : vector<16x128xf32>
    %c1_110 = arith.constant 1 : index
    %c0_111 = arith.constant 0 : index
    %c0_112 = arith.constant 0 : index
    %347 = vector.load %arg9[%c1_110, %c0_111, %c0_112] : memref<2x128x256xbf16, #tpu.memory_space<vmem>>, vector<1x128x256xbf16>
    %348 = vector.shape_cast %347 : vector<1x128x256xbf16> to vector<128x256xbf16>
    %349 = arith.truncf %346 : vector<16x128xf32> to vector<16x128xbf16>
    %cst_113 = arith.constant dense<0.000000e+00> : vector<16x256xf32>
    %350 = tpu.matmul %349, %348, %cst_113 {dimension_numbers = #tpu.dot_dimension_numbers<[1], [0], [0], [1], [0, 0, 1, 1], [], []>} : vector<16x128xbf16>, vector<128x256xbf16>, vector<16x256xf32> -> vector<16x256xf32>
    %c1_114 = arith.constant 1 : index
    %c0_115 = arith.constant 0 : index
    %351 = vector.load %arg6[%c1_114, %c0_115] : memref<2x256xf32, #tpu.memory_space<vmem>>, vector<1x256xf32>
    %352 = vector.broadcast %351 : vector<1x256xf32> to vector<16x256xf32>
    %353 = arith.addf %350, %352 : vector<16x256xf32>
    %354 = arith.mulf %353, %353 : vector<16x256xf32>
    %355 = arith.mulf %353, %354 : vector<16x256xf32>
    %cst_116 = arith.constant 4.471500e-02 : f32
    %356 = vector.broadcast %cst_116 : f32 to vector<16x256xf32>
    %357 = arith.mulf %356, %355 : vector<16x256xf32>
    %358 = arith.addf %353, %357 : vector<16x256xf32>
    %cst_117 = arith.constant 0.797884583 : f32
    %359 = vector.broadcast %cst_117 : f32 to vector<16x256xf32>
    %360 = arith.mulf %359, %358 : vector<16x256xf32>
    %361 = math.tanh %360 : vector<16x256xf32>
    %cst_118 = arith.constant 1.000000e+00 : f32
    %362 = vector.broadcast %cst_118 : f32 to vector<16x256xf32>
    %363 = arith.addf %362, %361 : vector<16x256xf32>
    %cst_119 = arith.constant 5.000000e-01 : f32
    %364 = vector.broadcast %cst_119 : f32 to vector<16x256xf32>
    %365 = arith.mulf %364, %363 : vector<16x256xf32>
    %366 = arith.mulf %353, %365 : vector<16x256xf32>
    %c1_120 = arith.constant 1 : index
    %c0_121 = arith.constant 0 : index
    %c0_122 = arith.constant 0 : index
    %367 = vector.load %arg10[%c1_120, %c0_121, %c0_122] : memref<2x256x128xbf16, #tpu.memory_space<vmem>>, vector<1x256x128xbf16>
    %368 = vector.shape_cast %367 : vector<1x256x128xbf16> to vector<256x128xbf16>
    %369 = arith.truncf %366 : vector<16x256xf32> to vector<16x256xbf16>
    %cst_123 = arith.constant dense<0.000000e+00> : vector<16x128xf32>
    %370 = tpu.matmul %369, %368, %cst_123 {dimension_numbers = #tpu.dot_dimension_numbers<[1], [0], [0], [1], [0, 0, 1, 1], [], []>} : vector<16x256xbf16>, vector<256x128xbf16>, vector<16x128xf32> -> vector<16x128xf32>
    %c17 = arith.constant 17 : index
    %c0_124 = arith.constant 0 : index
    %371 = vector.load %arg5[%c17, %c0_124] : memref<21x128xf32, #tpu.memory_space<vmem>>, vector<1x128xf32>
    %372 = vector.broadcast %371 : vector<1x128xf32> to vector<16x128xf32>
    %373 = arith.addf %370, %372 : vector<16x128xf32>
    %374 = arith.addf %346, %373 : vector<16x128xf32>
    %c18 = arith.constant 18 : index
    %c0_125 = arith.constant 0 : index
    %375 = vector.load %arg5[%c18, %c0_125] : memref<21x128xf32, #tpu.memory_space<vmem>>, vector<1x128xf32>
    %c19 = arith.constant 19 : index
    %c0_126 = arith.constant 0 : index
    %376 = vector.load %arg5[%c19, %c0_126] : memref<21x128xf32, #tpu.memory_space<vmem>>, vector<1x128xf32>
    %cst_127 = arith.constant dense<0.000000e+00> : vector<16xf32>
    %377 = vector.multi_reduction <add>, %374, %cst_127 [1] : vector<16x128xf32> to vector<16xf32>
    %378 = vector.shape_cast %377 : vector<16xf32> to vector<16x1xf32>
    %cst_128 = arith.constant 1.280000e+02 : f32
    %379 = vector.broadcast %cst_128 : f32 to vector<16x1xf32>
    %380 = arith.divf %378, %379 : vector<16x1xf32>
    %381 = vector.broadcast %380 : vector<16x1xf32> to vector<16x128xf32>
    %382 = arith.subf %374, %381 : vector<16x128xf32>
    %383 = arith.mulf %382, %382 : vector<16x128xf32>
    %cst_129 = arith.constant dense<0.000000e+00> : vector<16xf32>
    %384 = vector.multi_reduction <add>, %383, %cst_129 [1] : vector<16x128xf32> to vector<16xf32>
    %385 = vector.shape_cast %384 : vector<16xf32> to vector<16x1xf32>
    %cst_130 = arith.constant 1.280000e+02 : f32
    %386 = vector.broadcast %cst_130 : f32 to vector<16x1xf32>
    %387 = arith.divf %385, %386 : vector<16x1xf32>
    %388 = vector.broadcast %380 : vector<16x1xf32> to vector<16x128xf32>
    %389 = arith.subf %374, %388 : vector<16x128xf32>
    %cst_131 = arith.constant 9.99999996E-13 : f32
    %390 = vector.broadcast %cst_131 : f32 to vector<16x1xf32>
    %391 = arith.addf %387, %390 : vector<16x1xf32>
    %392 = math.rsqrt %391 : vector<16x1xf32>
    %393 = vector.broadcast %392 : vector<16x1xf32> to vector<16x128xf32>
    %394 = arith.mulf %389, %393 : vector<16x128xf32>
    %395 = vector.broadcast %375 : vector<1x128xf32> to vector<16x128xf32>
    %396 = arith.mulf %394, %395 : vector<16x128xf32>
    %397 = vector.broadcast %376 : vector<1x128xf32> to vector<16x128xf32>
    %398 = arith.addf %396, %397 : vector<16x128xf32>
    %399 = vector.extract_strided_slice %398 {offsets = [0, 0], sizes = [1, 128], strides = [1, 1]} : vector<16x128xf32> to vector<1x128xf32>
    %400 = vector.extract_strided_slice %398 {offsets = [8, 0], sizes = [1, 128], strides = [1, 1]} : vector<16x128xf32> to vector<1x128xf32>
    %401 = tpu.concatenate %399, %400 in 0 : vector<1x128xf32>, vector<1x128xf32> -> vector<2x128xf32>
    %c20 = arith.constant 20 : index
    %c0_132 = arith.constant 0 : index
    %402 = vector.load %arg5[%c20, %c0_132] : memref<21x128xf32, #tpu.memory_space<vmem>>, vector<1x128xf32>
    %403 = vector.extract_strided_slice %402 {offsets = [0, 0], sizes = [1, 24], strides = [1, 1]} : vector<1x128xf32> to vector<1x24xf32>
    %c0_133 = arith.constant 0 : index
    %c0_134 = arith.constant 0 : index
    %404 = vector.load %arg11[%c0_133, %c0_134] : memref<128x24xbf16, #tpu.memory_space<vmem>>, vector<128x24xbf16>
    %405 = arith.truncf %401 : vector<2x128xf32> to vector<2x128xbf16>
    %cst_135 = arith.constant dense<0.000000e+00> : vector<2x24xf32>
    %406 = tpu.matmul %405, %404, %cst_135 {dimension_numbers = #tpu.dot_dimension_numbers<[1], [0], [0], [1], [0, 0, 1, 1], [], []>} : vector<2x128xbf16>, vector<128x24xbf16>, vector<2x24xf32> -> vector<2x24xf32>
    %407 = vector.broadcast %403 : vector<1x24xf32> to vector<2x24xf32>
    %408 = arith.addf %406, %407 : vector<2x24xf32>
    %409 = vector.extract_strided_slice %408 {offsets = [0, 0], sizes = [2, 16], strides = [1, 1]} : vector<2x24xf32> to vector<2x16xf32>
    %410 = vector.extract_strided_slice %408 {offsets = [0, 16], sizes = [2, 8], strides = [1, 1]} : vector<2x24xf32> to vector<2x8xf32>
    %411 = tpu.iota {dimensions = array<i32: 1>} : vector<2x16xi32>
    %c0_136 = arith.constant 0 : index
    %c0_137 = arith.constant 0 : index
    %412 = vector.load %arg2[%c0_136, %c0_137] : memref<2x1xi32, #tpu.memory_space<vmem>>, vector<2x1xi32>
    %413 = vector.broadcast %412 : vector<2x1xi32> to vector<2x16xi32>
    %414 = arith.cmpi eq, %411, %413 : vector<2x16xi32>
    %415 = arith.extui %414 : vector<2x16xi1> to vector<2x16xi32>
    %416 = arith.sitofp %415 : vector<2x16xi32> to vector<2x16xf32>
    %cst_138 = arith.constant dense<0xFF800000> : vector<2xf32>
    %417 = vector.multi_reduction <maximumf>, %409, %cst_138 [1] : vector<2x16xf32> to vector<2xf32>
    %418 = vector.shape_cast %417 : vector<2xf32> to vector<2x1xf32>
    %419 = vector.broadcast %418 : vector<2x1xf32> to vector<2x16xf32>
    %420 = arith.subf %409, %419 : vector<2x16xf32>
    %421 = math.exp %420 : vector<2x16xf32>
    %cst_139 = arith.constant dense<0.000000e+00> : vector<2xf32>
    %422 = vector.multi_reduction <add>, %421, %cst_139 [1] : vector<2x16xf32> to vector<2xf32>
    %423 = vector.shape_cast %422 : vector<2xf32> to vector<2x1xf32>
    %424 = math.log %423 : vector<2x1xf32>
    %425 = arith.addf %418, %424 : vector<2x1xf32>
    %426 = arith.mulf %416, %409 : vector<2x16xf32>
    %cst_140 = arith.constant dense<0.000000e+00> : vector<2xf32>
    %427 = vector.multi_reduction <add>, %426, %cst_140 [1] : vector<2x16xf32> to vector<2xf32>
    %428 = vector.shape_cast %427 : vector<2xf32> to vector<2x1xf32>
    %429 = arith.subf %425, %428 : vector<2x1xf32>
    %430 = vector.shape_cast %429 : vector<2x1xf32> to vector<1x2x1xf32>
    %cst_141 = arith.constant dense<0.000000e+00> : vector<1xf32>
    %431 = vector.multi_reduction <add>, %430, %cst_141 [1, 2] : vector<1x2x1xf32> to vector<1xf32>
    %432 = vector.shape_cast %431 : vector<1xf32> to vector<1x1x1xf32>
    %433 = vector.extract %432[0, 0, 0] : f32 from vector<1x1x1xf32>
    %434 = vector.broadcast %433 : f32 to vector<1x1xf32>
    %cst_142 = arith.constant 5.000000e-01 : f32
    %435 = vector.broadcast %cst_142 : f32 to vector<1x1xf32>
    %436 = arith.mulf %434, %435 : vector<1x1xf32>
    %c0_143 = arith.constant 0 : index
    %c0_144 = arith.constant 0 : index
    %437 = vector.load %arg3[%c0_143, %c0_144] : memref<2x8xf32, #tpu.memory_space<vmem>>, vector<2x8xf32>
    %cst_145 = arith.constant 0.000000e+00 : f32
    %438 = vector.broadcast %cst_145 : f32 to vector<2x8xf32>
    %439 = arith.maximumf %410, %438 : vector<2x8xf32>
    %440 = arith.mulf %410, %437 : vector<2x8xf32>
    %441 = arith.subf %439, %440 : vector<2x8xf32>
    %442 = math.absf %410 : vector<2x8xf32>
    %cst_146 = arith.constant 0.000000e+00 : f32
    %443 = vector.broadcast %cst_146 : f32 to vector<2x8xf32>
    %444 = arith.subf %443, %442 : vector<2x8xf32>
    %445 = math.exp %444 : vector<2x8xf32>
    %cst_147 = arith.constant 1.000000e+00 : f32
    %446 = vector.broadcast %cst_147 : f32 to vector<2x8xf32>
    %447 = arith.addf %446, %445 : vector<2x8xf32>
    %448 = math.log %447 : vector<2x8xf32>
    %449 = arith.addf %441, %448 : vector<2x8xf32>
    %450 = vector.shape_cast %449 : vector<2x8xf32> to vector<1x2x8xf32>
    %cst_148 = arith.constant dense<0.000000e+00> : vector<1xf32>
    %451 = vector.multi_reduction <add>, %450, %cst_148 [1, 2] : vector<1x2x8xf32> to vector<1xf32>
    %452 = vector.shape_cast %451 : vector<1xf32> to vector<1x1x1xf32>
    %453 = vector.extract %452[0, 0, 0] : f32 from vector<1x1x1xf32>
    %454 = vector.broadcast %453 : f32 to vector<1x1xf32>
    %cst_149 = arith.constant 6.250000e-02 : f32
    %455 = vector.broadcast %cst_149 : f32 to vector<1x1xf32>
    %456 = arith.mulf %454, %455 : vector<1x1xf32>
    %cst_150 = arith.constant 0.000000e+00 : f32
    %457 = vector.broadcast %cst_150 : f32 to vector<8x128xf32>
    %c0_151 = arith.constant 0 : index
    %c0_152 = arith.constant 0 : index
    %458 = vector.load %arg12[%c0_151, %c0_152] : memref<8x128xf32, #tpu.memory_space<vmem>>, vector<8x128xf32>
    tpu.vector_store %arg12[%c0_151, %c0_152], %457 {strides = array<i32>} : memref<8x128xf32, #tpu.memory_space<vmem>>, vector<8x128xf32>,
    %c0_153 = arith.constant 0 : index
    %c0_154 = arith.constant 0 : index
    %459 = vector.load %arg12[%c0_153, %c0_154] : memref<8x128xf32, #tpu.memory_space<vmem>>, vector<2x24xf32>
    tpu.vector_store %arg12[%c0_153, %c0_154], %408 {strides = array<i32>} : memref<8x128xf32, #tpu.memory_space<vmem>>, vector<2x24xf32>,
    %460 = arith.addf %436, %456 : vector<1x1xf32>
    %c2_155 = arith.constant 2 : index
    %c0_156 = arith.constant 0 : index
    %461 = vector.load %arg12[%c2_155, %c0_156] : memref<8x128xf32, #tpu.memory_space<vmem>>, vector<1x1xf32>
    tpu.vector_store %arg12[%c2_155, %c0_156], %460 {strides = array<i32>} : memref<8x128xf32, #tpu.memory_space<vmem>>, vector<1x1xf32>,
    return
  }
}

</mosaic_0001>

<bundles_post_ra>
// kernel: model_forward.1
= control target key start
LH: loop header
LB: loop body
LE: loop exit
PB: predicated region body
PF: predicated region fallthrough
CT: control target
= control target key end

     0   :  { %17 = vsyncpa [#allocation3], 0  ;;  %s4132_s0 = inlined_call_operand.vmem [shape: s32[16,1], index: 0, kind: input, shape index: {}]   ;;  %s4133_s1 = inlined_call_operand.vmem [shape: s32[1,16], index: 1, kind: input, shape index: {}]   ;;  %s4134_s2 = inlined_call_operand.vmem [shape: s32[2,1], index: 2, kind: input, shape index: {}]   ;;  %s4135_s3 = inlined_call_operand.vmem [shape: f32[2,8], index: 3, kind: input, shape index: {}]   ;;  %s4136_s4 = inlined_call_operand.hbm [shape: f32[137,128], index: 4, kind: input, shape index: {}]   ;;  %s4137_s5 = inlined_call_operand.vmem [shape: f32[21,128], index: 5, kind: input, shape index: {}]   ;;  %s4138_s6 = inlined_call_operand.vmem [shape: f32[2,256], index: 6, kind: input, shape index: {}]   ;;  %s4139_s7 = inlined_call_operand.hbm [shape: bf16[2,128,384], index: 7, kind: input, shape index: {}]   ;;  %s4140_s8 = inlined_call_operand.hbm [shape: bf16[2,128,128], index: 8, kind: input, shape index: {}]   ;;  %s4141_s9 = inlined_call_operand.hbm [shape: bf16[2,128,256], index: 9, kind: input, shape index: {}]   ;;  %s4142_s10 = inlined_call_operand.hbm [shape: bf16[2,256,128], index: 10, kind: input, shape index: {}]   ;;  %s4143_s11 = inlined_call_operand.vmem [shape: bf16[128,24], index: 11, kind: input, shape index: {}]   ;;  %s4144_s12 = inlined_call_operand.vmem [shape: f32[8,128], index: 12, kind: output, shape index: {}]  }
   0x1   :  { %18 = vsyncpa [#allocation5], 0  ;;  %s49_s23 = sshll.u32 %s4139_s7, 4  ;;  %s50_s23 = int_to_ptr.hbm [resolvable:$true] %s49_s23 }
   0x2   :  { %19 = vsyncpa [#allocation8], 0  ;;  %s3660_s24 = smov [#allocation4]   ;;  %s3661_s26 = smov 192  }
   0x3   :  { %s51_s25 = sshll.u32 %s3660_s24, 4  ;;  %s3662_s27 = smov 12   ;;  %s52_s25 = int_to_ptr.vmem [resolvable:$true] %s51_s25 }
   0x4   :  { %57 = dma.hbm_to_vmem [thread:$0]  %s50_s23, 6144, %s52_s25, [#allocation5], %s3661_s26, %s3661_s26, %s3662_s27  }
   0x5   :  { %s75_s30 = sshll.u32 %s4141_s9, 4  ;;  %s3663_s13 = smov [#allocation7]   ;;  %s76_s30 = int_to_ptr.hbm [resolvable:$true] %s75_s30 }
   0x6   :  { %s77_s14 = sshll.u32 %s3663_s13, 4  ;;  %s32_s17 = sshll.u32 %s4136_s4, 4  ;;  %s78_s14 = int_to_ptr.vmem [resolvable:$true] %s77_s14  ;;  %s33_s17 = int_to_ptr.hbm [resolvable:$true] %s32_s17 }
   0x7   :  { %s3664_s7 = smov 128   ;;  %s3665_s18 = smov 8  }
   0x8   :  { %83 = dma.hbm_to_vmem [thread:$0]  %s76_s30, 4096, %s78_s14, [#allocation8], %s3664_s7, %s3664_s7, %s3665_s18  }
   0x9   :  { %s62_s21 = sshll.u32 %s4140_s8, 4  ;;  %s3666_s22 = smov [#allocation2]   ;;  %s63_s21 = int_to_ptr.hbm [resolvable:$true] %s62_s21 }
   0xa   :  { %s34_s23 = sshll.u32 %s3666_s22, 4  ;;  %s3667_s9 = smov [#allocation6]   ;;  %s35_s23 = int_to_ptr.vmem [resolvable:$true] %s34_s23 }
   0xb   :  { %40 = dma.hbm_to_vmem [thread:$0]  %s33_s17, 2304, %s35_s23, [#allocation3], %s3664_s7, %s3664_s7, %s3665_s18  }
   0xc   :  { %s64_s24 = sshll.u32 %s3667_s9, 4  ;;  %s3668_s25 = smov 64   ;;  %s65_s24 = int_to_ptr.vmem [resolvable:$true] %s64_s24 }
   0xd   :  { %s3669_s26 = smov 4   ;;  %s88_s28 = sshll.u32 %s4142_s10, 4  ;;  %s89_s28 = int_to_ptr.hbm [resolvable:$true] %s88_s28 }
   0xe   :  { %70 = dma.hbm_to_vmem [thread:$0]  %s63_s21, 2048, %s65_s24, [#allocation5], %s3668_s25, %s3668_s25, %s3669_s26  }
   0xf   :  { %s3670_s29 = smov [#allocation9]  }
  0x10   :  { %s90_s8 = sshll.u32 %s3670_s29, 4  ;;  %s91_s8 = int_to_ptr.vmem [resolvable:$true] %s90_s8 }
  0x11   :  { %96 = dma.hbm_to_vmem [thread:$0]  %s89_s28, 4096, %s91_s8, [#allocation8], %s3668_s25, %s3668_s25, %s3669_s26  }
  0x12   :  { %3654 = dma.done.wait [#allocation3], 2304  }
  0x13   :  { %3655 = vsyncadd [#allocation3], 4294964992 }
  0x14   :  { %3656 = dma.done.wait [#allocation5], 8192  }
  0x15   :  { %3657 = vsyncadd [#allocation5], 4294959104 }
  0x16   :  { %3658 = dma.done.wait [#allocation8], 8192  }
  0x17   :  { %3659 = vsyncadd [#allocation8], 4294959104  ;;  %v122_v0 = vlaneseq  ;;  %v3671_v1 = vmov 0   ;;  %v243_v8 = vld [vmem:[%s4133_s1] sm:$0x1]  ;;  %v151_v10 = vld [vmem:[#allocation2 + $0x78] sm:$0xff] }
  0x18   :  { %3370 = vset.pattern.permute.xlu0 %v3671_v1  ;;  %3401 = vset.pattern.permute.xlu1 %v3671_v1  ;;  %v120_v9 = vld [vmem:[%s4132_s0] sm:$0xff]  ;;  %vm244_vm0 = vcmp.gt.s32.totalorder %v243_v8, 0  ;;  %v150_v11 = vld [vmem:[#allocation2 + $0x70] sm:$0xff]  ;;  %v149_v15 = vld [vmem:[#allocation2 + $0x68] sm:$0xff]  ;;  %v3672_v33 = vmov 1.0   ;;  %v3673_v43 = vmov 128.0  }
  0x19   :  { %v236_v2 = vshrl.u32 %v122_v0, 7  ;;  %v3764_v3 = vand.u32 127, %v122_v0  ;;  %125 = vperm.xlu0 %3370, %v120_v9   ;;  %v245_v12 = vsel %vm244_vm0, 1, %v3671_v1  ;;  %154 = vmatpush.msra.mxu0 %v151_v10  ;;  %v121_v18 = vld [vmem:[%s4132_s0 + $0x8] sm:$0xff]  ;;  %v148_v19 = vld [vmem:[#allocation2 + $0x60] sm:$0xff]  ;;  %v147_v20 = vld [vmem:[#allocation2 + $0x58] sm:$0xff]  ;;  %3424 = vrcp.f32 %v3673_v43 }
  0x1a   :  { %v246_v14 = vperm.slane %v245_v12, 0  ;;  %v146_v21 = vld [vmem:[#allocation2 + $0x50] sm:$0xff]  ;;  %v145_v22 = vld [vmem:[#allocation2 + $0x48] sm:$0xff]  ;;  %v144_v23 = vld [vmem:[#allocation2 + $0x40] sm:$0xff]  ;;  %s3674_s9 = smov 32   ;;  %s3675_s24 = smov 96  }
  0x1b   :  { %v237_v4 = vadd.s32 8, %v236_v2  ;;  %v238_v5 = vshra.s32 %v236_v2, 3  ;;  %v240_v6 = vshra.s32 %v3764_v3, 3  ;;  %155 = vmatpush.msra.mxu0 %v150_v11  ;;  %v143_v24 = vld [vmem:[#allocation2 + $0x38] sm:$0xff]  ;;  %v142_v25 = vld [vmem:[#allocation2 + $0x30] sm:$0xff]  ;;  %v141_v26 = vld [vmem:[#allocation2 + $0x28] sm:$0xff] }
  0x1c   :  { %vm3781_vm3 = vcmp.eq.s32.totalorder %v246_v14, 1  ;;  %v140_v27 = vld [vmem:[#allocation2 + $0x20] sm:$0xff]  ;;  %v139_v28 = vld [vmem:[#allocation2 + $0x18] sm:$0xff]  ;;  %v138_v29 = vld [vmem:[#allocation2 + $0x10] sm:$0xff]  ;;  %vm536_vm15 = vcmask 261120   ;;  %vm554_vm0 = vcmask 130048  }
  0x1d   :  { %v239_v7 = vshra.s32 %v237_v4, 3  ;;  %vm3773_vm1 = vcmp.eq.s32.totalorder %v238_v5, %v240_v6  ;;  %156 = vmatpush.msra.mxu0 %v149_v15  ;;  %v137_v30 = vld [vmem:[#allocation2 + $0x8] sm:$0xff]  ;;  %v136_v31 = vld [vmem:[#allocation2] sm:$0xff]  ;;  %v2734_v58 = vld [vmem:[#allocation4 + $0xa8] sm:$0xf]  ;;  %s3678_s10 = smov 16  }
  0x1e   :  { %vm248_vm4 = vmand %vm3773_vm1, %vm3781_vm3  ;;  %v152_v35 = vld [vmem:[#allocation2 + $0x80] sm:$0xff]  ;;  %v3402_v36 = vld [vmem:[#allocation2 + $0x88] ss:$0 sm:$0xff]  ;;  %vm849_vm1 = vcmask 523264  }
  0x1f   :  { %vm3777_vm2 = vcmp.eq.s32.totalorder %v239_v7, %v240_v6  ;;  %157 = vmatpush.msra.mxu0 %v148_v19  ;;  %v3425_v44 = vpop.eup %3424  ;;  %v3232_v59 = vld [vmem:[#allocation4 + $0xb0] sm:$0xf0]  ;;  %v3231_v60 = vld [vmem:[#allocation4 + $0xac] sm:$0xf]  ;;  %v2736_v62 = vld [vmem:[#allocation4 + $0xb4] sm:$0xf0] }
  0x20   :  { %vm249_vm5 = vmand %vm3777_vm2, %vm3781_vm3  ;;  %v187_v45 = vmul.f32 128.0, %v3425_v44  ;;  %vm191_vm8 = vweird.f32 %v3425_v44  ;;  %v2735_v61 = vor.u32 %v3232_v59, %v2734_v58  ;;  %v2742_v63 = vld [vmem:[#allocation4 + $0xb0] sm:$0xf]  ;;  %v3233_v0 = vld [vmem:[#allocation4 + $0xb8] sm:$0xf0]  ;;  %v2739_v1 = vor.u32 %v3231_v60, %v2736_v62 }
  0x21   :  { %128 = vperm.xlu0 %3370, %v121_v18   ;;  %158 = vmatpush.msra.mxu0 %v147_v20  ;;  %v2743_v2 = vor.u32 %v3233_v0, %v2742_v63  ;;  %v2722_v4 = vld [vmem:[#allocation4 + $0x90] sm:$0xf]  ;;  %v3229_v5 = vld [vmem:[#allocation4 + $0x98] sm:$0xf0]  ;;  %v3228_v6 = vld [vmem:[#allocation4 + $0x94] sm:$0xf] }
  0x22   :  { %v188_v46 = vsub.f32 1.0, %v187_v45  ;;  %413 = vmatpush.bf16.msra.mxu1 %v2735_v61  ;;  %427 = vmatpush.bf16.msra.mxu2 %v2739_v1  ;;  %v2723_v7 = vor.u32 %v3229_v5, %v2722_v4  ;;  %v2724_v8 = vld [vmem:[#allocation4 + $0x9c] sm:$0xf0]  ;;  %v2730_v9 = vld [vmem:[#allocation4 + $0x98] sm:$0xf]  ;;  %vm852_vm2 = vcmask 785408  }
  0x23   :  { %159 = vmatpush.msra.mxu0 %v146_v21  ;;  %441 = vmatpush.bf16.msra.mxu3 %v2743_v2  ;;  %v3230_v10 = vld [vmem:[#allocation4 + $0xa0] sm:$0xf0]  ;;  %v2727_v11 = vor.u32 %v3228_v6, %v2724_v8  ;;  %v2710_v14 = vld [vmem:[#allocation4 + $0x78] sm:$0xf]  ;;  %v3225_v18 = vld [vmem:[#allocation4 + $0x7c] sm:$0xf] }
  0x24   :  { %v189_v47 = vmul.f32 %v3425_v44, %v188_v46  ;;  %v2731_v12 = vor.u32 %v3230_v10, %v2730_v9  ;;  %v3226_v15 = vld [vmem:[#allocation4 + $0x80] sm:$0xf0]  ;;  %v2712_v20 = vld [vmem:[#allocation4 + $0x84] sm:$0xf0]  ;;  %v2718_v21 = vld [vmem:[#allocation4 + $0x80] sm:$0xf] }
  0x25   :  { %160 = vmatpush.msra.mxu0 %v145_v22  ;;  %v2711_v19 = vor.u32 %v3226_v15, %v2710_v14  ;;  %v3227_v22 = vld [vmem:[#allocation4 + $0x88] sm:$0xf0]  ;;  %v2674_v43 = vld [vmem:[#allocation4 + $0x30] sm:$0xf]  ;;  %v3216_v45 = vld [vmem:[#allocation4 + $0x34] sm:$0xf] }
  0x26   :  { %v190_v48 = vadd.f32 %v3425_v44, %v189_v47  ;;  %414 = vmatpush.bf16.msra.mxu1 %v2723_v7  ;;  %428 = vmatpush.bf16.msra.mxu2 %v2727_v11  ;;  %v2676_v47 = vld [vmem:[#allocation4 + $0x3c] sm:$0xf0]  ;;  %v2664_v59 = vld [vmem:[#allocation4 + $0x24] sm:$0xf0]  ;;  %v3215_v61 = vld [vmem:[#allocation4 + $0x28] sm:$0xf0] }
  0x27   :  { %161 = vmatpush.msra.mxu0 %v144_v23  ;;  %442 = vmatpush.bf16.msra.mxu3 %v2731_v12  ;;  %v2715_v23 = vor.u32 %v3225_v18, %v2712_v20  ;;  %v2670_v60 = vld [vmem:[#allocation4 + $0x20] sm:$0xf]  ;;  %v3211_v1 = vld [vmem:[#allocation4 + $0x8] sm:$0xf0]  ;;  %v3210_v2 = vld [vmem:[#allocation4 + $0x4] sm:$0xf] }
  0x28   :  { %v3798_v49 = vsel %vm191_vm8, %v3425_v44, %v190_v48  ;;  %v3217_v44 = vld [vmem:[#allocation4 + $0x38] sm:$0xf0]  ;;  %v2682_v48 = vld [vmem:[#allocation4 + $0x38] sm:$0xf]  ;;  %v2671_v63 = vor.u32 %v3215_v61, %v2670_v60  ;;  %v2650_v0 = vld [vmem:[#allocation4] sm:$0xf] }
  0x29   :  { %162 = vmatpush.msra.mxu0 %v143_v24  ;;  %v2719_v24 = vor.u32 %v3227_v22, %v2718_v21  ;;  %v2675_v46 = vor.u32 %v3217_v44, %v2674_v43  ;;  %v2651_v5 = vor.u32 %v3211_v1, %v2650_v0  ;;  %v2652_v6 = vld [vmem:[#allocation4 + $0xc] sm:$0xf0]  ;;  %v2658_v7 = vld [vmem:[#allocation4 + $0x8] sm:$0xf]  ;;  %v3212_v8 = vld [vmem:[#allocation4 + $0x10] sm:$0xf0] }
  0x2a   :  { %415 = vmatpush.bf16.msra.mxu1 %v2711_v19  ;;  %429 = vmatpush.bf16.msra.mxu2 %v2715_v23  ;;  %v2655_v10 = vor.u32 %v3210_v2, %v2652_v6  ;;  %v2659_v11 = vor.u32 %v3212_v8, %v2658_v7 }
  0x2b   :  { %163 = vmatpush.msra.mxu0 %v142_v25  ;;  %443 = vmatpush.bf16.msra.mxu3 %v2719_v24  ;;  %v2698_v25 = vld [vmem:[#allocation4 + $0x60] sm:$0xf] }
  0x2d   :  { %164 = vmatpush.msra.mxu0 %v141_v26  ;;  %v3223_v26 = vld [vmem:[#allocation4 + $0x68] sm:$0xf0] }
  0x2f   :  { %165 = vmatpush.msra.mxu0 %v140_v27  ;;  %v3222_v27 = vld [vmem:[#allocation4 + $0x64] sm:$0xf] }
  0x31   :  { %166 = vmatpush.msra.mxu0 %v139_v28  ;;  %v2699_v28 = vor.u32 %v3223_v26, %v2698_v25 }
  0x33   :  { %167 = vmatpush.msra.mxu0 %v138_v29  ;;  %v2700_v29 = vld [vmem:[#allocation4 + $0x6c] sm:$0xf0]  ;;  %416 = vmatpush.bf16.msra.mxu1 %v2699_v28 }
  0x35   :  { %168 = vmatpush.msra.mxu0 %v137_v30  ;;  %v2706_v30 = vld [vmem:[#allocation4 + $0x68] sm:$0xf] }
  0x37   :  { %169 = vmatpush.msra.mxu0 %v136_v31  ;;  %v3224_v31 = vld [vmem:[#allocation4 + $0x70] sm:$0xf0] }
  0x8b   :  { %v126_v32 = vpop.permute.xlu0 %125 }
  0x8c   :  { %vm130_vm6 = vcmp.eq.s32.totalorder %v3764_v3, %v126_v32  ;;  %v2703_v32 = vor.u32 %v3222_v27, %v2700_v29 }
  0x8d   :  { %2646 = vmatmul.msk.f32.vlgmr.msra.gmra.mxu0 %vm130_vm6, %v3672_v33 }
  0x8e   :  { %430 = vmatpush.bf16.msra.mxu2 %v2703_v32  ;;  %v3403_v32 = vld [vmem:[%s4137_s5] ss:$0 sm:$0xff] }
  0x93   :  { %v129_v34 = vpop.permute.xlu0 %128 }
  0x94   :  { %vm131_vm7 = vcmp.eq.s32.totalorder %v3764_v3, %v129_v34  ;;  %v2686_v34 = vld [vmem:[#allocation4 + $0x48] sm:$0xf] }
  0x95   :  { %2647 = vmatmul.msk.f32.gmra.mxu0 %vm131_vm7, %v3672_v33  ;;  %v2707_v33 = vor.u32 %v3224_v31, %v2706_v30 }
  0x97   :  { %444 = vmatpush.bf16.msra.mxu3 %v2707_v33 }
 0x10a   :  { %v171_v37 = vpop.f32.mrf.mxu0 }
 0x10b   :  { %v172_v38 = vadd.f32 %v171_v37, %v152_v35 }
 0x10d   :  { %v178_v39 = vadd.f32 %v3402_v36, %v172_v38  ;;  %v2688_v38 = vld [vmem:[#allocation4 + $0x54] sm:$0xf0] }
 0x10f   :  { %182 = vadd.xlane.f32.xlu1 %v178_v39 }
 0x112   :  { %v174_v40 = vpop.f32.mrf.mxu0 }
 0x113   :  { %v175_v41 = vadd.f32 %v174_v40, %v152_v35  ;;  %v3220_v35 = vld [vmem:[#allocation4 + $0x50] sm:$0xf0]  ;;  %v3221_v40 = vld [vmem:[#allocation4 + $0x58] sm:$0xf0] }
 0x114   :  { %v2687_v37 = vor.u32 %v3220_v35, %v2686_v34 }
 0x115   :  { %v179_v42 = vadd.f32 %v3402_v36, %v175_v41  ;;  %v3219_v36 = vld [vmem:[#allocation4 + $0x4c] sm:$0xf] }
 0x116   :  { %v2691_v41 = vor.u32 %v3219_v36, %v2688_v38  ;;  %417 = vmatpush.bf16.msra.mxu1 %v2687_v37  ;;  %v3404_v37 = vld [vmem:[%s4137_s5 + $0x1] ss:$0 sm:$0xff] }
 0x117   :  { %184 = vadd.xlane.f32.xlu1 %v179_v42 }
 0x118   :  { %431 = vmatpush.bf16.msra.mxu2 %v2691_v41 }
 0x11a   :  { %418 = vmatpush.bf16.msra.mxu1 %v2675_v46 }
 0x182   :  { %v183_v50 = vpop.xlane.xlu1 %182 }
 0x183   :  { %v193_v51 = vmul.f32 %v3798_v49, %v183_v50  ;;  %v3218_v50 = vld [vmem:[#allocation4 + $0x40] sm:$0xf0] }
 0x185   :  { %v3801_v52 = vsub.f32 %v178_v39, %v193_v51  ;;  %v2694_v39 = vld [vmem:[#allocation4 + $0x50] sm:$0xf]  ;;  %v2679_v51 = vor.u32 %v3216_v45, %v2676_v47  ;;  %v3407_v47 = vld [vmem:[%s4137_s5 + $0x4] ss:$0 sm:$0xff] }
 0x187   :  { %v197_v53 = vmul.f32 %v3801_v52, %v3801_v52  ;;  %432 = vmatpush.bf16.msra.mxu2 %v2679_v51 }
 0x189   :  { %199 = vadd.xlane.f32.xlu2 %v197_v53  ;;  %v2683_v53 = vor.u32 %v3218_v50, %v2682_v48 }
 0x18a   :  { %v185_v54 = vpop.xlane.xlu1 %184 }
 0x18b   :  { %v194_v55 = vmul.f32 %v3798_v49, %v185_v54  ;;  %v2662_v54 = vld [vmem:[#allocation4 + $0x18] sm:$0xf] }
 0x18d   :  { %v3806_v56 = vsub.f32 %v179_v42, %v194_v55  ;;  %v2695_v42 = vor.u32 %v3221_v40, %v2694_v39  ;;  %v3214_v55 = vld [vmem:[#allocation4 + $0x20] sm:$0xf0] }
 0x18e   :  { %v2663_v58 = vor.u32 %v3214_v55, %v2662_v54 }
 0x18f   :  { %v198_v57 = vmul.f32 %v3806_v56, %v3806_v56  ;;  %445 = vmatpush.bf16.msra.mxu3 %v2695_v42  ;;  %v3406_v42 = vld [vmem:[%s4137_s5 + $0x3] ss:$0 sm:$0xff] }
 0x190   :  { %419 = vmatpush.bf16.msra.mxu1 %v2663_v58 }
 0x191   :  { %201 = vadd.xlane.f32.xlu2 %v198_v57  ;;  %v3213_v57 = vld [vmem:[#allocation4 + $0x1c] sm:$0xf] }
 0x192   :  { %v2667_v62 = vor.u32 %v3213_v57, %v2664_v59 }
 0x193   :  { %446 = vmatpush.bf16.msra.mxu3 %v2683_v53 }
 0x194   :  { %433 = vmatpush.bf16.msra.mxu2 %v2667_v62  ;;  %420 = vmatpush.bf16.msra.mxu1 %v2651_v5 }
 0x197   :  { %447 = vmatpush.bf16.msra.mxu3 %v2671_v63 }
 0x198   :  { %434 = vmatpush.bf16.msra.mxu2 %v2655_v10 }
 0x19b   :  { %448 = vmatpush.bf16.msra.mxu3 %v2659_v11 }
 0x1fc   :  { %v200_v4 = vpop.xlane.xlu2 %199 }
 0x1fd   :  { %v203_v9 = vmul.f32 %v200_v4, %v3798_v49 }
 0x1ff   :  { %v205_v12 = vadd.f32 1e-12, %v203_v9 }
 0x201   :  { %3426 = vrsqrt.f32 %v205_v12  ;;  %vm213_vm10 = vweird.f32 %v205_v12 }
 0x204   :  { %v202_v14 = vpop.xlane.xlu2 %201 }
 0x205   :  { %v204_v15 = vmul.f32 %v202_v14, %v3798_v49 }
 0x207   :  { %v3427_v18 = vpop.eup %3426  ;;  %v206_v19 = vadd.f32 1e-12, %v204_v15 }
 0x208   :  { %v208_v20 = vmul.f32 %v3427_v18, %v205_v12  ;;  %vm214_vm9 = vweird.f32 %v3427_v18 }
 0x209   :  { %3428 = vrsqrt.f32 %v206_v19  ;;  %vm215_vm11 = vmor %vm213_vm10, %vm214_vm9  ;;  %vm223_vm13 = vweird.f32 %v206_v19 }
 0x20a   :  { %v209_v21 = vmul.f32 %v3427_v18, %v208_v20 }
 0x20c   :  { %v210_v22 = vmul.f32 0.5, %v209_v21 }
 0x20e   :  { %v211_v23 = vsub.f32 1.5, %v210_v22 }
 0x20f   :  { %v3429_v24 = vpop.eup %3428 }
 0x210   :  { %v212_v25 = vmul.f32 %v3427_v18, %v211_v23  ;;  %v218_v26 = vmul.f32 %v3429_v24, %v206_v19  ;;  %vm224_vm12 = vweird.f32 %v3429_v24 }
 0x211   :  { %vm225_vm14 = vmor %vm223_vm13, %vm224_vm12 }
 0x212   :  { %v219_v27 = vmul.f32 %v3429_v24, %v218_v26  ;;  %v216_v28 = vsel %vm215_vm11, %v3427_v18, %v212_v25 }
 0x213   :  { %v227_v31 = vmul.f32 %v216_v28, %v3801_v52 }
 0x214   :  { %v220_v29 = vmul.f32 0.5, %v219_v27 }
 0x215   :  { %v230_v36 = vmul.f32 %v3403_v32, %v227_v31 }
 0x216   :  { %v221_v30 = vsub.f32 1.5, %v220_v29 }
 0x217   :  { %v3820_v39 = vadd.f32 %v3404_v37, %v230_v36 }
 0x218   :  { %v222_v33 = vmul.f32 %v3429_v24, %v221_v30 }
 0x21a   :  { %v226_v34 = vsel %vm225_vm14, %v3429_v24, %v222_v33 }
 0x21b   :  { %v228_v35 = vmul.f32 %v226_v34, %v3806_v56  ;;  %v3405_v56 = vld [vmem:[%s4137_s5 + $0x2] ss:$0 sm:$0xff] }
 0x21d   :  { %v231_v38 = vmul.f32 %v3403_v32, %v228_v35 }
 0x21f   :  { %v3822_v40 = vadd.f32 %v3404_v37, %v231_v38 }
 0x221   :  { %v284_v52 = vpack.c.bf16 %v3822_v40, %v3820_v39 }
 0x223   :  { %421 = vmatmul.bf16.vlgmr.msra.gmra.mxu1 %v284_v52  ;;  %435 = vmatmul.bf16.vlgmr.msra.gmra.mxu2 %v284_v52 }
 0x224   :  { %449 = vmatmul.bf16.vlgmr.msra.gmra.mxu3 %v284_v52 }
 0x2a0   :  { %v422_v41 = vpop.f32.mrf.mxu1 }
 0x2a1   :  { %v457_v43 = vadd.f32 %v3405_v56, %v422_v41 }
 0x2a3   :  { %v467_v50 = vpack.c.bf16 %v457_v43, %v457_v43 }
 0x2a5   :  { %v521_v55 = vunpack.c.l.b16 %v467_v50 }
 0x2a6   :  { %v436_v44 = vpop.f32.mrf.mxu2 }
 0x2a7   :  { %v461_v45 = vadd.f32 %v3406_v42, %v436_v44  ;;  %v450_v46 = vpop.f32.mrf.mxu3 }
 0x2a8   :  { %v424_v48 = vpop.f32.mrf.mxu1  ;;  %v465_v54 = vadd.f32 %v3407_v47, %v450_v46 }
 0x2a9   :  { %v458_v51 = vadd.f32 %v3405_v56, %v424_v48  ;;  %469 = vxpose.xlu0.b32.start [1/2] (short) %v461_v45, 128 }
 0x2aa   :  { %v517_v62 = vpack.c.bf16 %v465_v54, %v465_v54 }
 0x2ab   :  { %v468_v53 = vpack.c.bf16 %v458_v51, %v458_v51 }
 0x2ac   :  { %v580_v1 = vunpack.c.l.b16 %v517_v62 }
 0x2ad   :  { %v522_v57 = vunpack.c.l.b16 %v468_v53 }
 0x2ae   :  { %v438_v58 = vpop.f32.mrf.mxu2 }
 0x2af   :  { %v523_v59 = vpack.c.b16 %v522_v57, %v521_v55  ;;  %v462_v60 = vadd.f32 %v3406_v42, %v438_v58  ;;  %v452_v61 = vpop.f32.mrf.mxu3 }
 0x2b0   :  { %v466_v63 = vadd.f32 %v3407_v47, %v452_v61 }
 0x2b1   :  { %470 = vxpose.xlu0.b32.end [2/2] (short) %v462_v60, 128  ;;  %749 = vrot.lane.b32.xlu2 %v523_v59, %s3674_s9 }
 0x2b2   :  { %v518_v0 = vpack.c.bf16 %v466_v63, %v466_v63  ;;  %601 = vrot.lane.b32.xlu1 %v523_v59, %s3675_s24 }
 0x2b4   :  { %v581_v2 = vunpack.c.l.b16 %v518_v0 }
 0x2b6   :  { %v3837_v4 = vpack.c.b16 %v581_v2, %v580_v1 }
 0x2b8   :  { %594 = vmatpush.bf16.msrb.mxu3 %v3837_v4 }
 0x2b9   :  { %675 = vrot.lane.b32.xlu2 %v523_v59, %s3668_s25 }
 0x30b   :  { %v750_v44 = vpop.permute.xlu2 %749 }
 0x313   :  { %v676_v55 = vpop.permute.xlu2 %675 }
 0x324   :  { %v602_v37 = vpop.permute.xlu1 %601 }
 0x34d   :  { %v485_v5 = vpop.trf.xlu0 }
 0x34e   :  { %v501_v12 = vpack.c.bf16 %v485_v5, %v485_v5 }
 0x350   :  { %v528_v20 = vunpack.c.l.b16 %v501_v12 }
 0x355   :  { %v486_v6 = vpop.trf.xlu0 }
 0x356   :  { %v502_v10 = vpack.c.bf16 %v486_v6, %v486_v6 }
 0x358   :  { %v529_v18 = vunpack.c.l.b16 %v502_v10 }
 0x35a   :  { %v532_v22 = vpack.c.b16 %v529_v18, %v528_v20 }
 0x35d   :  { %v487_v7 = vpop.trf.xlu0 }
 0x35e   :  { %v503_v8 = vpack.c.bf16 %v487_v7, %v487_v7 }
 0x360   :  { %v530_v14 = vunpack.c.l.b16 %v503_v8  ;;  %v3676_v8 = vmov -1e+09  }
 0x365   :  { %v488_v9 = vpop.trf.xlu0 }
 0x366   :  { %v504_v11 = vpack.c.bf16 %v488_v9, %v488_v9  ;;  %v3850_v9 = vsel %vm248_vm4, 0.0, %v3676_v8 }
 0x368   :  { %v531_v15 = vunpack.c.l.b16 %v504_v11 }
 0x36a   :  { %v533_v19 = vpack.c.b16 %v531_v15, %v530_v14  ;;  %v3859_v14 = vsel %vm249_vm5, 0.0, %v3676_v8 }
 0x36c   :  { %546 = vmatpush.bf16.msrb.mxu2 %v533_v19 }
 0x36d   :  { %v489_v21 = vpop.trf.xlu0 }
 0x36e   :  { %v505_v29 = vpack.c.bf16 %v489_v21, %v489_v21 }
 0x370   :  { %547 = vmatpush.bf16.msrb.mxu2 %v532_v22  ;;  %v607_v34 = vunpack.c.l.b16 %v505_v29 }
 0x373   :  { %2744 = vmatmul.msk.bf16.vlgmr.msrb.gmra.mxu2 %vm536_vm15, %v523_v59 }
 0x375   :  { %v490_v23 = vpop.trf.xlu0 }
 0x376   :  { %v506_v27 = vpack.c.bf16 %v490_v23, %v490_v23 }
 0x378   :  { %v608_v32 = vunpack.c.l.b16 %v506_v27 }
 0x37a   :  { %v611_v36 = vpack.c.b16 %v608_v32, %v607_v34 }
 0x37d   :  { %v491_v24 = vpop.trf.xlu0 }
 0x37e   :  { %v507_v25 = vpack.c.bf16 %v491_v24, %v491_v24 }
 0x380   :  { %v609_v30 = vunpack.c.l.b16 %v507_v25 }
 0x385   :  { %v492_v26 = vpop.trf.xlu0 }
 0x386   :  { %v508_v28 = vpack.c.bf16 %v492_v26, %v492_v26 }
 0x388   :  { %v610_v31 = vunpack.c.l.b16 %v508_v28 }
 0x38a   :  { %v612_v33 = vpack.c.b16 %v610_v31, %v609_v30 }
 0x38c   :  { %624 = vmatpush.bf16.msra.mxu2 %v612_v33 }
 0x38d   :  { %v493_v35 = vpop.trf.xlu0 }
 0x38e   :  { %v509_v45 = vpack.c.bf16 %v493_v35, %v493_v35 }
 0x390   :  { %625 = vmatpush.bf16.msra.mxu2 %v611_v36  ;;  %v681_v51 = vunpack.c.l.b16 %v509_v45 }
 0x393   :  { %2746 = vmatmul.msk.bf16.vlgmr.msra.gmra.mxu2 %vm536_vm15, %v602_v37 }
 0x395   :  { %v494_v38 = vpop.trf.xlu0 }
 0x396   :  { %v510_v42 = vpack.c.bf16 %v494_v38, %v494_v38 }
 0x398   :  { %v682_v48 = vunpack.c.l.b16 %v510_v42 }
 0x39a   :  { %v685_v54 = vpack.c.b16 %v682_v48, %v681_v51 }
 0x39d   :  { %v495_v52 = vpop.trf.xlu0 }
 0x39e   :  { %v511_v41 = vpack.c.bf16 %v495_v52, %v495_v52 }
 0x3a0   :  { %v683_v46 = vunpack.c.l.b16 %v511_v41 }
 0x3a5   :  { %v496_v56 = vpop.trf.xlu0 }
 0x3a6   :  { %v512_v43 = vpack.c.bf16 %v496_v56, %v496_v56 }
 0x3a8   :  { %v684_v47 = vunpack.c.l.b16 %v512_v43 }
 0x3aa   :  { %v686_v50 = vpack.c.b16 %v684_v47, %v683_v46 }
 0x3ac   :  { %698 = vmatpush.bf16.msrb.mxu0 %v686_v50 }
 0x3ad   :  { %v497_v53 = vpop.trf.xlu0 }
 0x3ae   :  { %v513_v60 = vpack.c.bf16 %v497_v53, %v497_v53 }
 0x3b0   :  { %699 = vmatpush.bf16.msrb.mxu0 %v685_v54  ;;  %v755_v1 = vunpack.c.l.b16 %v513_v60 }
 0x3b3   :  { %2748 = vmatmul.msk.bf16.vlgmr.msrb.gmra.mxu0 %vm536_vm15, %v676_v55 }
 0x3b5   :  { %v498_v57 = vpop.trf.xlu0 }
 0x3b6   :  { %v514_v61 = vpack.c.bf16 %v498_v57, %v498_v57 }
 0x3b8   :  { %v756_v2 = vunpack.c.l.b16 %v514_v61 }
 0x3ba   :  { %v759_v7 = vpack.c.b16 %v756_v2, %v755_v1 }
 0x3bd   :  { %v499_v58 = vpop.trf.xlu0 }
 0x3be   :  { %v515_v59 = vpack.c.bf16 %v499_v58, %v499_v58 }
 0x3c0   :  { %v757_v63 = vunpack.c.l.b16 %v515_v59 }
 0x3c5   :  { %v500_v62 = vpop.trf.xlu0 }
 0x3c6   :  { %v516_v0 = vpack.c.bf16 %v500_v62, %v500_v62 }
 0x3c8   :  { %v758_v5 = vunpack.c.l.b16 %v516_v0 }
 0x3ca   :  { %v760_v6 = vpack.c.b16 %v758_v5, %v757_v63 }
 0x3cc   :  { %772 = vmatpush.bf16.msrb.mxu2 %v760_v6 }
 0x3d0   :  { %773 = vmatpush.bf16.msrb.mxu2 %v759_v7 }
 0x3d3   :  { %2750 = vmatmul.msk.bf16.vlgmr.msrb.gmra.mxu2 %vm536_vm15, %v750_v44 }
 0x3f6   :  { %v549_v10 = vpop.f32.mrf.mxu2 }
 0x3f7   :  { %v550_v11 = vadd.f32 %v549_v10, %v3850_v9 }
 0x3f9   :  { %v555_v12 = vsel %vm554_vm0, %v550_v11, -inf }
 0x3fa   :  { %556 = vmax.xlane.f32.xlu1 %v555_v12 }
 0x3fe   :  { %v551_v13 = vpop.f32.mrf.mxu2 }
 0x3ff   :  { %v552_v15 = vadd.f32 %v551_v13, %v3859_v14 }
 0x401   :  { %v558_v18 = vsel %vm554_vm0, %v552_v15, -inf }
 0x402   :  { %559 = vmax.xlane.f32.xlu2 %v558_v18 }
 0x416   :  { %v627_v19 = vpop.f32.mrf.mxu2 }
 0x417   :  { %v628_v20 = vadd.f32 %v627_v19, %v3850_v9 }
 0x419   :  { %v632_v21 = vsel %vm554_vm0, %v628_v20, -inf }
 0x41a   :  { %633 = vmax.xlane.f32.xlu0 %v632_v21 }
 0x41e   :  { %v629_v22 = vpop.f32.mrf.mxu2 }
 0x41f   :  { %v630_v16 = vadd.f32 %v629_v22, %v3859_v14 }
 0x421   :  { %v635_v17 = vsel %vm554_vm0, %v630_v16, -inf }
 0x422   :  { %636 = vmax.xlane.f32.xlu1 %v635_v17 }
 0x430   :  { %v701_v23 = vpop.f32.mrf.mxu0 }
 0x431   :  { %v702_v24 = vadd.f32 %v701_v23, %v3850_v9 }
 0x433   :  { %v706_v25 = vsel %vm554_vm0, %v702_v24, -inf }
 0x434   :  { %707 = vmax.xlane.f32.xlu2 %v706_v25 }
 0x438   :  { %v703_v26 = vpop.f32.mrf.mxu0 }
 0x439   :  { %v704_v27 = vadd.f32 %v703_v26, %v3859_v14 }
 0x43b   :  { %v709_v28 = vsel %vm554_vm0, %v704_v27, -inf }
 0x43c   :  { %710 = vmax.xlane.f32.xlu1 %v709_v28 }
 0x456   :  { %v775_v29 = vpop.f32.mrf.mxu2 }
 0x457   :  { %v776_v30 = vadd.f32 %v775_v29, %v3850_v9 }
 0x459   :  { %v780_v31 = vsel %vm554_vm0, %v776_v30, -inf }
 0x45a   :  { %781 = vmax.xlane.f32.xlu2 %v780_v31 }
 0x45e   :  { %v777_v32 = vpop.f32.mrf.mxu2 }
 0x45f   :  { %v778_v33 = vadd.f32 %v777_v32, %v3859_v14 }
 0x461   :  { %v783_v34 = vsel %vm554_vm0, %v778_v33, -inf }
 0x462   :  { %784 = vmax.xlane.f32.xlu1 %v783_v34 }
 0x46d   :  { %v557_v35 = vpop.xlane.xlu1 %556 }
 0x46e   :  { %v561_v36 = vsub.f32 %v550_v11, %v557_v35 }
 0x470   :  { %v563_v37 = vmul.f32 1.442695, %v561_v36 }
 0x472   :  { %3430 = vpow2.f32 %v563_v37 }
 0x475   :  { %v560_v38 = vpop.xlane.xlu2 %559 }
 0x476   :  { %v562_v52 = vsub.f32 %v552_v15, %v560_v38 }
 0x478   :  { %v3431_v41 = vpop.eup %3430  ;;  %v565_v56 = vmul.f32 1.442695, %v562_v52 }
 0x479   :  { %v567_v42 = vsel %vm554_vm0, %v3431_v41, 0.0 }
 0x47a   :  { %3432 = vpow2.f32 %v565_v56  ;;  %568 = vadd.xlane.f32.xlu2 %v567_v42 }
 0x480   :  { %v3433_v43 = vpop.eup %3432 }
 0x481   :  { %v570_v44 = vsel %vm554_vm0, %v3433_v43, 0.0 }
 0x482   :  { %571 = vadd.xlane.f32.xlu1 %v570_v44 }
 0x48d   :  { %v634_v45 = vpop.xlane.xlu0 %633 }
 0x48e   :  { %v638_v46 = vsub.f32 %v628_v20, %v634_v45 }
 0x490   :  { %v640_v47 = vmul.f32 1.442695, %v638_v46 }
 0x492   :  { %3434 = vpow2.f32 %v640_v47 }
 0x495   :  { %v637_v48 = vpop.xlane.xlu1 %636 }
 0x496   :  { %v639_v50 = vsub.f32 %v630_v16, %v637_v48 }
 0x498   :  { %v3435_v51 = vpop.eup %3434  ;;  %v642_v53 = vmul.f32 1.442695, %v639_v50 }
 0x499   :  { %v644_v54 = vsel %vm554_vm0, %v3435_v51, 0.0 }
 0x49a   :  { %3436 = vpow2.f32 %v642_v53  ;;  %645 = vadd.xlane.f32.xlu2 %v644_v54 }
 0x4a0   :  { %v3437_v55 = vpop.eup %3436 }
 0x4a1   :  { %v647_v57 = vsel %vm554_vm0, %v3437_v55, 0.0 }
 0x4a2   :  { %648 = vadd.xlane.f32.xlu1 %v647_v57  ;;  %v3241_v57 = vld [vmem:[#allocation6 + $0x38] sm:$0xff] }
 0x4a3   :  { %922 = vmatpush.bf16.msra.mxu0 %v3241_v57  ;;  %v2828_v57 = vld [vmem:[#allocation7 + $0x58] sm:$0xf0] }
 0x4a7   :  { %v708_v58 = vpop.xlane.xlu2 %707 }
 0x4a8   :  { %v712_v59 = vsub.f32 %v702_v24, %v708_v58  ;;  %v3240_v58 = vld [vmem:[#allocation6 + $0x30] sm:$0xff] }
 0x4a9   :  { %923 = vmatpush.bf16.msra.mxu0 %v3240_v58 }
 0x4aa   :  { %v714_v60 = vmul.f32 1.442695, %v712_v59 }
 0x4ac   :  { %3438 = vpow2.f32 %v714_v60 }
 0x4af   :  { %v711_v63 = vpop.xlane.xlu1 %710 }
 0x4b0   :  { %v713_v0 = vsub.f32 %v704_v27, %v711_v63 }
 0x4b2   :  { %v3879_v61 = vpop.eup %3438  ;;  %655 = vrot.lane.b32.xlu2 %v3837_v4, %s3675_s24  ;;  %v716_v1 = vmul.f32 1.442695, %v713_v0 }
 0x4b3   :  { %v718_v62 = vsel %vm554_vm0, %v3879_v61, 0.0 }
 0x4b4   :  { %719 = vadd.xlane.f32.xlu1 %v718_v62  ;;  %3440 = vpow2.f32 %v716_v1  ;;  %v3238_v1 = vld [vmem:[#allocation6 + $0x20] sm:$0xff] }
 0x4ba   :  { %v3441_v2 = vpop.eup %3440 }
 0x4bb   :  { %v721_v5 = vsel %vm554_vm0, %v3441_v2, 0.0 }
 0x4cd   :  { %803 = vrot.lane.b32.xlu1 %v3837_v4, %s3674_s9  ;;  %v782_v6 = vpop.xlane.xlu2 %781 }
 0x4ce   :  { %v786_v7 = vsub.f32 %v776_v30, %v782_v6  ;;  %v3235_v6 = vld [vmem:[#allocation6 + $0x8] sm:$0xff] }
 0x4d0   :  { %v788_v8 = vmul.f32 1.442695, %v786_v7  ;;  %v3234_v7 = vld [vmem:[#allocation6] sm:$0xff] }
 0x4d2   :  { %3442 = vpow2.f32 %v788_v8 }
 0x4d5   :  { %v785_v10 = vpop.xlane.xlu1 %784 }
 0x4d6   :  { %v787_v11 = vsub.f32 %v778_v33, %v785_v10 }
 0x4d8   :  { %v790_v12 = vmul.f32 1.442695, %v787_v11  ;;  %v3443_v15 = vpop.eup %3442 }
 0x4d9   :  { %v792_v19 = vsel %vm554_vm0, %v3443_v15, 0.0 }
 0x4db   :  { %722 = vadd.xlane.f32.xlu2 %v721_v5  ;;  %v3236_v5 = vld [vmem:[#allocation6 + $0x10] sm:$0xff] }
 0x4ed   :  { %v569_v13 = vpop.xlane.xlu2 %568 }
 0x4ee   :  { %3444 = vrcp.f32 %v569_v13 }
 0x4ef   :  { %3446 = vpow2.f32 %v790_v12 }
 0x4f4   :  { %v3445_v20 = vpop.eup %3444 }
 0x4f5   :  { %v572_v18 = vpop.xlane.xlu1 %571  ;;  %v3447_v21 = vpop.eup %3446  ;;  %v575_v16 = vmul.f32 %v3445_v20, %v3431_v41 }
 0x4f6   :  { %3448 = vrcp.f32 %v572_v18  ;;  %v795_v23 = vsel %vm554_vm0, %v3447_v21, 0.0 }
 0x4f7   :  { %793 = vadd.xlane.f32.xlu1 %v792_v19 }
 0x4fc   :  { %v3449_v22 = vpop.eup %3448 }
 0x4fd   :  { %v576_v17 = vmul.f32 %v3449_v22, %v3433_v43 }
 0x4ff   :  { %796 = vadd.xlane.f32.xlu1 %v795_v23  ;;  %v577_v24 = vpack.c.bf16 %v576_v17, %v575_v16 }
 0x501   :  { %2745 = vmatmul.msk.bf16.vlgmr.msrb.gmra.mxu3 %vm554_vm0, %v577_v24 }
 0x50d   :  { %v646_v25 = vpop.xlane.xlu2 %645 }
 0x50e   :  { %3450 = vrcp.f32 %v646_v25 }
 0x514   :  { %v3451_v28 = vpop.eup %3450 }
 0x515   :  { %v656_v26 = vpop.permute.xlu2 %655  ;;  %v649_v27 = vpop.xlane.xlu1 %648  ;;  %v652_v30 = vmul.f32 %v3451_v28, %v3435_v51 }
 0x516   :  { %3452 = vrcp.f32 %v649_v27  ;;  %668 = vmatpush.bf16.msra.mxu3 %v656_v26  ;;  %v3408_v26 = vld [vmem:[%s4137_s5 + $0x5] ss:$0 sm:$0xff] }
 0x518   :  { %729 = vrot.lane.b32.xlu1 %v3837_v4, %s3668_s25 }
 0x51c   :  { %v3453_v29 = vpop.eup %3452 }
 0x51d   :  { %v653_v31 = vmul.f32 %v3453_v29, %v3437_v55 }
 0x51f   :  { %v654_v32 = vpack.c.bf16 %v653_v31, %v652_v30 }
 0x521   :  { %2747 = vmatmul.msk.bf16.vlgmr.msra.gmra.mxu3 %vm554_vm0, %v654_v32 }
 0x527   :  { %v720_v33 = vpop.xlane.xlu1 %719 }
 0x53f   :  { %v804_v34 = vpop.permute.xlu1 %803 }
 0x540   :  { %816 = vmatpush.bf16.msrb.mxu3 %v804_v34 }
 0x54e   :  { %v723_v56 = vpop.xlane.xlu2 %722 }
 0x56a   :  { %v794_v35 = vpop.xlane.xlu1 %793 }
 0x56b   :  { %3454 = vrcp.f32 %v794_v35 }
 0x571   :  { %v3455_v37 = vpop.eup %3454 }
 0x572   :  { %v797_v36 = vpop.xlane.xlu1 %796  ;;  %v800_v52 = vmul.f32 %v3455_v37, %v3443_v15 }
 0x573   :  { %3456 = vrcp.f32 %v797_v36 }
 0x574   :  { %3458 = vrcp.f32 %v723_v56  ;;  %v3256_v56 = vld [vmem:[#allocation7 + $0x74] sm:$0xf] }
 0x575   :  { %3460 = vrcp.f32 %v720_v33 }
 0x579   :  { %v3457_v38 = vpop.eup %3456 }
 0x57a   :  { %v801_v41 = vmul.f32 %v3457_v38, %v3447_v21  ;;  %v3459_v42 = vpop.eup %3458 }
 0x57b   :  { %v3461_v43 = vpop.eup %3460  ;;  %v727_v44 = vmul.f32 %v3459_v42, %v3441_v2  ;;  %v3237_v2 = vld [vmem:[#allocation6 + $0x18] sm:$0xff] }
 0x57c   :  { %v802_v4 = vpack.c.bf16 %v801_v41, %v800_v52  ;;  %v726_v45 = vmul.f32 %v3461_v43, %v3879_v61  ;;  %v3239_v61 = vld [vmem:[#allocation6 + $0x28] sm:$0xff]  ;;  %v3257_v41 = vld [vmem:[#allocation7 + $0x74] sm:$0xf0]  ;;  %v2844_v42 = vld [vmem:[#allocation7 + $0x78] sm:$0xf0] }
 0x57d   :  { %924 = vmatpush.bf16.msra.mxu0 %v3239_v61  ;;  %v2847_v43 = vor.u32 %v3256_v56, %v2844_v42  ;;  %v3250_v61 = vld [vmem:[#allocation7 + $0x44] sm:$0xf] }
 0x57e   :  { %2751 = vmatmul.msk.bf16.vlgmr.msrb.gmra.mxu3 %vm554_vm0, %v802_v4  ;;  %v728_v47 = vpack.c.bf16 %v727_v44, %v726_v45  ;;  %v2834_v44 = vld [vmem:[#allocation7 + $0x60] sm:$0xf]  ;;  %v3255_v45 = vld [vmem:[#allocation7 + $0x64] sm:$0xf0] }
 0x57f   :  { %1103 = vmatpush.bf16.msra.mxu2 %v2847_v43 }
 0x581   :  { %925 = vmatpush.bf16.msra.mxu0 %v3238_v1  ;;  %v2810_v1 = vld [vmem:[#allocation7 + $0x30] sm:$0xf] }
 0x584   :  { %v596_v48 = vpop.f32.mrf.mxu3 }
 0x585   :  { %926 = vmatpush.bf16.msra.mxu0 %v3237_v2  ;;  %v3249_v2 = vld [vmem:[#allocation7 + $0x34] sm:$0xf0] }
 0x589   :  { %927 = vmatpush.bf16.msra.mxu0 %v3236_v5  ;;  %v3248_v5 = vld [vmem:[#allocation7 + $0x34] sm:$0xf] }
 0x58a   :  { %v730_v46 = vpop.permute.xlu1 %729 }
 0x58b   :  { %742 = vmatpush.bf16.msrb.mxu1 %v730_v46  ;;  %v3254_v46 = vld [vmem:[#allocation7 + $0x64] sm:$0xf] }
 0x58c   :  { %v598_v50 = vpop.f32.mrf.mxu3 }
 0x58d   :  { %928 = vmatpush.bf16.msra.mxu0 %v3235_v6  ;;  %v2811_v6 = vor.u32 %v3249_v2, %v2810_v1  ;;  %v3261_v1 = vld [vmem:[#allocation9 + $0x18] sm:$0xff]  ;;  %v3270_v2 = vld [vmem:[#allocation9 + $0x60] sm:$0xff] }
 0x58e   :  { %2749 = vmatmul.msk.bf16.vlgmr.msrb.gmra.mxu1 %vm554_vm0, %v728_v47  ;;  %v2835_v47 = vor.u32 %v3255_v45, %v2834_v44 }
 0x591   :  { %929 = vmatpush.bf16.msra.mxu0 %v3234_v7  ;;  %v2812_v7 = vld [vmem:[#allocation7 + $0x38] sm:$0xf0] }
 0x5a4   :  { %v670_v51 = vpop.f32.mrf.mxu3 }
 0x5ac   :  { %v672_v53 = vpop.f32.mrf.mxu3 }
 0x5ad   :  { %v3371_v54 = vpack.i.bf16 %v672_v53, %v670_v51  ;;  %v2826_v51 = vld [vmem:[#allocation7 + $0x50] sm:$0xf]  ;;  %v3253_v53 = vld [vmem:[#allocation7 + $0x54] sm:$0xf0] }
 0x5af   :  { %3372 = vrot.lane.b32.xlu1 %v3371_v54, %s3674_s9  ;;  %v3252_v54 = vld [vmem:[#allocation7 + $0x54] sm:$0xf] }
 0x5b0   :  { %v2831_v58 = vor.u32 %v3252_v54, %v2828_v57  ;;  %v3410_v54 = vld [vmem:[%s4137_s5 + $0x7] ss:$0 sm:$0xff] }
 0x601   :  { %v818_v55 = vpop.f32.mrf.mxu3 }
 0x609   :  { %v820_v59 = vpop.f32.mrf.mxu3 }
 0x60a   :  { %v3381_v60 = vpack.i.bf16 %v820_v59, %v818_v55  ;;  %v2827_v55 = vor.u32 %v3253_v53, %v2826_v51  ;;  %v2818_v59 = vld [vmem:[#allocation7 + $0x40] sm:$0xf] }
 0x60b   :  { %v744_v62 = vpop.f32.mrf.mxu1 }
 0x60c   :  { %3382 = vrot.lane.b32.xlu1 %v3381_v60, %s3675_s24  ;;  %v3251_v60 = vld [vmem:[#allocation7 + $0x44] sm:$0xf0] }
 0x613   :  { %v746_v63 = vpop.f32.mrf.mxu1 }
 0x614   :  { %v3376_v0 = vpack.i.bf16 %v746_v63, %v744_v62  ;;  %v2819_v62 = vor.u32 %v3251_v60, %v2818_v59  ;;  %v2820_v63 = vld [vmem:[#allocation7 + $0x48] sm:$0xf0]  ;;  %v3265_v59 = vld [vmem:[#allocation9 + $0x38] sm:$0xff]  ;;  %v3264_v60 = vld [vmem:[#allocation9 + $0x30] sm:$0xff] }
 0x615   :  { %1285 = vmatpush.bf16.msra.mxu3 %v3265_v59 }
 0x616   :  { %3377 = vrot.lane.b32.xlu2 %v3376_v0, %s3668_s25  ;;  %v2823_v0 = vor.u32 %v3250_v61, %v2820_v63  ;;  %v3263_v61 = vld [vmem:[#allocation9 + $0x28] sm:$0xff]  ;;  %v3262_v63 = vld [vmem:[#allocation9 + $0x20] sm:$0xff] }
 0x619   :  { %1286 = vmatpush.bf16.msra.mxu3 %v3264_v60 }
 0x61d   :  { %1287 = vmatpush.bf16.msra.mxu3 %v3263_v61 }
 0x621   :  { %v3373_v8 = vpop.permute.xlu1 %3372  ;;  %1288 = vmatpush.bf16.msra.mxu3 %v3262_v63 }
 0x622   :  { %v3375_v11 = vunpack.i.h.bf16 %v3373_v8  ;;  %v3374_v12 = vunpack.i.l.bf16 %v3373_v8  ;;  %v2815_v8 = vor.u32 %v3248_v5, %v2812_v7  ;;  %v3260_v5 = vld [vmem:[#allocation9 + $0x10] sm:$0xff]  ;;  %v3269_v7 = vld [vmem:[#allocation9 + $0x58] sm:$0xff] }
 0x624   :  { %v848_v19 = vsel %vm536_vm15, %v598_v50, %v3375_v11  ;;  %v847_v20 = vsel %vm536_vm15, %v596_v48, %v3374_v12  ;;  %v2836_v48 = vld [vmem:[#allocation7 + $0x68] sm:$0xf0]  ;;  %v3247_v11 = vld [vmem:[#allocation7 + $0x24] sm:$0xf0]  ;;  %v3246_v12 = vld [vmem:[#allocation7 + $0x24] sm:$0xf] }
 0x625   :  { %v2839_v50 = vor.u32 %v3254_v46, %v2836_v48  ;;  %1289 = vmatpush.bf16.msra.mxu3 %v3261_v1  ;;  %v3411_v1 = vld [vmem:[%s4137_s5 + $0x8] ss:$0 sm:$0xff] }
 0x627   :  { %1104 = vmatpush.bf16.msra.mxu2 %v2839_v50 }
 0x629   :  { %1290 = vmatpush.bf16.msra.mxu3 %v3260_v5 }
 0x62b   :  { %1105 = vmatpush.bf16.msra.mxu2 %v2831_v58 }
 0x62f   :  { %1106 = vmatpush.bf16.msra.mxu2 %v2823_v0  ;;  %v3271_v0 = vld [vmem:[#allocation9 + $0x68] sm:$0xff] }
 0x633   :  { %1107 = vmatpush.bf16.msra.mxu2 %v2815_v8  ;;  %v3259_v8 = vld [vmem:[#allocation9 + $0x8] sm:$0xff] }
 0x634   :  { %1291 = vmatpush.bf16.msra.mxu3 %v3259_v8 }
 0x670   :  { %v3378_v10 = vpop.permute.xlu2 %3377 }
 0x671   :  { %v3380_v13 = vunpack.i.h.bf16 %v3378_v10  ;;  %v3379_v15 = vunpack.i.l.bf16 %v3378_v10  ;;  %v2802_v10 = vld [vmem:[#allocation7 + $0x20] sm:$0xf] }
 0x673   :  { %v850_v16 = vsel %vm849_vm1, %v847_v20, %v3379_v15  ;;  %v851_v17 = vsel %vm849_vm1, %v848_v19, %v3380_v13  ;;  %v2803_v13 = vor.u32 %v3247_v11, %v2802_v10  ;;  %v2804_v15 = vld [vmem:[#allocation7 + $0x28] sm:$0xf0]  ;;  %v2794_v19 = vld [vmem:[#allocation7 + $0x10] sm:$0xf]  ;;  %v3245_v20 = vld [vmem:[#allocation7 + $0x14] sm:$0xf0] }
 0x674   :  { %v3268_v11 = vld [vmem:[#allocation9 + $0x50] sm:$0xff] }
 0x67e   :  { %v3383_v18 = vpop.permute.xlu1 %3382 }
 0x67f   :  { %v3385_v21 = vunpack.i.h.bf16 %v3383_v18  ;;  %v3384_v22 = vunpack.i.l.bf16 %v3383_v18  ;;  %v2807_v18 = vor.u32 %v3246_v12, %v2804_v15 }
 0x681   :  { %v853_v23 = vsel %vm852_vm2, %v850_v16, %v3384_v22  ;;  %v854_v24 = vsel %vm852_vm2, %v851_v17, %v3385_v21  ;;  %1108 = vmatpush.bf16.msra.mxu2 %v2807_v18  ;;  %v3244_v21 = vld [vmem:[#allocation7 + $0x14] sm:$0xf]  ;;  %v2795_v22 = vor.u32 %v3245_v20, %v2794_v19  ;;  %v2796_v16 = vld [vmem:[#allocation7 + $0x18] sm:$0xf0]  ;;  %v2786_v17 = vld [vmem:[#allocation7] sm:$0xf] }
 0x682   :  { %v871_v25 = vpack.c.bf16 %v854_v24, %v853_v23  ;;  %v3243_v23 = vld [vmem:[#allocation7 + $0x4] sm:$0xf0] }
 0x683   :  { %v3267_v18 = vld [vmem:[#allocation9 + $0x48] sm:$0xff] }
 0x684   :  { %930 = vmatmul.bf16.vlgmr.msra.gmra.mxu0 %v871_v25  ;;  %v2799_v25 = vor.u32 %v3244_v21, %v2796_v16  ;;  %v3266_v16 = vld [vmem:[#allocation9 + $0x40] sm:$0xff] }
 0x686   :  { %1109 = vmatpush.bf16.msra.mxu2 %v2799_v25 }
 0x701   :  { %v931_v27 = vpop.f32.mrf.mxu0 }
 0x702   :  { %v932_v28 = vadd.f32 %v3408_v26, %v931_v27  ;;  %v2788_v27 = vld [vmem:[#allocation7 + $0x8] sm:$0xf0] }
 0x704   :  { %v936_v29 = vadd.f32 %v932_v28, %v3820_v39 }
 0x706   :  { %940 = vadd.xlane.f32.xlu1 %v936_v29 }
 0x709   :  { %v933_v30 = vpop.f32.mrf.mxu0 }
 0x70a   :  { %v934_v31 = vadd.f32 %v3408_v26, %v933_v30  ;;  %v3242_v26 = vld [vmem:[#allocation7 + $0x4] sm:$0xf] }
 0x70b   :  { %v2791_v30 = vor.u32 %v3242_v26, %v2788_v27 }
 0x70c   :  { %v937_v32 = vadd.f32 %v934_v31, %v3822_v40  ;;  %v2842_v40 = vld [vmem:[#allocation7 + $0x70] sm:$0xf] }
 0x70d   :  { %v2843_v4 = vor.u32 %v3257_v41, %v2842_v40  ;;  %1110 = vmatpush.bf16.msra.mxu2 %v2791_v30 }
 0x70e   :  { %942 = vadd.xlane.f32.xlu2 %v937_v32 }
 0x70f   :  { %1089 = vmatpush.bf16.msra.mxu1 %v2843_v4 }
 0x713   :  { %1090 = vmatpush.bf16.msra.mxu1 %v2835_v47  ;;  %v3409_v47 = vld [vmem:[%s4137_s5 + $0x6] ss:$0 sm:$0xff] }
 0x717   :  { %1091 = vmatpush.bf16.msra.mxu1 %v2827_v55 }
 0x71b   :  { %1092 = vmatpush.bf16.msra.mxu1 %v2819_v62  ;;  %v3272_v62 = vld [vmem:[#allocation9 + $0x70] sm:$0xff] }
 0x71f   :  { %1093 = vmatpush.bf16.msra.mxu1 %v2811_v6  ;;  %v1003_v6 = vld [vmem:[%s4138_s6] ss:$2 sm:$0x3] }
 0x720   :  { %v1005_v10 = vperm.slane %v1003_v6, 0  ;;  %v1006_v20 = vperm.slane %v1003_v6, 1 }
 0x723   :  { %1094 = vmatpush.bf16.msra.mxu1 %v2803_v13  ;;  %v3258_v13 = vld [vmem:[#allocation9] sm:$0xff] }
 0x724   :  { %1292 = vmatpush.bf16.msra.mxu3 %v3258_v13 }
 0x727   :  { %1095 = vmatpush.bf16.msra.mxu1 %v2795_v22 }
 0x779   :  { %v941_v33 = vpop.xlane.xlu1 %940 }
 0x77a   :  { %v944_v34 = vmul.f32 %v941_v33, %v3798_v49 }
 0x77c   :  { %v3912_v35 = vsub.f32 %v936_v29, %v944_v34  ;;  %v2787_v29 = vor.u32 %v3243_v23, %v2786_v17 }
 0x77e   :  { %v948_v36 = vmul.f32 %v3912_v35, %v3912_v35  ;;  %1096 = vmatpush.bf16.msra.mxu1 %v2787_v29 }
 0x780   :  { %950 = vadd.xlane.f32.xlu1 %v948_v36 }
 0x781   :  { %v943_v37 = vpop.xlane.xlu2 %942 }
 0x782   :  { %v945_v38 = vmul.f32 %v943_v37, %v3798_v49 }
 0x784   :  { %v3917_v52 = vsub.f32 %v937_v32, %v945_v38 }
 0x786   :  { %v949_v39 = vmul.f32 %v3917_v52, %v3917_v52 }
 0x788   :  { %952 = vadd.xlane.f32.xlu1 %v949_v39 }
 0x7f3   :  { %v951_v24 = vpop.xlane.xlu1 %950 }
 0x7f4   :  { %v954_v28 = vmul.f32 %v951_v24, %v3798_v49 }
 0x7f6   :  { %v956_v31 = vadd.f32 1e-12, %v954_v28 }
 0x7f8   :  { %3462 = vrsqrt.f32 %v956_v31  ;;  %vm964_vm4 = vweird.f32 %v956_v31 }
 0x7fb   :  { %v953_v32 = vpop.xlane.xlu1 %952 }
 0x7fc   :  { %v955_v33 = vmul.f32 %v953_v32, %v3798_v49 }
 0x7fe   :  { %v3463_v34 = vpop.eup %3462  ;;  %v957_v36 = vadd.f32 1e-12, %v955_v33 }
 0x7ff   :  { %v959_v37 = vmul.f32 %v3463_v34, %v956_v31  ;;  %vm965_vm3 = vweird.f32 %v3463_v34 }
 0x800   :  { %3464 = vrsqrt.f32 %v957_v36  ;;  %vm966_vm5 = vmor %vm964_vm4, %vm965_vm3  ;;  %vm974_vm7 = vweird.f32 %v957_v36 }
 0x801   :  { %v960_v38 = vmul.f32 %v3463_v34, %v959_v37 }
 0x803   :  { %v961_v39 = vmul.f32 0.5, %v960_v38 }
 0x805   :  { %v962_v40 = vsub.f32 1.5, %v961_v39 }
 0x806   :  { %v3465_v41 = vpop.eup %3464 }
 0x807   :  { %v963_v56 = vmul.f32 %v3463_v34, %v962_v40  ;;  %v969_v4 = vmul.f32 %v3465_v41, %v957_v36  ;;  %vm975_vm6 = vweird.f32 %v3465_v41 }
 0x808   :  { %vm976_vm8 = vmor %vm974_vm7, %vm975_vm6 }
 0x809   :  { %v970_v42 = vmul.f32 %v3465_v41, %v969_v4  ;;  %v967_v43 = vsel %vm966_vm5, %v3463_v34, %v963_v56 }
 0x80a   :  { %v978_v46 = vmul.f32 %v967_v43, %v3912_v35 }
 0x80b   :  { %v971_v44 = vmul.f32 0.5, %v970_v42 }
 0x80c   :  { %v981_v53 = vmul.f32 %v3409_v47, %v978_v46 }
 0x80d   :  { %v972_v45 = vsub.f32 1.5, %v971_v44 }
 0x80e   :  { %v3931_v57 = vadd.f32 %v3410_v54, %v981_v53 }
 0x80f   :  { %v973_v48 = vmul.f32 %v3465_v41, %v972_v45 }
 0x811   :  { %v977_v50 = vsel %vm976_vm8, %v3465_v41, %v973_v48 }
 0x812   :  { %v979_v51 = vmul.f32 %v977_v50, %v3917_v52  ;;  %v3273_v52 = vld [vmem:[#allocation9 + $0x78] sm:$0xff] }
 0x813   :  { %1299 = vmatpush.bf16.msrb.mxu0 %v3273_v52 }
 0x814   :  { %v982_v55 = vmul.f32 %v3409_v47, %v979_v51 }
 0x816   :  { %v3933_v58 = vadd.f32 %v3410_v54, %v982_v55 }
 0x817   :  { %1300 = vmatpush.bf16.msrb.mxu0 %v3272_v62 }
 0x818   :  { %v1002_v35 = vpack.c.bf16 %v3933_v58, %v3931_v57 }
 0x81a   :  { %1097 = vmatmul.bf16.vlgmr.msra.gmra.mxu1 %v1002_v35  ;;  %1111 = vmatmul.bf16.vlgmr.msra.gmra.mxu2 %v1002_v35 }
 0x81b   :  { %1301 = vmatpush.bf16.msrb.mxu0 %v3271_v0 }
 0x81f   :  { %1302 = vmatpush.bf16.msrb.mxu0 %v3270_v2 }
 0x823   :  { %1303 = vmatpush.bf16.msrb.mxu0 %v3269_v7 }
 0x827   :  { %1304 = vmatpush.bf16.msrb.mxu0 %v3268_v11 }
 0x82b   :  { %1305 = vmatpush.bf16.msrb.mxu0 %v3267_v18 }
 0x82f   :  { %1306 = vmatpush.bf16.msrb.mxu0 %v3266_v16 }
 0x897   :  { %v1098_v12 = vpop.f32.mrf.mxu1 }
 0x898   :  { %v1099_v15 = vadd.f32 %v1098_v12, %v1005_v10 }
 0x89a   :  { %v1117_v19 = vmul.f32 %v1099_v15, %v1099_v15 }
 0x89c   :  { %v1121_v21 = vmul.f32 %v1117_v19, %v1099_v15 }
 0x89d   :  { %v1112_v22 = vpop.f32.mrf.mxu2 }
 0x89e   :  { %v1125_v17 = vmul.f32 0.044715, %v1121_v21  ;;  %v1113_v23 = vadd.f32 %v1112_v22, %v1006_v20 }
 0x89f   :  { %v1100_v24 = vpop.f32.mrf.mxu1 }
 0x8a0   :  { %v1129_v25 = vadd.f32 %v1125_v17, %v1099_v15  ;;  %v1118_v26 = vmul.f32 %v1113_v23, %v1113_v23  ;;  %v1101_v27 = vadd.f32 %v1100_v24, %v1005_v10  ;;  %v3295_v24 = vld [vmem:[#allocation4 + $0x16c] sm:$0xf] }
 0x8a2   :  { %v1133_v28 = vmul.f32 0.7978846, %v1129_v25  ;;  %v1122_v29 = vmul.f32 %v1118_v26, %v1113_v23  ;;  %v1119_v30 = vmul.f32 %v1101_v27, %v1101_v27  ;;  %v3000_v26 = vld [vmem:[#allocation4 + $0x174] sm:$0xf0] }
 0x8a4   :  { %v1126_v31 = vmul.f32 0.044715, %v1122_v29  ;;  %v1123_v32 = vmul.f32 %v1119_v30, %v1101_v27  ;;  %3466 = vtanh.f32 %v1133_v28  ;;  %v3297_v28 = vld [vmem:[#allocation4 + $0x178] sm:$0xf0]  ;;  %v3003_v29 = vor.u32 %v3295_v24, %v3000_v26  ;;  %v3279_v24 = vld [vmem:[#allocation4 + $0xe8] sm:$0xf0] }
 0x8a5   :  { %v1114_v33 = vpop.f32.mrf.mxu2 }
 0x8a6   :  { %v1130_v34 = vadd.f32 %v1126_v31, %v1113_v23  ;;  %v1127_v36 = vmul.f32 0.044715, %v1123_v32  ;;  %v1115_v37 = vadd.f32 %v1114_v33, %v1006_v20  ;;  %1539 = vmatpush.bf16.msrb.mxu2 %v3003_v29  ;;  %v2986_v31 = vld [vmem:[#allocation4 + $0x150] sm:$0xf]  ;;  %v3293_v32 = vld [vmem:[#allocation4 + $0x158] sm:$0xf0] }
 0x8a7   :  { %v3292_v33 = vld [vmem:[#allocation4 + $0x154] sm:$0xf]  ;;  %v3275_v29 = vld [vmem:[#allocation4 + $0xc8] sm:$0xf0] }
 0x8a8   :  { %v1134_v38 = vmul.f32 0.7978846, %v1130_v34  ;;  %v1131_v39 = vadd.f32 %v1127_v36, %v1101_v27  ;;  %v1120_v40 = vmul.f32 %v1115_v37, %v1115_v37  ;;  %v2987_v34 = vor.u32 %v3293_v32, %v2986_v31  ;;  %v2988_v36 = vld [vmem:[#allocation4 + $0x15c] sm:$0xf0] }
 0x8aa   :  { %v1135_v41 = vmul.f32 0.7978846, %v1131_v39  ;;  %v1124_v56 = vmul.f32 %v1120_v40, %v1115_v37  ;;  %3468 = vtanh.f32 %v1134_v38  ;;  %v3467_v4 = vpop.eup %3466  ;;  %v3294_v38 = vld [vmem:[#allocation4 + $0x160] sm:$0xf0]  ;;  %v2991_v39 = vor.u32 %v3292_v33, %v2988_v36  ;;  %v2916_v33 = vld [vmem:[#allocation4 + $0xcc] sm:$0xf0] }
 0x8ab   :  { %v1141_v44 = vadd.f32 1.0, %v3467_v4  ;;  %v3289_v4 = vld [vmem:[#allocation4 + $0x13c] sm:$0xf]  ;;  %v3276_v36 = vld [vmem:[#allocation4 + $0xd0] sm:$0xf0] }
 0x8ac   :  { %3470 = vtanh.f32 %v1135_v41  ;;  %v1128_v42 = vmul.f32 0.044715, %v1124_v56  ;;  %1540 = vmatpush.bf16.msrb.mxu2 %v2991_v39  ;;  %v2974_v41 = vld [vmem:[#allocation4 + $0x138] sm:$0xf]  ;;  %v3290_v56 = vld [vmem:[#allocation4 + $0x140] sm:$0xf0] }
 0x8ad   :  { %v1145_v48 = vmul.f32 0.5, %v1141_v44  ;;  %v2982_v44 = vld [vmem:[#allocation4 + $0x140] sm:$0xf] }
 0x8ae   :  { %v1132_v43 = vadd.f32 %v1128_v42, %v1115_v37  ;;  %v2975_v42 = vor.u32 %v3290_v56, %v2974_v41 }
 0x8af   :  { %v1149_v54 = vmul.f32 %v1145_v48, %v1099_v15  ;;  %v2962_v48 = vld [vmem:[#allocation4 + $0x120] sm:$0xf] }
 0x8b0   :  { %v1136_v45 = vmul.f32 0.7978846, %v1132_v43  ;;  %v3469_v46 = vpop.eup %3468  ;;  %v2976_v43 = vld [vmem:[#allocation4 + $0x144] sm:$0xf0] }
 0x8b1   :  { %v1142_v51 = vadd.f32 1.0, %v3469_v46  ;;  %v2979_v46 = vor.u32 %v3289_v4, %v2976_v43 }
 0x8b2   :  { %v3471_v47 = vpop.eup %3470  ;;  %3472 = vtanh.f32 %v1136_v45  ;;  %v3291_v45 = vld [vmem:[#allocation4 + $0x148] sm:$0xf0] }
 0x8b3   :  { %v1143_v50 = vadd.f32 1.0, %v3471_v47  ;;  %v1146_v59 = vmul.f32 0.5, %v1142_v51  ;;  %v2983_v47 = vor.u32 %v3291_v45, %v2982_v44  ;;  %1541 = vmatpush.bf16.msrb.mxu2 %v2979_v46  ;;  %v3286_v51 = vld [vmem:[#allocation4 + $0x124] sm:$0xf] }
 0x8b5   :  { %v1147_v53 = vmul.f32 0.5, %v1143_v50  ;;  %v1150_v62 = vmul.f32 %v1146_v59, %v1113_v23  ;;  %v3296_v23 = vld [vmem:[#allocation4 + $0x170] sm:$0xf0]  ;;  %v3287_v50 = vld [vmem:[#allocation4 + $0x128] sm:$0xf0] }
 0x8b7   :  { %v1151_v55 = vmul.f32 %v1147_v53, %v1101_v27  ;;  %v3006_v27 = vld [vmem:[#allocation4 + $0x170] sm:$0xf]  ;;  %v2963_v53 = vor.u32 %v3287_v50, %v2962_v48 }
 0x8b8   :  { %v3473_v35 = vpop.eup %3472  ;;  %v3007_v30 = vor.u32 %v3297_v28, %v3006_v27  ;;  %v2914_v28 = vld [vmem:[#allocation4 + $0xc0] sm:$0xf] }
 0x8b9   :  { %v1144_v60 = vadd.f32 1.0, %v3473_v35  ;;  %v1185_v52 = vpack.c.bf16 %v1151_v55, %v1149_v54  ;;  %v2964_v54 = vld [vmem:[#allocation4 + $0x12c] sm:$0xf0]  ;;  %v2970_v55 = vld [vmem:[#allocation4 + $0x128] sm:$0xf]  ;;  %v2915_v32 = vor.u32 %v3275_v29, %v2914_v28 }
 0x8ba   :  { %1553 = vmatpush.bf16.msrb.mxu3 %v3007_v30  ;;  %v3288_v35 = vld [vmem:[#allocation4 + $0x130] sm:$0xf0]  ;;  %v2967_v59 = vor.u32 %v3286_v51, %v2964_v54  ;;  %v3274_v30 = vld [vmem:[#allocation4 + $0xc4] sm:$0xf] }
 0x8bb   :  { %v1148_v61 = vmul.f32 0.5, %v1144_v60  ;;  %1293 = vmatmul.bf16.vlgmr.msra.gmra.mxu3 %v1185_v52  ;;  %v2971_v60 = vor.u32 %v3288_v35, %v2970_v55  ;;  %v2950_v52 = vld [vmem:[#allocation4 + $0x108] sm:$0xf]  ;;  %v3412_v35 = vld [vmem:[%s4137_s5 + $0x9] ss:$0 sm:$0xff] }
 0x8bc   :  { %1542 = vmatpush.bf16.msrb.mxu2 %v2967_v59 }
 0x8bd   :  { %v1152_v63 = vmul.f32 %v1148_v61, %v1115_v37  ;;  %v2994_v37 = vld [vmem:[#allocation4 + $0x158] sm:$0xf]  ;;  %v3284_v61 = vld [vmem:[#allocation4 + $0x110] sm:$0xf0] }
 0x8be   :  { %v2995_v40 = vor.u32 %v3294_v38, %v2994_v37  ;;  %v2919_v37 = vor.u32 %v3274_v30, %v2916_v33 }
 0x8bf   :  { %v1186_v0 = vpack.c.bf16 %v1152_v63, %v1150_v62  ;;  %v3283_v62 = vld [vmem:[#allocation4 + $0x10c] sm:$0xf]  ;;  %v2951_v63 = vor.u32 %v3284_v61, %v2950_v52 }
 0x8c0   :  { %1554 = vmatpush.bf16.msrb.mxu3 %v2995_v40 }
 0x8c1   :  { %1307 = vmatmul.bf16.vlgmr.msrb.gmra.mxu0 %v1186_v0  ;;  %v2952_v0 = vld [vmem:[#allocation4 + $0x114] sm:$0xf0] }
 0x8c4   :  { %1555 = vmatpush.bf16.msrb.mxu3 %v2983_v47 }
 0x8c8   :  { %1556 = vmatpush.bf16.msrb.mxu3 %v2971_v60 }
 0x93e   :  { %v1294_v2 = vpop.f32.mrf.mxu3  ;;  %v1308_v5 = vpop.f32.mrf.mxu0 }
 0x93f   :  { %v1295_v6 = vadd.f32 %v3411_v1, %v1294_v2  ;;  %v3285_v2 = vld [vmem:[#allocation4 + $0x118] sm:$0xf0] }
 0x941   :  { %v1309_v7 = vadd.f32 %v1308_v5, %v1295_v6  ;;  %v2955_v5 = vor.u32 %v3283_v62, %v2952_v0  ;;  %v3413_v62 = vld [vmem:[%s4137_s5 + $0xa] ss:$0 sm:$0xff] }
 0x943   :  { %v1313_v8 = vadd.f32 %v1309_v7, %v3931_v57  ;;  %1543 = vmatpush.bf16.msrb.mxu2 %v2955_v5  ;;  %v2938_v7 = vld [vmem:[#allocation4 + $0xf0] sm:$0xf]  ;;  %v3415_v5 = vld [vmem:[%s4137_s5 + $0xc] ss:$0 sm:$0xff] }
 0x945   :  { %1317 = vadd.xlane.f32.xlu2 %v1313_v8 }
 0x946   :  { %v1296_v10 = vpop.f32.mrf.mxu3  ;;  %v1310_v12 = vpop.f32.mrf.mxu0 }
 0x947   :  { %v1297_v11 = vadd.f32 %v3411_v1, %v1296_v10  ;;  %v2958_v1 = vld [vmem:[#allocation4 + $0x110] sm:$0xf]  ;;  %v3280_v10 = vld [vmem:[#allocation4 + $0xf4] sm:$0xf] }
 0x948   :  { %v2959_v6 = vor.u32 %v3285_v2, %v2958_v1 }
 0x949   :  { %v1311_v13 = vadd.f32 %v1310_v12, %v1297_v11  ;;  %v2940_v12 = vld [vmem:[#allocation4 + $0xfc] sm:$0xf0] }
 0x94a   :  { %1557 = vmatpush.bf16.msrb.mxu3 %v2959_v6 }
 0x94b   :  { %v1314_v15 = vadd.f32 %v1311_v13, %v3933_v58  ;;  %v2998_v58 = vld [vmem:[#allocation4 + $0x168] sm:$0xf]  ;;  %v2946_v13 = vld [vmem:[#allocation4 + $0xf8] sm:$0xf] }
 0x94c   :  { %v2999_v25 = vor.u32 %v3296_v23, %v2998_v58  ;;  %v2928_v58 = vld [vmem:[#allocation4 + $0xe4] sm:$0xf0]  ;;  %v2934_v23 = vld [vmem:[#allocation4 + $0xe0] sm:$0xf] }
 0x94d   :  { %1319 = vadd.xlane.f32.xlu1 %v1314_v15  ;;  %v2935_v27 = vor.u32 %v3279_v24, %v2934_v23 }
 0x94e   :  { %1525 = vmatpush.bf16.msrb.mxu1 %v2999_v25 }
 0x952   :  { %1526 = vmatpush.bf16.msrb.mxu1 %v2987_v34  ;;  %v2922_v34 = vld [vmem:[#allocation4 + $0xc8] sm:$0xf] }
 0x953   :  { %v2923_v38 = vor.u32 %v3276_v36, %v2922_v34 }
 0x956   :  { %1527 = vmatpush.bf16.msrb.mxu1 %v2975_v42 }
 0x95a   :  { %1528 = vmatpush.bf16.msrb.mxu1 %v2963_v53 }
 0x95e   :  { %1529 = vmatpush.bf16.msrb.mxu1 %v2951_v63 }
 0x9b8   :  { %v1318_v18 = vpop.xlane.xlu2 %1317 }
 0x9b9   :  { %v1321_v19 = vmul.f32 %v1318_v18, %v3798_v49  ;;  %v2943_v18 = vor.u32 %v3280_v10, %v2940_v12 }
 0x9bb   :  { %v3946_v20 = vsub.f32 %v1313_v8, %v1321_v19  ;;  %v3281_v8 = vld [vmem:[#allocation4 + $0xf8] sm:$0xf0]  ;;  %1544 = vmatpush.bf16.msrb.mxu2 %v2943_v18 }
 0x9bc   :  { %v2939_v11 = vor.u32 %v3281_v8, %v2938_v7 }
 0x9bd   :  { %v1325_v21 = vmul.f32 %v3946_v20, %v3946_v20 }
 0x9be   :  { %1530 = vmatpush.bf16.msrb.mxu1 %v2939_v11  ;;  %v3416_v11 = vld [vmem:[%s4137_s5 + $0xd] ss:$0 sm:$0xff] }
 0x9bf   :  { %1327 = vadd.xlane.f32.xlu2 %v1325_v21  ;;  %v2926_v21 = vld [vmem:[#allocation4 + $0xd8] sm:$0xf] }
 0x9c0   :  { %v1320_v22 = vpop.xlane.xlu1 %1319 }
 0x9c1   :  { %v1322_v57 = vmul.f32 %v1320_v22, %v3798_v49  ;;  %v3278_v22 = vld [vmem:[#allocation4 + $0xe0] sm:$0xf0] }
 0x9c3   :  { %v3951_v16 = vsub.f32 %v1314_v15, %v1322_v57  ;;  %v3282_v15 = vld [vmem:[#allocation4 + $0x100] sm:$0xf0]  ;;  %v3277_v57 = vld [vmem:[#allocation4 + $0xdc] sm:$0xf] }
 0x9c4   :  { %v2947_v19 = vor.u32 %v3282_v15, %v2946_v13  ;;  %v2931_v26 = vor.u32 %v3277_v57, %v2928_v58 }
 0x9c5   :  { %v1326_v17 = vmul.f32 %v3951_v16, %v3951_v16 }
 0x9c6   :  { %1558 = vmatpush.bf16.msrb.mxu3 %v2947_v19  ;;  %1545 = vmatpush.bf16.msrb.mxu2 %v2931_v26 }
 0x9c7   :  { %1329 = vadd.xlane.f32.xlu1 %v1326_v17  ;;  %v2927_v17 = vor.u32 %v3278_v22, %v2926_v21 }
 0x9c9   :  { %1531 = vmatpush.bf16.msrb.mxu1 %v2927_v17 }
 0x9ca   :  { %1559 = vmatpush.bf16.msrb.mxu3 %v2935_v27  ;;  %1546 = vmatpush.bf16.msrb.mxu2 %v2919_v37 }
 0x9cd   :  { %1532 = vmatpush.bf16.msrb.mxu1 %v2915_v32 }
 0x9ce   :  { %1560 = vmatpush.bf16.msrb.mxu3 %v2923_v38 }
 0xa32   :  { %v1328_v25 = vpop.xlane.xlu2 %1327 }
 0xa33   :  { %v1331_v31 = vmul.f32 %v1328_v25, %v3798_v49 }
 0xa35   :  { %v1333_v39 = vadd.f32 1e-12, %v1331_v31 }
 0xa37   :  { %3474 = vrsqrt.f32 %v1333_v39  ;;  %vm1341_vm10 = vweird.f32 %v1333_v39 }
 0xa3a   :  { %v1330_v40 = vpop.xlane.xlu1 %1329 }
 0xa3b   :  { %v1332_v41 = vmul.f32 %v1330_v40, %v3798_v49 }
 0xa3d   :  { %v3475_v56 = vpop.eup %3474  ;;  %v1334_v4 = vadd.f32 1e-12, %v1332_v41 }
 0xa3e   :  { %v1336_v42 = vmul.f32 %v3475_v56, %v1333_v39  ;;  %vm1342_vm9 = vweird.f32 %v3475_v56 }
 0xa3f   :  { %3476 = vrsqrt.f32 %v1334_v4  ;;  %vm1343_vm11 = vmor %vm1341_vm10, %vm1342_vm9  ;;  %vm1351_vm13 = vweird.f32 %v1334_v4 }
 0xa40   :  { %v1337_v43 = vmul.f32 %v3475_v56, %v1336_v42 }
 0xa42   :  { %v1338_v44 = vmul.f32 0.5, %v1337_v43 }
 0xa44   :  { %v1339_v45 = vsub.f32 1.5, %v1338_v44 }
 0xa45   :  { %v3477_v46 = vpop.eup %3476 }
 0xa46   :  { %v1340_v47 = vmul.f32 %v3475_v56, %v1339_v45  ;;  %v1346_v48 = vmul.f32 %v3477_v46, %v1334_v4  ;;  %vm1352_vm12 = vweird.f32 %v3477_v46 }
 0xa47   :  { %vm1353_vm14 = vmor %vm1351_vm13, %vm1352_vm12  ;;  %vm2632_vm12 = vcmask 189440   ;;  %vm2567_vm13 = vcmask 123904  }
 0xa48   :  { %v1347_v50 = vmul.f32 %v3477_v46, %v1346_v48  ;;  %v1344_v51 = vsel %vm1343_vm11, %v3475_v56, %v1340_v47  ;;  %vm2478_vm11 = vcmask 1040384  }
 0xa49   :  { %v1355_v55 = vmul.f32 %v1344_v51, %v3946_v20 }
 0xa4a   :  { %v1348_v53 = vmul.f32 0.5, %v1347_v50 }
 0xa4b   :  { %v1358_v61 = vmul.f32 %v3412_v35, %v1355_v55 }
 0xa4c   :  { %v1349_v54 = vsub.f32 1.5, %v1348_v53 }
 0xa4d   :  { %v3965_v0 = vadd.f32 %v3413_v62, %v1358_v61 }
 0xa4e   :  { %v1350_v59 = vmul.f32 %v3477_v46, %v1349_v54 }
 0xa50   :  { %v1354_v60 = vsel %vm1353_vm14, %v3477_v46, %v1350_v59 }
 0xa51   :  { %v1356_v52 = vmul.f32 %v1354_v60, %v3951_v16  ;;  %v3414_v16 = vld [vmem:[%s4137_s5 + $0xb] ss:$0 sm:$0xff] }
 0xa53   :  { %v1359_v63 = vmul.f32 %v3412_v35, %v1356_v52 }
 0xa55   :  { %v3967_v1 = vadd.f32 %v3413_v62, %v1359_v63 }
 0xa57   :  { %v1396_v20 = vpack.c.bf16 %v3967_v1, %v3965_v0 }
 0xa59   :  { %1533 = vmatmul.bf16.vlgmr.msrb.gmra.mxu1 %v1396_v20  ;;  %1547 = vmatmul.bf16.vlgmr.msrb.gmra.mxu2 %v1396_v20 }
 0xa5a   :  { %1561 = vmatmul.bf16.vlgmr.msrb.gmra.mxu3 %v1396_v20 }
 0xad6   :  { %v1534_v2 = vpop.f32.mrf.mxu1 }
 0xad7   :  { %v1569_v6 = vadd.f32 %v3414_v16, %v1534_v2 }
 0xad9   :  { %v1579_v13 = vpack.c.bf16 %v1569_v6, %v1569_v6 }
 0xadb   :  { %v1633_v21 = vunpack.c.l.b16 %v1579_v13 }
 0xadc   :  { %v1548_v7 = vpop.f32.mrf.mxu2 }
 0xadd   :  { %v1573_v8 = vadd.f32 %v3415_v5, %v1548_v7  ;;  %v1562_v10 = vpop.f32.mrf.mxu3 }
 0xade   :  { %v1536_v12 = vpop.f32.mrf.mxu1  ;;  %v1577_v19 = vadd.f32 %v3416_v11, %v1562_v10 }
 0xadf   :  { %v1570_v15 = vadd.f32 %v3414_v16, %v1536_v12  ;;  %1581 = vxpose.xlu2.b32.start [1/2] (short) %v1573_v8, 128 }
 0xae0   :  { %v1629_v24 = vpack.c.bf16 %v1577_v19, %v1577_v19 }
 0xae1   :  { %v1580_v18 = vpack.c.bf16 %v1570_v15, %v1570_v15 }
 0xae2   :  { %v1690_v27 = vunpack.c.l.b16 %v1629_v24 }
 0xae3   :  { %v1634_v22 = vunpack.c.l.b16 %v1580_v18 }
 0xae4   :  { %v1550_v57 = vpop.f32.mrf.mxu2 }
 0xae5   :  { %v1635_v17 = vpack.c.b16 %v1634_v22, %v1633_v21  ;;  %v1574_v58 = vadd.f32 %v3415_v5, %v1550_v57  ;;  %v1564_v23 = vpop.f32.mrf.mxu3 }
 0xae6   :  { %v1578_v25 = vadd.f32 %v3416_v11, %v1564_v23 }
 0xae7   :  { %1582 = vxpose.xlu2.b32.end [2/2] (short) %v1574_v58, 128  ;;  %1859 = vrot.lane.b32.xlu0 %v1635_v17, %s3674_s9 }
 0xae8   :  { %v1630_v26 = vpack.c.bf16 %v1578_v25, %v1578_v25  ;;  %1711 = vrot.lane.b32.xlu1 %v1635_v17, %s3675_s24 }
 0xaea   :  { %v1691_v28 = vunpack.c.l.b16 %v1630_v26 }
 0xaec   :  { %v3982_v29 = vpack.c.b16 %v1691_v28, %v1690_v27 }
 0xaee   :  { %1704 = vmatpush.bf16.msra.mxu1 %v3982_v29 }
 0xaf0   :  { %1785 = vrot.lane.b32.xlu1 %v1635_v17, %s3668_s25 }
 0xb5a   :  { %v1712_v61 = vpop.permute.xlu1 %1711 }
 0xb62   :  { %v1786_v18 = vpop.permute.xlu1 %1785 }
 0xb78   :  { %v1597_v30 = vpop.trf.xlu2 }
 0xb79   :  { %v1613_v38 = vpack.c.bf16 %v1597_v30, %v1597_v30 }
 0xb7b   :  { %v1640_v4 = vunpack.c.l.b16 %v1613_v38 }
 0xb80   :  { %v1598_v31 = vpop.trf.xlu2 }
 0xb81   :  { %v1614_v36 = vpack.c.bf16 %v1598_v31, %v1598_v31  ;;  %v1860_v31 = vpop.permute.xlu0 %1859 }
 0xb83   :  { %v1641_v41 = vunpack.c.l.b16 %v1614_v36 }
 0xb85   :  { %v1644_v43 = vpack.c.b16 %v1641_v41, %v1640_v4 }
 0xb88   :  { %v1599_v32 = vpop.trf.xlu2 }
 0xb89   :  { %v1615_v33 = vpack.c.bf16 %v1599_v32, %v1599_v32 }
 0xb8b   :  { %v1642_v39 = vunpack.c.l.b16 %v1615_v33 }
 0xb90   :  { %v1600_v34 = vpop.trf.xlu2 }
 0xb91   :  { %v1616_v37 = vpack.c.bf16 %v1600_v34, %v1600_v34 }
 0xb93   :  { %v1643_v40 = vunpack.c.l.b16 %v1616_v37 }
 0xb95   :  { %v1645_v56 = vpack.c.b16 %v1643_v40, %v1642_v39 }
 0xb97   :  { %1657 = vmatpush.bf16.msra.mxu0 %v1645_v56 }
 0xb98   :  { %v1601_v42 = vpop.trf.xlu2 }
 0xb99   :  { %v1617_v51 = vpack.c.bf16 %v1601_v42, %v1601_v42 }
 0xb9b   :  { %1658 = vmatpush.bf16.msra.mxu0 %v1644_v43  ;;  %v1717_v59 = vunpack.c.l.b16 %v1617_v51 }
 0xb9e   :  { %3008 = vmatmul.msk.bf16.vlgmr.msra.gmra.mxu0 %vm536_vm15, %v1635_v17 }
 0xba0   :  { %v1602_v44 = vpop.trf.xlu2 }
 0xba1   :  { %v1618_v48 = vpack.c.bf16 %v1602_v44, %v1602_v44 }
 0xba3   :  { %v1718_v55 = vunpack.c.l.b16 %v1618_v48 }
 0xba5   :  { %v1721_v52 = vpack.c.b16 %v1718_v55, %v1717_v59 }
 0xba8   :  { %v1603_v45 = vpop.trf.xlu2 }
 0xba9   :  { %v1619_v46 = vpack.c.bf16 %v1603_v45, %v1603_v45 }
 0xbab   :  { %v1719_v53 = vunpack.c.l.b16 %v1619_v46 }
 0xbb0   :  { %v1604_v47 = vpop.trf.xlu2 }
 0xbb1   :  { %v1620_v50 = vpack.c.bf16 %v1604_v47, %v1604_v47 }
 0xbb3   :  { %v1720_v54 = vunpack.c.l.b16 %v1620_v50 }
 0xbb5   :  { %v1722_v35 = vpack.c.b16 %v1720_v54, %v1719_v53 }
 0xbb7   :  { %1734 = vmatpush.bf16.msra.mxu2 %v1722_v35 }
 0xbb8   :  { %v1605_v60 = vpop.trf.xlu2 }
 0xbb9   :  { %v1621_v6 = vpack.c.bf16 %v1605_v60, %v1605_v60 }
 0xbbb   :  { %1735 = vmatpush.bf16.msra.mxu2 %v1721_v52  ;;  %v1791_v12 = vunpack.c.l.b16 %v1621_v6 }
 0xbbe   :  { %3010 = vmatmul.msk.bf16.vlgmr.msra.gmra.mxu2 %vm536_vm15, %v1712_v61 }
 0xbc0   :  { %v1606_v62 = vpop.trf.xlu2 }
 0xbc1   :  { %v1622_v16 = vpack.c.bf16 %v1606_v62, %v1606_v62 }
 0xbc3   :  { %v1792_v10 = vunpack.c.l.b16 %v1622_v16 }
 0xbc5   :  { %v1795_v15 = vpack.c.b16 %v1792_v10, %v1791_v12 }
 0xbc8   :  { %v1607_v63 = vpop.trf.xlu2 }
 0xbc9   :  { %v1623_v20 = vpack.c.bf16 %v1607_v63, %v1607_v63 }
 0xbcb   :  { %v1793_v7 = vunpack.c.l.b16 %v1623_v20 }
 0xbd0   :  { %v1608_v2 = vpop.trf.xlu2 }
 0xbd1   :  { %v1624_v5 = vpack.c.bf16 %v1608_v2, %v1608_v2 }
 0xbd3   :  { %v1794_v8 = vunpack.c.l.b16 %v1624_v5 }
 0xbd5   :  { %v1796_v11 = vpack.c.b16 %v1794_v8, %v1793_v7 }
 0xbd7   :  { %1808 = vmatpush.bf16.msrb.mxu0 %v1796_v11 }
 0xbd8   :  { %v1609_v13 = vpop.trf.xlu2 }
 0xbd9   :  { %v1625_v17 = vpack.c.bf16 %v1609_v13, %v1609_v13 }
 0xbdb   :  { %1809 = vmatpush.bf16.msrb.mxu0 %v1795_v15  ;;  %v1865_v26 = vunpack.c.l.b16 %v1625_v17 }
 0xbde   :  { %3012 = vmatmul.msk.bf16.vlgmr.msrb.gmra.mxu0 %vm536_vm15, %v1786_v18 }
 0xbe0   :  { %v1610_v19 = vpop.trf.xlu2 }
 0xbe1   :  { %v1626_v58 = vpack.c.bf16 %v1610_v19, %v1610_v19 }
 0xbe3   :  { %v1866_v27 = vunpack.c.l.b16 %v1626_v58 }
 0xbe5   :  { %v1869_v30 = vpack.c.b16 %v1866_v27, %v1865_v26 }
 0xbe8   :  { %v1611_v21 = vpop.trf.xlu2 }
 0xbe9   :  { %v1627_v22 = vpack.c.bf16 %v1611_v21, %v1611_v21 }
 0xbeb   :  { %v1867_v23 = vunpack.c.l.b16 %v1627_v22 }
 0xbf0   :  { %v1612_v57 = vpop.trf.xlu2 }
 0xbf1   :  { %v1628_v24 = vpack.c.bf16 %v1612_v57, %v1612_v57 }
 0xbf3   :  { %v1868_v25 = vunpack.c.l.b16 %v1628_v24 }
 0xbf5   :  { %v1870_v28 = vpack.c.b16 %v1868_v25, %v1867_v23 }
 0xbf7   :  { %1882 = vmatpush.bf16.msrb.mxu2 %v1870_v28 }
 0xbfb   :  { %1883 = vmatpush.bf16.msrb.mxu2 %v1869_v30 }
 0xbfe   :  { %3014 = vmatmul.msk.bf16.vlgmr.msrb.gmra.mxu2 %vm536_vm15, %v1860_v31 }
 0xc1b   :  { %v1660_v32 = vpop.f32.mrf.mxu0 }
 0xc1c   :  { %v1661_v33 = vadd.f32 %v1660_v32, %v3850_v9 }
 0xc1e   :  { %v1665_v34 = vsel %vm554_vm0, %v1661_v33, -inf }
 0xc1f   :  { %1666 = vmax.xlane.f32.xlu2 %v1665_v34 }
 0xc23   :  { %v1662_v36 = vpop.f32.mrf.mxu0 }
 0xc24   :  { %v1663_v37 = vadd.f32 %v1662_v36, %v3859_v14 }
 0xc26   :  { %v1668_v38 = vsel %vm554_vm0, %v1663_v37, -inf }
 0xc27   :  { %1669 = vmax.xlane.f32.xlu0 %v1668_v38 }
 0xc41   :  { %v1737_v39 = vpop.f32.mrf.mxu2 }
 0xc42   :  { %v1738_v40 = vadd.f32 %v1737_v39, %v3850_v9 }
 0xc44   :  { %v1742_v41 = vsel %vm554_vm0, %v1738_v40, -inf }
 0xc45   :  { %1743 = vmax.xlane.f32.xlu0 %v1742_v41 }
 0xc49   :  { %v1739_v56 = vpop.f32.mrf.mxu2 }
 0xc4a   :  { %v1740_v4 = vadd.f32 %v1739_v56, %v3859_v14 }
 0xc4c   :  { %v1745_v42 = vsel %vm554_vm0, %v1740_v4, -inf }
 0xc4d   :  { %1746 = vmax.xlane.f32.xlu1 %v1745_v42 }
 0xc5b   :  { %v1811_v43 = vpop.f32.mrf.mxu0 }
 0xc5c   :  { %v1812_v44 = vadd.f32 %v1811_v43, %v3850_v9 }
 0xc5e   :  { %v1816_v45 = vsel %vm554_vm0, %v1812_v44, -inf }
 0xc5f   :  { %1817 = vmax.xlane.f32.xlu1 %v1816_v45 }
 0xc63   :  { %v1813_v46 = vpop.f32.mrf.mxu0 }
 0xc64   :  { %v1814_v47 = vadd.f32 %v1813_v46, %v3859_v14 }
 0xc66   :  { %v1819_v48 = vsel %vm554_vm0, %v1814_v47, -inf }
 0xc67   :  { %1820 = vmax.xlane.f32.xlu0 %v1819_v48 }
 0xc81   :  { %v1885_v50 = vpop.f32.mrf.mxu2 }
 0xc82   :  { %v1886_v51 = vadd.f32 %v1885_v50, %v3850_v9 }
 0xc84   :  { %v1890_v53 = vsel %vm554_vm0, %v1886_v51, -inf }
 0xc85   :  { %1891 = vmax.xlane.f32.xlu1 %v1890_v53 }
 0xc89   :  { %v1887_v54 = vpop.f32.mrf.mxu2 }
 0xc8a   :  { %v1888_v55 = vadd.f32 %v1887_v54, %v3859_v14 }
 0xc8c   :  { %v1893_v35 = vsel %vm554_vm0, %v1888_v55, -inf }
 0xc8d   :  { %1894 = vmax.xlane.f32.xlu0 %v1893_v35 }
 0xc92   :  { %v1667_v59 = vpop.xlane.xlu2 %1666 }
 0xc93   :  { %v1671_v60 = vsub.f32 %v1661_v33, %v1667_v59 }
 0xc95   :  { %v1673_v52 = vmul.f32 1.442695, %v1671_v60 }
 0xc97   :  { %3478 = vpow2.f32 %v1673_v52 }
 0xc9a   :  { %v1670_v61 = vpop.xlane.xlu0 %1669 }
 0xc9b   :  { %v1672_v62 = vsub.f32 %v1663_v37, %v1670_v61 }
 0xc9d   :  { %v3479_v63 = vpop.eup %3478  ;;  %v1675_v20 = vmul.f32 1.442695, %v1672_v62 }
 0xc9e   :  { %v1677_v2 = vsel %vm554_vm0, %v3479_v63, 0.0 }
 0xc9f   :  { %3480 = vpow2.f32 %v1675_v20  ;;  %1678 = vadd.xlane.f32.xlu1 %v1677_v2 }
 0xca5   :  { %v3481_v9 = vpop.eup %3480 }
 0xca6   :  { %v1680_v16 = vsel %vm554_vm0, %v3481_v9, 0.0 }
 0xca7   :  { %1681 = vadd.xlane.f32.xlu0 %v1680_v16 }
 0xcb8   :  { %v1744_v14 = vpop.xlane.xlu0 %1743 }
 0xcb9   :  { %v1748_v5 = vsub.f32 %v1738_v40, %v1744_v14 }
 0xcbb   :  { %v1750_v6 = vmul.f32 1.442695, %v1748_v5 }
 0xcbd   :  { %3482 = vpow2.f32 %v1750_v6 }
 0xcc0   :  { %v1747_v7 = vpop.xlane.xlu1 %1746 }
 0xcc1   :  { %v1749_v8 = vsub.f32 %v1740_v4, %v1747_v7 }
 0xcc3   :  { %v3483_v10 = vpop.eup %3482  ;;  %v1752_v11 = vmul.f32 1.442695, %v1749_v8 }
 0xcc4   :  { %v1754_v12 = vsel %vm554_vm0, %v3483_v10, 0.0 }
 0xcc5   :  { %3484 = vpow2.f32 %v1752_v11  ;;  %1755 = vadd.xlane.f32.xlu1 %v1754_v12 }
 0xccb   :  { %v3485_v13 = vpop.eup %3484 }
 0xccc   :  { %v1757_v15 = vsel %vm554_vm0, %v3485_v13, 0.0 }
 0xccd   :  { %1758 = vadd.xlane.f32.xlu0 %v1757_v15 }
 0xcd2   :  { %v1818_v18 = vpop.xlane.xlu1 %1817 }
 0xcd3   :  { %v1822_v19 = vsub.f32 %v1812_v44, %v1818_v18 }
 0xcd5   :  { %v1824_v21 = vmul.f32 1.442695, %v1822_v19 }
 0xcd7   :  { %3486 = vpow2.f32 %v1824_v21  ;;  %v3305_v21 = vld [vmem:[#allocation6 + $0x78] sm:$0xff] }
 0xcd8   :  { %2031 = vmatpush.bf16.msra.mxu0 %v3305_v21 }
 0xcda   :  { %v1821_v17 = vpop.xlane.xlu0 %1820 }
 0xcdb   :  { %v1823_v58 = vsub.f32 %v1814_v47, %v1821_v17  ;;  %v3302_v17 = vld [vmem:[#allocation6 + $0x60] sm:$0xff] }
 0xcdd   :  { %v4010_v22 = vpop.eup %3486  ;;  %v1826_v23 = vmul.f32 1.442695, %v1823_v58  ;;  %v3301_v58 = vld [vmem:[#allocation6 + $0x58] sm:$0xff] }
 0xcde   :  { %1765 = vrot.lane.b32.xlu1 %v3982_v29, %s3675_s24  ;;  %v1828_v57 = vsel %vm554_vm0, %v4010_v22, 0.0 }
 0xcdf   :  { %1829 = vadd.xlane.f32.xlu0 %v1828_v57  ;;  %3488 = vpow2.f32 %v1826_v23  ;;  %v3303_v57 = vld [vmem:[#allocation6 + $0x68] sm:$0xff]  ;;  %v3300_v23 = vld [vmem:[#allocation6 + $0x50] sm:$0xff] }
 0xce5   :  { %v3489_v24 = vpop.eup %3488 }
 0xce6   :  { %v1831_v25 = vsel %vm554_vm0, %v3489_v24, 0.0 }
 0xcf3   :  { %1913 = vrot.lane.b32.xlu0 %v3982_v29, %s3674_s9 }
 0xcf8   :  { %v1892_v26 = vpop.xlane.xlu1 %1891 }
 0xcf9   :  { %v1896_v27 = vsub.f32 %v1886_v51, %v1892_v26 }
 0xcfb   :  { %v1898_v28 = vmul.f32 1.442695, %v1896_v27 }
 0xcfd   :  { %3490 = vpow2.f32 %v1898_v28 }
 0xd00   :  { %v1895_v30 = vpop.xlane.xlu0 %1894 }
 0xd01   :  { %v1897_v31 = vsub.f32 %v1888_v55, %v1895_v30 }
 0xd03   :  { %v1900_v32 = vmul.f32 1.442695, %v1897_v31  ;;  %v3491_v34 = vpop.eup %3490 }
 0xd04   :  { %v1902_v37 = vsel %vm554_vm0, %v3491_v34, 0.0 }
 0xd08   :  { %1832 = vadd.xlane.f32.xlu1 %v1831_v25  ;;  %v3298_v25 = vld [vmem:[#allocation6 + $0x40] sm:$0xff] }
 0xd12   :  { %v1679_v33 = vpop.xlane.xlu1 %1678 }
 0xd13   :  { %3492 = vrcp.f32 %v1679_v33 }
 0xd14   :  { %3494 = vpow2.f32 %v1900_v32 }
 0xd19   :  { %v3493_v38 = vpop.eup %3492 }
 0xd1a   :  { %v1682_v36 = vpop.xlane.xlu0 %1681  ;;  %v3495_v39 = vpop.eup %3494  ;;  %v1685_v41 = vmul.f32 %v3493_v38, %v3479_v63 }
 0xd1b   :  { %3496 = vrcp.f32 %v1682_v36  ;;  %v1905_v42 = vsel %vm554_vm0, %v3495_v39, 0.0 }
 0xd1d   :  { %1903 = vadd.xlane.f32.xlu0 %v1902_v37 }
 0xd21   :  { %v3497_v40 = vpop.eup %3496 }
 0xd22   :  { %v1686_v56 = vmul.f32 %v3497_v40, %v3481_v9 }
 0xd24   :  { %v1687_v4 = vpack.c.bf16 %v1686_v56, %v1685_v41 }
 0xd25   :  { %1906 = vadd.xlane.f32.xlu0 %v1905_v42  ;;  %v3417_v42 = vld [vmem:[%s4137_s5 + $0xe] ss:$0 sm:$0xff] }
 0xd26   :  { %3009 = vmatmul.msk.bf16.vlgmr.msra.gmra.mxu1 %vm554_vm0, %v1687_v4 }
 0xd38   :  { %v1756_v44 = vpop.xlane.xlu1 %1755 }
 0xd39   :  { %1839 = vrot.lane.b32.xlu0 %v3982_v29, %s3668_s25 }
 0xd40   :  { %v1759_v43 = vpop.xlane.xlu0 %1758 }
 0xd41   :  { %3498 = vrcp.f32 %v1759_v43 }
 0xd42   :  { %3500 = vrcp.f32 %v1756_v44 }
 0xd47   :  { %v3499_v45 = vpop.eup %3498 }
 0xd48   :  { %v3501_v46 = vpop.eup %3500  ;;  %v1763_v47 = vmul.f32 %v3499_v45, %v3485_v13 }
 0xd49   :  { %v1762_v48 = vmul.f32 %v3501_v46, %v3483_v10 }
 0xd4b   :  { %v1764_v51 = vpack.c.bf16 %v1763_v47, %v1762_v48 }
 0xd50   :  { %v1766_v50 = vpop.permute.xlu1 %1765 }
 0xd51   :  { %1778 = vmatpush.bf16.msra.mxu3 %v1766_v50 }
 0xd52   :  { %v1830_v53 = vpop.xlane.xlu0 %1829 }
 0xd54   :  { %3011 = vmatmul.msk.bf16.vlgmr.msra.gmra.mxu3 %vm554_vm0, %v1764_v51 }
 0xd65   :  { %v1914_v54 = vpop.permute.xlu0 %1913 }
 0xd66   :  { %1926 = vmatpush.bf16.msrb.mxu3 %v1914_v54 }
 0xd7b   :  { %v1833_v59 = vpop.xlane.xlu1 %1832 }
 0xd90   :  { %v1904_v55 = vpop.xlane.xlu0 %1903 }
 0xd91   :  { %3502 = vrcp.f32 %v1904_v55 }
 0xd97   :  { %v3503_v29 = vpop.eup %3502 }
 0xd98   :  { %v1907_v35 = vpop.xlane.xlu0 %1906  ;;  %v1910_v52 = vmul.f32 %v3503_v29, %v3491_v34 }
 0xd99   :  { %3504 = vrcp.f32 %v1907_v35 }
 0xd9a   :  { %3506 = vrcp.f32 %v1833_v59  ;;  %v3321_v59 = vld [vmem:[#allocation7 + $0xf4] sm:$0xf0] }
 0xd9b   :  { %3508 = vrcp.f32 %v1830_v53 }
 0xd9f   :  { %v3505_v60 = vpop.eup %3504 }
 0xda0   :  { %v1911_v61 = vmul.f32 %v3505_v60, %v3495_v39  ;;  %v3507_v63 = vpop.eup %3506  ;;  %v3320_v60 = vld [vmem:[#allocation7 + $0xf4] sm:$0xf] }
 0xda1   :  { %v3509_v20 = vpop.eup %3508  ;;  %v1837_v2 = vmul.f32 %v3507_v63, %v3489_v24  ;;  %v3299_v24 = vld [vmem:[#allocation6 + $0x48] sm:$0xff]  ;;  %v3099_v63 = vld [vmem:[#allocation7 + $0xe0] sm:$0xf] }
 0xda2   :  { %v1912_v62 = vpack.c.bf16 %v1911_v61, %v1910_v52  ;;  %v1836_v9 = vmul.f32 %v3509_v20, %v4010_v22  ;;  %v3304_v22 = vld [vmem:[#allocation6 + $0x70] sm:$0xff]  ;;  %v3109_v61 = vld [vmem:[#allocation7 + $0xf8] sm:$0xf0]  ;;  %v3319_v20 = vld [vmem:[#allocation7 + $0xe4] sm:$0xf0] }
 0xda3   :  { %v1706_v8 = vpop.f32.mrf.mxu1  ;;  %2032 = vmatpush.bf16.msra.mxu0 %v3304_v22  ;;  %v3075_v22 = vld [vmem:[#allocation7 + $0xb0] sm:$0xf] }
 0xda4   :  { %3015 = vmatmul.msk.bf16.vlgmr.msrb.gmra.mxu3 %vm554_vm0, %v1912_v62  ;;  %v1838_v14 = vpack.c.bf16 %v1837_v2, %v1836_v9  ;;  %v3112_v62 = vor.u32 %v3320_v60, %v3109_v61  ;;  %v3318_v2 = vld [vmem:[#allocation7 + $0xe4] sm:$0xf]  ;;  %v3100_v9 = vor.u32 %v3319_v20, %v3099_v63  ;;  %v3418_v20 = vld [vmem:[%s4137_s5 + $0xf] ss:$0 sm:$0xff] }
 0xda6   :  { %2214 = vmatpush.bf16.msra.mxu2 %v3112_v62 }
 0xda7   :  { %2033 = vmatpush.bf16.msra.mxu0 %v3303_v57  ;;  %v3313_v57 = vld [vmem:[#allocation7 + $0xb4] sm:$0xf0] }
 0xdab   :  { %v1840_v16 = vpop.permute.xlu0 %1839  ;;  %v1708_v10 = vpop.f32.mrf.mxu1  ;;  %2034 = vmatpush.bf16.msra.mxu0 %v3302_v17  ;;  %v3312_v17 = vld [vmem:[#allocation7 + $0xb4] sm:$0xf] }
 0xdac   :  { %1852 = vmatpush.bf16.msrb.mxu1 %v1840_v16  ;;  %v3101_v16 = vld [vmem:[#allocation7 + $0xe8] sm:$0xf0] }
 0xdaf   :  { %3013 = vmatmul.msk.bf16.vlgmr.msrb.gmra.mxu1 %vm554_vm0, %v1838_v14  ;;  %2035 = vmatpush.bf16.msra.mxu0 %v3301_v58  ;;  %v3104_v14 = vor.u32 %v3318_v2, %v3101_v16  ;;  %v3076_v58 = vor.u32 %v3313_v57, %v3075_v22  ;;  %v3324_v22 = vld [vmem:[#allocation9 + $0x90] sm:$0xff] }
 0xdb0   :  { %v3048_v57 = vld [vmem:[%s4138_s6 + $0x1] ss:$2 sm:$0x3] }
 0xdb1   :  { %2215 = vmatpush.bf16.msra.mxu2 %v3104_v14 }
 0xdb3   :  { %2036 = vmatpush.bf16.msra.mxu0 %v3300_v23  ;;  %v3077_v23 = vld [vmem:[#allocation7 + $0xb8] sm:$0xf0] }
 0xdb7   :  { %2037 = vmatpush.bf16.msra.mxu0 %v3299_v24  ;;  %v3080_v24 = vor.u32 %v3312_v17, %v3077_v23  ;;  %v3333_v17 = vld [vmem:[#allocation9 + $0xd8] sm:$0xff]  ;;  %v2116_v23 = vperm.slane %v3048_v57, 0 }
 0xdbb   :  { %2038 = vmatpush.bf16.msra.mxu0 %v3298_v25  ;;  %v3067_v25 = vld [vmem:[#allocation7 + $0xa0] sm:$0xf] }
 0xdd7   :  { %v1780_v5 = vpop.f32.mrf.mxu3 }
 0xddf   :  { %v1782_v6 = vpop.f32.mrf.mxu3 }
 0xde0   :  { %v3386_v7 = vpack.i.bf16 %v1782_v6, %v1780_v5  ;;  %v3091_v5 = vld [vmem:[#allocation7 + $0xd0] sm:$0xf]  ;;  %v3317_v6 = vld [vmem:[#allocation7 + $0xd4] sm:$0xf0] }
 0xde2   :  { %3387 = vrot.lane.b32.xlu0 %v3386_v7, %s3674_s9  ;;  %v3316_v7 = vld [vmem:[#allocation7 + $0xd4] sm:$0xf] }
 0xe27   :  { %v1928_v11 = vpop.f32.mrf.mxu3 }
 0xe2c   :  { %v1854_v12 = vpop.f32.mrf.mxu1 }
 0xe2f   :  { %v1930_v13 = vpop.f32.mrf.mxu3 }
 0xe30   :  { %v3396_v15 = vpack.i.bf16 %v1930_v13, %v1928_v11  ;;  %v3315_v13 = vld [vmem:[#allocation7 + $0xc4] sm:$0xf0] }
 0xe32   :  { %3397 = vrot.lane.b32.xlu0 %v3396_v15, %s3675_s24  ;;  %v3314_v15 = vld [vmem:[#allocation7 + $0xc4] sm:$0xf] }
 0xe34   :  { %v1856_v18 = vpop.f32.mrf.mxu1 }
 0xe35   :  { %v3391_v19 = vpack.i.bf16 %v1856_v18, %v1854_v12  ;;  %v3083_v12 = vld [vmem:[#allocation7 + $0xc0] sm:$0xf] }
 0xe36   :  { %v3084_v18 = vor.u32 %v3315_v13, %v3083_v12  ;;  %v3327_v12 = vld [vmem:[#allocation9 + $0xa8] sm:$0xff]  ;;  %v3336_v13 = vld [vmem:[#allocation9 + $0xf0] sm:$0xff] }
 0xe37   :  { %3392 = vrot.lane.b32.xlu1 %v3391_v19, %s3668_s25  ;;  %v3085_v19 = vld [vmem:[#allocation7 + $0xc8] sm:$0xf0] }
 0xe38   :  { %v3088_v21 = vor.u32 %v3314_v15, %v3085_v19  ;;  %v3326_v15 = vld [vmem:[#allocation9 + $0xa0] sm:$0xff]  ;;  %v3325_v19 = vld [vmem:[#allocation9 + $0x98] sm:$0xff] }
 0xe54   :  { %v3388_v26 = vpop.permute.xlu0 %3387 }
 0xe55   :  { %v3390_v27 = vunpack.i.h.bf16 %v3388_v26  ;;  %v3389_v28 = vunpack.i.l.bf16 %v3388_v26  ;;  %v3311_v26 = vld [vmem:[#allocation7 + $0xa4] sm:$0xf0] }
 0xe57   :  { %v1958_v34 = vsel %vm536_vm15, %v1708_v10, %v3390_v27  ;;  %v1957_v36 = vsel %vm536_vm15, %v1706_v8, %v3389_v28  ;;  %v3092_v8 = vor.u32 %v3317_v6, %v3091_v5  ;;  %v3093_v10 = vld [vmem:[#allocation7 + $0xd8] sm:$0xf0]  ;;  %v3310_v27 = vld [vmem:[#allocation7 + $0xa4] sm:$0xf]  ;;  %v3068_v28 = vor.u32 %v3311_v26, %v3067_v25  ;;  %v3419_v5 = vld [vmem:[%s4137_s5 + $0x10] ss:$0 sm:$0xff] }
 0xe58   :  { %v3096_v11 = vor.u32 %v3316_v7, %v3093_v10  ;;  %v3329_v10 = vld [vmem:[#allocation9 + $0xb8] sm:$0xff]  ;;  %v3322_v26 = vld [vmem:[#allocation9 + $0x80] sm:$0xff] }
 0xe59   :  { %2397 = vmatpush.bf16.msra.mxu3 %v3329_v10 }
 0xe5a   :  { %2216 = vmatpush.bf16.msra.mxu2 %v3096_v11  ;;  %v3328_v11 = vld [vmem:[#allocation9 + $0xb0] sm:$0xff] }
 0xe5d   :  { %2398 = vmatpush.bf16.msra.mxu3 %v3328_v11 }
 0xe5e   :  { %2217 = vmatpush.bf16.msra.mxu2 %v3088_v21  ;;  %v3334_v21 = vld [vmem:[#allocation9 + $0xe0] sm:$0xff] }
 0xe61   :  { %2399 = vmatpush.bf16.msra.mxu3 %v3327_v12 }
 0xe62   :  { %2218 = vmatpush.bf16.msra.mxu2 %v3080_v24  ;;  %v3332_v24 = vld [vmem:[#allocation9 + $0xd0] sm:$0xff] }
 0xe65   :  { %2400 = vmatpush.bf16.msra.mxu3 %v3326_v15  ;;  %v3420_v15 = vld [vmem:[%s4137_s5 + $0x11] ss:$0 sm:$0xff] }
 0xe69   :  { %2401 = vmatpush.bf16.msra.mxu3 %v3325_v19 }
 0xe6d   :  { %2402 = vmatpush.bf16.msra.mxu3 %v3324_v22 }
 0xea4   :  { %v3398_v30 = vpop.permute.xlu0 %3397 }
 0xea5   :  { %v3400_v37 = vunpack.i.h.bf16 %v3398_v30  ;;  %v3399_v38 = vunpack.i.l.bf16 %v3398_v30  ;;  %v3069_v30 = vld [vmem:[#allocation7 + $0xa8] sm:$0xf0] }
 0xea9   :  { %v3393_v31 = vpop.permute.xlu1 %3392 }
 0xeaa   :  { %v3395_v32 = vunpack.i.h.bf16 %v3393_v31  ;;  %v3394_v33 = vunpack.i.l.bf16 %v3393_v31  ;;  %v3072_v31 = vor.u32 %v3310_v27, %v3069_v30 }
 0xeac   :  { %v1960_v39 = vsel %vm849_vm1, %v1958_v34, %v3395_v32  ;;  %v1959_v40 = vsel %vm849_vm1, %v1957_v36, %v3394_v33  ;;  %2219 = vmatpush.bf16.msra.mxu2 %v3072_v31  ;;  %v3059_v32 = vld [vmem:[#allocation7 + $0x90] sm:$0xf]  ;;  %v3309_v33 = vld [vmem:[#allocation7 + $0x94] sm:$0xf0]  ;;  %v3308_v34 = vld [vmem:[#allocation7 + $0x94] sm:$0xf] }
 0xead   :  { %v1961_v41 = vsel %vm852_vm2, %v1959_v40, %v3399_v38  ;;  %v1962_v56 = vsel %vm852_vm2, %v1960_v39, %v3400_v37  ;;  %v3060_v36 = vor.u32 %v3309_v33, %v3059_v32  ;;  %v3061_v37 = vld [vmem:[#allocation7 + $0x98] sm:$0xf0]  ;;  %v3051_v38 = vld [vmem:[#allocation7 + $0x80] sm:$0xf]  ;;  %v3307_v39 = vld [vmem:[#allocation7 + $0x84] sm:$0xf0] }
 0xeae   :  { %v1980_v4 = vpack.c.bf16 %v1962_v56, %v1961_v41  ;;  %v3064_v41 = vor.u32 %v3308_v34, %v3061_v37  ;;  %v3306_v56 = vld [vmem:[#allocation7 + $0x84] sm:$0xf]  ;;  %v2117_v31 = vperm.slane %v3048_v57, 1 }
 0xeaf   :  { %v3330_v34 = vld [vmem:[#allocation9 + $0xc0] sm:$0xff] }
 0xeb0   :  { %2039 = vmatmul.bf16.vlgmr.msra.gmra.mxu0 %v1980_v4  ;;  %v3053_v4 = vld [vmem:[#allocation7 + $0x88] sm:$0xf0]  ;;  %2220 = vmatpush.bf16.msra.mxu2 %v3064_v41 }
 0xf2d   :  { %v2040_v43 = vpop.f32.mrf.mxu0 }
 0xf2e   :  { %v2041_v44 = vadd.f32 %v3417_v42, %v2040_v43  ;;  %v3052_v43 = vor.u32 %v3307_v39, %v3051_v38 }
 0xf30   :  { %v2045_v45 = vadd.f32 %v2041_v44, %v3965_v0  ;;  %v3056_v44 = vor.u32 %v3306_v56, %v3053_v4 }
 0xf32   :  { %2049 = vadd.xlane.f32.xlu0 %v2045_v45  ;;  %2221 = vmatpush.bf16.msra.mxu2 %v3056_v44 }
 0xf35   :  { %v2042_v46 = vpop.f32.mrf.mxu0 }
 0xf36   :  { %v2043_v47 = vadd.f32 %v3417_v42, %v2042_v46 }
 0xf38   :  { %v2046_v48 = vadd.f32 %v2043_v47, %v3967_v1  ;;  %v3107_v1 = vld [vmem:[#allocation7 + $0xf0] sm:$0xf] }
 0xf39   :  { %v3108_v52 = vor.u32 %v3321_v59, %v3107_v1 }
 0xf3a   :  { %2051 = vadd.xlane.f32.xlu1 %v2046_v48 }
 0xf3b   :  { %2200 = vmatpush.bf16.msra.mxu1 %v3108_v52 }
 0xf3f   :  { %2201 = vmatpush.bf16.msra.mxu1 %v3100_v9 }
 0xf43   :  { %2202 = vmatpush.bf16.msra.mxu1 %v3092_v8 }
 0xf47   :  { %2203 = vmatpush.bf16.msra.mxu1 %v3084_v18  ;;  %v3335_v18 = vld [vmem:[#allocation9 + $0xe8] sm:$0xff] }
 0xf4b   :  { %2204 = vmatpush.bf16.msra.mxu1 %v3076_v58  ;;  %v3323_v58 = vld [vmem:[#allocation9 + $0x88] sm:$0xff] }
 0xf4c   :  { %2403 = vmatpush.bf16.msra.mxu3 %v3323_v58 }
 0xf4f   :  { %2205 = vmatpush.bf16.msra.mxu1 %v3068_v28  ;;  %v3331_v28 = vld [vmem:[#allocation9 + $0xc8] sm:$0xff] }
 0xf50   :  { %2404 = vmatpush.bf16.msra.mxu3 %v3322_v26 }
 0xf53   :  { %2206 = vmatpush.bf16.msra.mxu1 %v3060_v36 }
 0xf57   :  { %2207 = vmatpush.bf16.msra.mxu1 %v3052_v43 }
 0xfa5   :  { %v2050_v50 = vpop.xlane.xlu0 %2049 }
 0xfa6   :  { %v2053_v51 = vmul.f32 %v2050_v50, %v3798_v49 }
 0xfa8   :  { %v4043_v53 = vsub.f32 %v2045_v45, %v2053_v51 }
 0xfaa   :  { %v2057_v54 = vmul.f32 %v4043_v53, %v4043_v53 }
 0xfac   :  { %2059 = vadd.xlane.f32.xlu0 %v2057_v54 }
 0xfad   :  { %v2052_v55 = vpop.xlane.xlu1 %2051 }
 0xfae   :  { %v2054_v35 = vmul.f32 %v2052_v55, %v3798_v49 }
 0xfb0   :  { %v4048_v29 = vsub.f32 %v2046_v48, %v2054_v35 }
 0xfb2   :  { %v2058_v0 = vmul.f32 %v4048_v29, %v4048_v29 }
 0xfb4   :  { %2061 = vadd.xlane.f32.xlu0 %v2058_v0 }
0x101f   :  { %v2060_v40 = vpop.xlane.xlu0 %2059 }
0x1020   :  { %v2063_v42 = vmul.f32 %v2060_v40, %v3798_v49 }
0x1022   :  { %v2065_v45 = vadd.f32 1e-12, %v2063_v42 }
0x1024   :  { %3510 = vrsqrt.f32 %v2065_v45  ;;  %vm2073_vm0 = vweird.f32 %v2065_v45 }
0x1027   :  { %v2062_v46 = vpop.xlane.xlu0 %2061 }
0x1028   :  { %v2064_v47 = vmul.f32 %v2062_v46, %v3798_v49 }
0x102a   :  { %v3511_v48 = vpop.eup %3510  ;;  %v2066_v50 = vadd.f32 1e-12, %v2064_v47 }
0x102b   :  { %v2068_v51 = vmul.f32 %v3511_v48, %v2065_v45  ;;  %vm2074_vm15 = vweird.f32 %v3511_v48 }
0x102c   :  { %3512 = vrsqrt.f32 %v2066_v50  ;;  %vm2075_vm1 = vmor %vm2073_vm0, %vm2074_vm15  ;;  %vm2083_vm3 = vweird.f32 %v2066_v50  ;;  %vm2618_vm15 = vcmask 58368   ;;  %vm2585_vm0 = vcmask 1024  }
0x102d   :  { %v2069_v54 = vmul.f32 %v3511_v48, %v2068_v51 }
0x102f   :  { %v2070_v55 = vmul.f32 0.5, %v2069_v54 }
0x1031   :  { %v2071_v35 = vsub.f32 1.5, %v2070_v55 }
0x1032   :  { %v3513_v0 = vpop.eup %3512 }
0x1033   :  { %v2072_v1 = vmul.f32 %v3511_v48, %v2071_v35  ;;  %v2078_v59 = vmul.f32 %v3513_v0, %v2066_v50  ;;  %vm2084_vm2 = vweird.f32 %v3513_v0 }
0x1034   :  { %vm2085_vm4 = vmor %vm2083_vm3, %vm2084_vm2 }
0x1035   :  { %v2079_v60 = vmul.f32 %v3513_v0, %v2078_v59  ;;  %v2076_v52 = vsel %vm2075_vm1, %v3511_v48, %v2072_v1  ;;  %vm2635_vm1 = vcmask 0  }
0x1036   :  { %v2087_v63 = vmul.f32 %v2076_v52, %v4043_v53 }
0x1037   :  { %v2080_v61 = vmul.f32 0.5, %v2079_v60 }
0x1038   :  { %v2090_v14 = vmul.f32 %v3418_v20, %v2087_v63 }
0x1039   :  { %v2081_v62 = vsub.f32 1.5, %v2080_v61 }
0x103a   :  { %v4062_v7 = vadd.f32 %v3419_v5, %v2090_v14 }
0x103b   :  { %v2082_v2 = vmul.f32 %v3513_v0, %v2081_v62 }
0x103d   :  { %v2086_v9 = vsel %vm2085_vm4, %v3513_v0, %v2082_v2 }
0x103e   :  { %v2088_v16 = vmul.f32 %v2086_v9, %v4048_v29  ;;  %v3337_v29 = vld [vmem:[#allocation9 + $0xf8] sm:$0xff] }
0x103f   :  { %2411 = vmatpush.bf16.msrb.mxu0 %v3337_v29 }
0x1040   :  { %v2091_v6 = vmul.f32 %v3418_v20, %v2088_v16 }
0x1042   :  { %v4064_v8 = vadd.f32 %v3419_v5, %v2091_v6 }
0x1043   :  { %2412 = vmatpush.bf16.msrb.mxu0 %v3336_v13 }
0x1044   :  { %v2112_v53 = vpack.c.bf16 %v4064_v8, %v4062_v7 }
0x1046   :  { %2208 = vmatmul.bf16.vlgmr.msra.gmra.mxu1 %v2112_v53  ;;  %2222 = vmatmul.bf16.vlgmr.msra.gmra.mxu2 %v2112_v53 }
0x1047   :  { %2413 = vmatpush.bf16.msrb.mxu0 %v3335_v18 }
0x104b   :  { %2414 = vmatpush.bf16.msrb.mxu0 %v3334_v21 }
0x104f   :  { %2415 = vmatpush.bf16.msrb.mxu0 %v3333_v17 }
0x1053   :  { %2416 = vmatpush.bf16.msrb.mxu0 %v3332_v24 }
0x1057   :  { %2417 = vmatpush.bf16.msrb.mxu0 %v3331_v28 }
0x105b   :  { %2418 = vmatpush.bf16.msrb.mxu0 %v3330_v34 }
0x10c3   :  { %v2209_v25 = vpop.f32.mrf.mxu1 }
0x10c4   :  { %v2210_v27 = vadd.f32 %v2209_v25, %v2116_v23 }
0x10c6   :  { %v2228_v30 = vmul.f32 %v2210_v27, %v2210_v27 }
0x10c8   :  { %v2232_v32 = vmul.f32 %v2228_v30, %v2210_v27 }
0x10c9   :  { %v2223_v33 = vpop.f32.mrf.mxu2 }
0x10ca   :  { %v2236_v36 = vmul.f32 0.044715, %v2232_v32  ;;  %v2224_v37 = vadd.f32 %v2223_v33, %v2117_v31 }
0x10cb   :  { %v2211_v38 = vpop.f32.mrf.mxu1 }
0x10cc   :  { %v2240_v39 = vadd.f32 %v2236_v36, %v2210_v27  ;;  %v2229_v40 = vmul.f32 %v2224_v37, %v2224_v37  ;;  %v2212_v41 = vadd.f32 %v2211_v38, %v2116_v23  ;;  %v3343_v36 = vld [vmem:[%s4143_s11 + $0x28] sm:$0xff]  ;;  %v3341_v38 = vld [vmem:[%s4143_s11 + $0x18] sm:$0xff] }
0x10ce   :  { %v2244_v56 = vmul.f32 0.7978846, %v2240_v39  ;;  %v2233_v4 = vmul.f32 %v2229_v40, %v2224_v37  ;;  %v2230_v42 = vmul.f32 %v2212_v41, %v2212_v41  ;;  %v3340_v39 = vld [vmem:[%s4143_s11 + $0x10] sm:$0xff] }
0x10d0   :  { %v2237_v43 = vmul.f32 0.044715, %v2233_v4  ;;  %v2234_v44 = vmul.f32 %v2230_v42, %v2212_v41  ;;  %3514 = vtanh.f32 %v2244_v56  ;;  %v3339_v56 = vld [vmem:[%s4143_s11 + $0x8] sm:$0xff]  ;;  %v3338_v42 = vld [vmem:[%s4143_s11] sm:$0xff] }
0x10d1   :  { %v2225_v45 = vpop.f32.mrf.mxu2 }
0x10d2   :  { %v2241_v46 = vadd.f32 %v2237_v43, %v2224_v37  ;;  %v2238_v47 = vmul.f32 0.044715, %v2234_v44  ;;  %v2226_v48 = vadd.f32 %v2225_v45, %v2117_v31  ;;  %v2560_v45 = vld [vmem:[%s4134_s2] sm:$0x3] }
0x10d4   :  { %v2245_v50 = vmul.f32 0.7978846, %v2241_v46  ;;  %v2242_v51 = vadd.f32 %v2238_v47, %v2212_v41  ;;  %v2231_v54 = vmul.f32 %v2226_v48, %v2226_v48 }
0x10d6   :  { %v2246_v55 = vmul.f32 0.7978846, %v2242_v51  ;;  %v2235_v35 = vmul.f32 %v2231_v54, %v2226_v48  ;;  %3516 = vtanh.f32 %v2245_v50  ;;  %v3515_v0 = vpop.eup %3514 }
0x10d7   :  { %v2252_v60 = vadd.f32 1.0, %v3515_v0 }
0x10d8   :  { %3518 = vtanh.f32 %v2246_v55  ;;  %v2239_v1 = vmul.f32 0.044715, %v2235_v35 }
0x10d9   :  { %v2256_v63 = vmul.f32 0.5, %v2252_v60 }
0x10da   :  { %v2243_v59 = vadd.f32 %v2239_v1, %v2226_v48 }
0x10db   :  { %v2260_v16 = vmul.f32 %v2256_v63, %v2210_v27 }
0x10dc   :  { %v2247_v52 = vmul.f32 0.7978846, %v2243_v59  ;;  %v3517_v61 = vpop.eup %3516 }
0x10dd   :  { %v2253_v2 = vadd.f32 1.0, %v3517_v61  ;;  %v3421_v61 = vld [vmem:[%s4137_s5 + $0x12] ss:$0 sm:$0xff] }
0x10de   :  { %v3519_v62 = vpop.eup %3518  ;;  %3520 = vtanh.f32 %v2247_v52 }
0x10df   :  { %v2254_v20 = vadd.f32 1.0, %v3519_v62  ;;  %v2257_v6 = vmul.f32 0.5, %v2253_v2 }
0x10e1   :  { %v2258_v9 = vmul.f32 0.5, %v2254_v20  ;;  %v2261_v29 = vmul.f32 %v2257_v6, %v2224_v37  ;;  %v3342_v37 = vld [vmem:[%s4143_s11 + $0x20] sm:$0xff] }
0x10e3   :  { %v2262_v14 = vmul.f32 %v2258_v9, %v2212_v41 }
0x10e4   :  { %v3521_v5 = vpop.eup %3520 }
0x10e5   :  { %v2255_v53 = vadd.f32 1.0, %v3521_v5  ;;  %v2297_v10 = vpack.c.bf16 %v2262_v14, %v2260_v16  ;;  %v3422_v16 = vld [vmem:[%s4137_s5 + $0x13] ss:$0 sm:$0xff] }
0x10e7   :  { %v2259_v11 = vmul.f32 0.5, %v2255_v53  ;;  %2405 = vmatmul.bf16.vlgmr.msra.gmra.mxu3 %v2297_v10 }
0x10e9   :  { %v2263_v12 = vmul.f32 %v2259_v11, %v2226_v48  ;;  %v3677_v11 = vmov 0.0  }
0x10ea   :  { %2631 = vst [vmem:[%s4144_s12] sm:$0xff] %v3677_v11 }
0x10eb   :  { %v2298_v13 = vpack.c.bf16 %v2263_v12, %v2261_v29  ;;  %v3423_v29 = vld [vmem:[%s4137_s5 + $0x14] ss:$0 sm:$0xff] }
0x10ed   :  { %2419 = vmatmul.bf16.vlgmr.msrb.gmra.mxu0 %v2298_v13 }
0x116a   :  { %v2406_v18 = vpop.f32.mrf.mxu3  ;;  %v2420_v19 = vpop.f32.mrf.mxu0 }
0x116b   :  { %v2407_v21 = vadd.f32 %v3420_v15, %v2406_v18 }
0x116d   :  { %v2421_v22 = vadd.f32 %v2420_v19, %v2407_v21  ;;  %v2598_v19 = vld [vmem:[%s4135_s3] sm:$0x3]  ;;  %s3679_s3 = smov 112  }
0x116f   :  { %v2425_v57 = vadd.f32 %v2421_v22, %v4062_v7  ;;  %v3345_v7 = vld [vmem:[%s4143_s11 + $0x38] sm:$0xff] }
0x1170   :  { %2547 = vmatpush.bf16.msrb.mxu1 %v3345_v7 }
0x1171   :  { %2429 = vadd.xlane.f32.xlu1 %v2425_v57 }
0x1172   :  { %v2408_v17 = vpop.f32.mrf.mxu3  ;;  %v2422_v23 = vpop.f32.mrf.mxu0 }
0x1173   :  { %v2409_v58 = vadd.f32 %v3420_v15, %v2408_v17 }
0x1175   :  { %v2423_v24 = vadd.f32 %v2422_v23, %v2409_v58 }
0x1177   :  { %v2426_v25 = vadd.f32 %v2423_v24, %v4064_v8  ;;  %v3344_v8 = vld [vmem:[%s4143_s11 + $0x30] sm:$0xff] }
0x1178   :  { %2548 = vmatpush.bf16.msrb.mxu1 %v3344_v8 }
0x1179   :  { %2431 = vadd.xlane.f32.xlu0 %v2426_v25 }
0x117c   :  { %2549 = vmatpush.bf16.msrb.mxu1 %v3343_v36 }
0x1180   :  { %2550 = vmatpush.bf16.msrb.mxu1 %v3342_v37 }
0x1184   :  { %2551 = vmatpush.bf16.msrb.mxu1 %v3341_v38 }
0x1188   :  { %2552 = vmatpush.bf16.msrb.mxu1 %v3340_v39 }
0x118c   :  { %2553 = vmatpush.bf16.msrb.mxu1 %v3339_v56 }
0x1190   :  { %2554 = vmatpush.bf16.msrb.mxu1 %v3338_v42 }
0x11e4   :  { %v2430_v26 = vpop.xlane.xlu1 %2429 }
0x11e5   :  { %v2433_v27 = vmul.f32 %v2430_v26, %v3798_v49 }
0x11e7   :  { %v2435_v28 = vsub.f32 %v2425_v57, %v2433_v27 }
0x11e9   :  { %v2437_v30 = vmul.f32 %v2435_v28, %v2435_v28 }
0x11eb   :  { %2439 = vadd.xlane.f32.xlu1 %v2437_v30 }
0x11ec   :  { %v2432_v31 = vpop.xlane.xlu0 %2431 }
0x11ed   :  { %v2434_v32 = vmul.f32 %v2432_v31, %v3798_v49 }
0x11ef   :  { %v2436_v33 = vsub.f32 %v2426_v25, %v2434_v32 }
0x11f1   :  { %v2438_v34 = vmul.f32 %v2436_v33, %v2436_v33 }
0x11f3   :  { %2441 = vadd.xlane.f32.xlu0 %v2438_v34 }
0x1204   :  { %2562 = vperm.xlu1 %3401, %v2560_v45  }
0x125e   :  { %v2440_v40 = vpop.xlane.xlu1 %2439 }
0x125f   :  { %v2443_v41 = vmul.f32 %v2440_v40, %v3798_v49 }
0x1261   :  { %v2445_v4 = vadd.f32 1e-12, %v2443_v41 }
0x1263   :  { %3522 = vrsqrt.f32 %v2445_v4  ;;  %vm2453_vm6 = vweird.f32 %v2445_v4 }
0x1266   :  { %v2442_v43 = vpop.xlane.xlu0 %2441 }
0x1267   :  { %v2444_v44 = vmul.f32 %v2442_v43, %v3798_v49 }
0x1269   :  { %v3523_v46 = vpop.eup %3522  ;;  %v2446_v47 = vadd.f32 1e-12, %v2444_v44 }
0x126a   :  { %v2448_v48 = vmul.f32 %v3523_v46, %v2445_v4  ;;  %vm2454_vm5 = vweird.f32 %v3523_v46 }
0x126b   :  { %3524 = vrsqrt.f32 %v2446_v47  ;;  %vm2455_vm7 = vmor %vm2453_vm6, %vm2454_vm5  ;;  %vm2463_vm9 = vweird.f32 %v2446_v47 }
0x126c   :  { %v2449_v50 = vmul.f32 %v3523_v46, %v2448_v48 }
0x126e   :  { %v2450_v51 = vmul.f32 0.5, %v2449_v50 }
0x1270   :  { %v2451_v54 = vsub.f32 1.5, %v2450_v51 }
0x1271   :  { %v3525_v55 = vpop.eup %3524 }
0x1272   :  { %v2458_v35 = vmul.f32 %v3525_v55, %v2446_v47  ;;  %v2452_v0 = vmul.f32 %v3523_v46, %v2451_v54  ;;  %vm2464_vm8 = vweird.f32 %v3525_v55 }
0x1273   :  { %vm2465_vm10 = vmor %vm2463_vm9, %vm2464_vm8 }
0x1274   :  { %v2459_v1 = vmul.f32 %v3525_v55, %v2458_v35  ;;  %v2456_v49 = vsel %vm2455_vm7, %v3523_v46, %v2452_v0 }
0x1275   :  { %v2467_v62 = vmul.f32 %v2456_v49, %v2435_v28 }
0x1276   :  { %v2460_v59 = vmul.f32 0.5, %v2459_v1  ;;  %v2563_v25 = vpop.permute.xlu1 %2562 }
0x1277   :  { %v2470_v2 = vmul.f32 %v3421_v61, %v2467_v62  ;;  %vm2564_vm14 = vcmp.eq.s32.totalorder %v3764_v3, %v2563_v25 }
0x1278   :  { %v2461_v60 = vsub.f32 1.5, %v2460_v59  ;;  %v3209_v30 = vsel %vm2564_vm14, 1.0, %v3677_v11 }
0x1279   :  { %v2473_v5 = vadd.f32 %v3422_v16, %v2470_v2 }
0x127a   :  { %v2462_v52 = vmul.f32 %v3525_v55, %v2461_v60 }
0x127c   :  { %v2466_v63 = vsel %vm2465_vm10, %v3525_v55, %v2462_v52 }
0x127d   :  { %v2468_v20 = vmul.f32 %v2466_v63, %v2436_v33 }
0x127f   :  { %v2471_v9 = vmul.f32 %v3421_v61, %v2468_v20 }
0x1281   :  { %v2474_v14 = vadd.f32 %v3422_v16, %v2471_v9 }
0x1283   :  { %v2476_v6 = vrot.slane %v2474_v14, 7 }
0x1285   :  { %v2479_v53 = vsel %vm2478_vm11, %v2473_v5, %v2476_v6 }
0x1286   :  { %v2497_v10 = vpack.c.bf16 %v2479_v53, %v2479_v53 }
0x1288   :  { %2555 = vmatmul.bf16.vlgmr.msrb.gmra.mxu1 %v2497_v10 }
0x1305   :  { %v2556_v12 = vpop.f32.mrf.mxu1 }
0x1306   :  { %v2557_v13 = vadd.f32 %v3423_v29, %v2556_v12 }
0x1308   :  { %2633 = vst.msk [vmem:[%s4144_s12] sm:$0x3] %vm2632_vm12, %v2557_v13  ;;  %v2568_v15 = vsel %vm2567_vm13, %v2557_v13, -inf  ;;  %v2606_v21 = vand.u32 2147483647, %v2557_v13  ;;  %v2580_v31 = vmul.f32 %v3209_v30, %v2557_v13  ;;  %v2599_v34 = vmax.f32 %v2557_v13, 0.0 }
0x1309   :  { %2569 = vmax.xlane.f32.xlu0 %v2568_v15 }
0x130a   :  { %v2607_v22 = vsub.f32 0.0, %v2606_v21  ;;  %v2581_v8 = vsel %vm2567_vm13, %v2580_v31, 0.0 }
0x130c   :  { %v2608_v57 = vmul.f32 1.442695, %v2607_v22 }
0x130d   :  { %v2558_v18 = vpop.f32.mrf.mxu1 }
0x130e   :  { %3526 = vpow2.f32 %v2608_v57 }
0x1314   :  { %v3527_v24 = vpop.eup %3526 }
0x1315   :  { %v2610_v26 = vadd.f32 1.0, %v3527_v24 }
0x131d   :  { %2601 = vrot.lane.b32.xlu0 %v2598_v19, %s3678_s10 }
0x137c   :  { %v2570_v17 = vpop.xlane.xlu0 %2569 }
0x137d   :  { %v2571_v58 = vsub.f32 %v2557_v13, %v2570_v17 }
0x137f   :  { %v2572_v23 = vmul.f32 1.442695, %v2571_v58 }
0x1381   :  { %3528 = vpow2.f32 %v2572_v23 }
0x1382   :  { %3530 = vlog2.f32 %v2610_v26 }
0x1387   :  { %v3529_v27 = vpop.eup %3528 }
0x1388   :  { %v2574_v28 = vsel %vm2567_vm13, %v3529_v27, 0.0  ;;  %v3531_v32 = vpop.eup %3530 }
0x1389   :  { %2575 = vadd.xlane.f32.xlu2 %v2574_v28  ;;  %v2612_v37 = vmul.f32 0.6931472, %v3531_v32 }
0x138f   :  { %v2602_v33 = vpop.permute.xlu0 %2601 }
0x1390   :  { %v2604_v7 = vmul.f32 %v2602_v33, %v2557_v13 }
0x1391   :  { %2582 = vadd.xlane.f32.xlu2 %v2581_v8 }
0x1392   :  { %v2605_v36 = vsub.f32 %v2599_v34, %v2604_v7 }
0x1394   :  { %v2613_v38 = vadd.f32 %v2612_v37, %v2605_v36 }
0x1396   :  { %2615 = vrot.lane.b32.xlu1 %v2613_v38, %s3679_s3 }
0x13fc   :  { %v2576_v3 = vpop.xlane.xlu2 %2575 }
0x13fd   :  { %3532 = vlog2.f32 %v2576_v3 }
0x1403   :  { %v3533_v39 = vpop.eup %3532 }
0x1404   :  { %v2578_v40 = vmul.f32 0.6931472, %v3533_v39  ;;  %v2583_v56 = vpop.xlane.xlu2 %2582 }
0x1406   :  { %v2579_v41 = vadd.f32 %v2578_v40, %v2570_v17 }
0x1408   :  { %v2584_v4 = vsub.f32 %v2579_v41, %v2583_v56  ;;  %v2616_v42 = vpop.permute.xlu1 %2615 }
0x1409   :  { %v2619_v43 = vsel %vm2618_vm15, %v2616_v42, 0.0 }
0x140a   :  { %2620 = vadd.xlane.f32.xlu2 %v2619_v43  ;;  %v2586_v44 = vsel %vm2585_vm0, %v2584_v4, 0.0 }
0x140b   :  { %2587 = vadd.xlane.f32.xlu0 %v2586_v44 }
0x147d   :  { %v2621_v45 = vpop.xlane.xlu2 %2620 }
0x147e   :  { %v2622_v46 = vrot.slane %v2621_v45, 4  ;;  %v2588_v47 = vpop.xlane.xlu0 %2587 }
0x147f   :  { %v2589_v48 = vrot.slane %v2588_v47, 4 }
0x1480   :  { %v2623_v50 = vadd.f32 %v2622_v46, %v2621_v45 }
0x1481   :  { %v2590_v51 = vadd.f32 %v2589_v48, %v2588_v47 }
0x1482   :  { %v2624_v54 = vrot.slane %v2623_v50, 2 }
0x1483   :  { %v2591_v55 = vrot.slane %v2590_v51, 2 }
0x1484   :  { %v2625_v35 = vadd.f32 %v2624_v54, %v2623_v50 }
0x1485   :  { %v2592_v0 = vadd.f32 %v2591_v55, %v2590_v51 }
0x1486   :  { %v2626_v1 = vrot.slane %v2625_v35, 1 }
0x1487   :  { %v2593_v59 = vrot.slane %v2592_v0, 1 }
0x1488   :  { %v2627_v49 = vadd.f32 %v2626_v1, %v2625_v35 }
0x1489   :  { %v2594_v60 = vadd.f32 %v2593_v59, %v2592_v0 }
0x148b   :  { %3346 = vpush %v2594_v60 }
0x148c   :  { %3348 = vpush %v2627_v49 }
0x14bc   :  { %s3347_s5 = spop %3346 }
0x14bd   :  { %v2596_v52 = vstv %s3347_s5  ;;  %s3349_s30 = spop %3348 }
0x14be   :  { %v2597_v61 = vmul.f32 0.5, %v2596_v52  ;;  %v2629_v62 = vstv %s3349_s30 }
0x14bf   :  { %v2630_v63 = vmul.f32 0.0625, %v2629_v62 }
0x14c1   :  { %v2634_v20 = vadd.f32 %v2630_v63, %v2597_v61 }
0x14c3   :  { %2636 = vst.msk [vmem:[%s4144_s12 + $0x2] sm:$0x1] %vm2635_vm1, %v2634_v20 }
0x14c4   :  { %2641 = vsyncpa [#allocation3], 1 }
0x14c5   :  { %2642 = vsyncpa [#allocation5], 1 }
0x14c6   :  { %2643 = vsyncpa [#allocation8], 1 }

</bundles_post_ra>
